<compile_context>
chip_gen: v7x
topology: tpu7x:2x2x1
jax: 0.10.0
libtpu: 0.0.40
codegen_flags: <defaults>
</compile_context>

<pallas_src>
import functools

import jax
import jax.numpy as jnp
from jax.experimental import pallas as pl
from jax.experimental.pallas import tpu as pltpu

SCALING_MIN_VAL = 2e-16
LANE = 128

# ---------------- quantized-activation helpers (used inside the kernel) -----
RELU3_SCALE = 1.5 / 3.0       # QuantReLU: bit_width=2 (unsigned 0..3), max_val=1.5
RELU4_SCALE = 10.0 / 127.0    # QuantHardTanh: bit_width=8, narrow_range, max_val=10


def relu3_q(x):
    # quantized ReLU: clamp(round(relu(x)/s), 0, 3) * s
    return jnp.clip(jnp.round(jnp.maximum(x, 0.0) / RELU3_SCALE), 0.0, 3.0) * RELU3_SCALE


def relu4_q(x):
    # quantized hard-tanh: clamp(round(x/s), -127, 127) * s (subsumes [-10,10] clip)
    return jnp.clip(jnp.round(x / RELU4_SCALE), -127.0, 127.0) * RELU4_SCALE


def _round_up(x, m):
    return (x + m - 1) // m * m


# ---------------- single fused Pallas kernel (whole group per batch image) --
def _group_kernel(p_hi_ref, p_lo_ref, w0_ref, wd_ref, w15_ref, sb_ref, o_ref,
                  a_buf, b_buf, *, Ho, Wo, Cp):
    f32 = jnp.float32
    M = Ho * Wo

    # zero the padded activation buffers: the 1-pixel halo must read as 0
    # (= conv padding); padded channel lanes also stay 0.
    a_buf[...] = jnp.zeros_like(a_buf)
    b_buf[...] = jnp.zeros_like(b_buf)

    def bn(acc, layer):
        # folded (weight_scale * bn_scale, bn_bias) epilogue
        return acc * sb_ref[layer, 0:1, :] + sb_ref[layer, 1:2, :]

    def store_interior(buf, val):
        buf[1:1 + Ho, 1:1 + Wo, :] = val.reshape(Ho, Wo, Cp)

    def load_interior(buf):
        return buf[1:1 + Ho, 1:1 + Wo, :].reshape(M, Cp)

    def conv3x3(buf, layer):
        """stride-1 pad-1 3x3 conv of the padded VMEM activation (fused im2col:
        9 shifted bf16 matmuls accumulated in f32)."""
        acc = jnp.zeros((M, Cp), f32)
        for k in range(9):
            ky, kx = divmod(k, 3)
            a = buf[ky:ky + Ho, kx:kx + Wo, :].reshape(M, Cp).astype(jnp.bfloat16)
            acc = acc + jnp.dot(a, w15_ref[layer - 1, k, :, :],
                                preferred_element_type=f32)
        return bn(acc, layer)

    # ---- layer 0: binary 3x3 conv (im2col patches; f32 split into bf16 hi/lo) ----
    p_hi = p_hi_ref[0, :, :]
    p_lo = p_lo_ref[0, :, :]
    acc0 = (jnp.dot(p_hi, w0_ref[...], preferred_element_type=f32)
            + jnp.dot(p_lo, w0_ref[...], preferred_element_type=f32))
    a0 = relu3_q(bn(acc0, 0))                 # relu3(bn0(conv0(x)))
    store_interior(a_buf, a0)

    # ---- downsample: int8 1x1 conv on strided x (= centre tap of the patches) + BN
    accd = (jnp.dot(p_hi, wd_ref[...], preferred_element_type=f32)
            + jnp.dot(p_lo, wd_ref[...], preferred_element_type=f32))
    id0 = bn(accd, 6)

    # ---- block 0 ----
    t1 = conv3x3(a_buf, 1)                                   # bn1(conv1(a0))
    x_b1 = relu3_q(relu4_q(t1) + relu4_q(id0))
    store_interior(b_buf, x_b1)

    # ---- block 1 ----
    a2 = relu3_q(conv3x3(b_buf, 2))
    store_interior(a_buf, a2)
    t3 = conv3x3(a_buf, 3)
    x_b2 = relu3_q(relu4_q(t3) + relu4_q(load_interior(b_buf)))
    store_interior(b_buf, x_b2)

    # ---- block 2 ----
    a4 = relu3_q(conv3x3(b_buf, 4))
    store_interior(a_buf, a4)
    t5 = conv3x3(a_buf, 5)
    out = relu3_q(relu4_q(load_interior(b_buf)) + relu4_q(t5))

    o_ref[0, :, :] = out.astype(o_ref.dtype)  # relu3 values exact in bf16


# ---------------- glue: im2col (layer 0 only), weight quant, BN folding -----
def im2col_3x3(x_nhwc, stride):
    """3x3, padding=1 patch extraction for the first (possibly strided) conv."""
    N, H, W, C = x_nhwc.shape
    Ho = (H + 2 - 3) // stride + 1
    Wo = (W + 2 - 3) // stride + 1
    xp = jnp.pad(x_nhwc, ((0, 0), (1, 1), (1, 1), (0, 0)))
    cols = []
    for ky in range(3):
        for kx in range(3):
            cols.append(xp[:, ky: ky + stride * (Ho - 1) + 1: stride,
                           kx: kx + stride * (Wo - 1) + 1: stride, :])
    patches = jnp.concatenate(cols, axis=-1).reshape(N, Ho * Wo, 9 * C)
    return patches, Ho, Wo


def bn_fold(p, eps=1e-5):
    scale = p["gamma"] / jnp.sqrt(p["var"] + eps)
    bias = p["beta"] - p["mean"] * scale
    return scale, bias


def prep_w3x3_mat(w, bn_scale, bn_bias, Cp, K0p):
    """conv0: Brevitas BINARY quant (per-out-channel AVE scale) as a (K0p, Cp)
    +/-1 matrix matching the im2col column order."""
    Cout, Cin = w.shape[0], w.shape[1]
    w_scale = jnp.maximum(jnp.mean(jnp.abs(w).reshape(Cout, -1), axis=1),
                          SCALING_MIN_VAL)
    sign = jnp.where(w >= 0, 1.0, -1.0)
    wmat = jnp.transpose(sign, (2, 3, 1, 0)).reshape(9 * Cin, Cout)
    wmat = jnp.pad(wmat, ((0, K0p - 9 * Cin), (0, Cp - Cout)))
    s = jnp.pad(w_scale * bn_scale, (0, Cp - Cout))
    b = jnp.pad(bn_bias, (0, Cp - Cout))
    return wmat.astype(jnp.bfloat16), s, b


def prep_w3x3_taps(w, bn_scale, bn_bias, Cp):
    """conv1..5: BINARY quant as (9, Cp, Cp) per-tap matrices for in-VMEM
    shifted matmuls (fused im2col)."""
    Cout, Cin = w.shape[0], w.shape[1]
    w_scale = jnp.maximum(jnp.mean(jnp.abs(w).reshape(Cout, -1), axis=1),
                          SCALING_MIN_VAL)
    sign = jnp.where(w >= 0, 1.0, -1.0)
    taps = jnp.transpose(sign, (2, 3, 1, 0)).reshape(9, Cin, Cout)
    taps = jnp.pad(taps, ((0, 0), (0, Cp - Cin), (0, Cp - Cout)))
    s = jnp.pad(w_scale * bn_scale, (0, Cp - Cout))
    b = jnp.pad(bn_bias, (0, Cp - Cout))
    return taps.astype(jnp.bfloat16), s, b


def prep_w1x1_mat(w, bn_scale, bn_bias, Cp, K0p, Cin):
    """downsample: Brevitas INT8 narrow-range quant (per-out-channel MAX scale);
    codes placed at the centre-tap rows of the conv0 patch matrix."""
    Cexp = w.shape[0]
    w2 = w[:, :, 0, 0]
    ws = jnp.maximum(jnp.max(jnp.abs(w2), axis=1) / 127.0, SCALING_MIN_VAL)
    codes = jnp.clip(jnp.round(w2 / ws[:, None]), -127.0, 127.0)     # (Cexp, Cin)
    wmat = jnp.zeros((K0p, Cp), jnp.float32)
    wmat = wmat.at[4 * Cin:5 * Cin, :Cexp].set(codes.T)              # centre tap
    s = jnp.pad(ws * bn_scale, (0, Cp - Cexp))
    b = jnp.pad(bn_bias, (0, Cp - Cexp))
    return wmat.astype(jnp.bfloat16), s, b


# ---------------- full forward ----------------------------------------------
def group_explore0_forward(x_nchw, params, stride_first):
    N, Cin, H, W = x_nchw.shape
    Cout = params["conv0_w"].shape[0]
    Cexp = params["down_w"].shape[0]
    Cp = _round_up(max(Cout, Cexp), LANE)          # lane-dense padded channel dim
    K0p = _round_up(9 * Cin, LANE)

    x = jnp.transpose(x_nchw, (0, 2, 3, 1)).astype(jnp.float32)   # NHWC

    # layer-0 im2col (the only HBM-read activation); bf16 hi/lo split of f32
    patches, Ho, Wo = im2col_3x3(x, stride_first)
    M = Ho * Wo
    patches = jnp.pad(patches, ((0, 0), (0, 0), (0, K0p - 9 * Cin)))
    p_hi = patches.astype(jnp.bfloat16)
    p_lo = (patches - p_hi.astype(jnp.float32)).astype(jnp.bfloat16)

    # weight quantization + BN folding -> packed resident operands
    s0, b0 = bn_fold(params["bn0"])
    w0, sc0, bi0 = prep_w3x3_mat(params["conv0_w"], s0, b0, Cp, K0p)
    sd, bd = bn_fold(params["bn_down"])
    wd, scd, bid = prep_w1x1_mat(params["down_w"], sd, bd, Cp, K0p, Cin)

    taps, scales, biases = [], [sc0], [bi0]
    for l in range(1, 6):
        s, b = bn_fold(params[f"bn{l}"])
        t, sc, bi = prep_w3x3_taps(params[f"conv{l}_w"], s, b, Cp)
        taps.append(t)
        scales.append(sc)
        biases.append(bi)
    scales.append(scd)
    biases.append(bid)
    w15 = jnp.stack(taps)                                                  # (5,9,Cp,Cp) bf16
    sb = jnp.stack([jnp.stack(scales), jnp.stack(biases)], axis=1)         # (7,2,Cp)
    sb = sb.astype(jnp.float32)

    kernel = functools.partial(_group_kernel, Ho=Ho, Wo=Wo, Cp=Cp)

    flops = 2 * N * M * (4 * K0p * Cp + 45 * Cp * Cp)
    bytes_acc = ((p_hi.size + p_lo.size + w0.size + wd.size + w15.size) * 2
                 + sb.size * 4 + N * M * Cp * 2)

    out = pl.pallas_call(
        kernel,
        out_shape=jax.ShapeDtypeStruct((N, M, Cp), jnp.bfloat16),
        grid=(N,),
        in_specs=[
            pl.BlockSpec((1, M, K0p), lambda n: (n, 0, 0)),       # patches hi
            pl.BlockSpec((1, M, K0p), lambda n: (n, 0, 0)),       # patches lo
            pl.BlockSpec((K0p, Cp), lambda n: (0, 0)),            # conv0 codes (resident)
            pl.BlockSpec((K0p, Cp), lambda n: (0, 0)),            # downsample codes
            pl.BlockSpec((5, 9, Cp, Cp), lambda n: (0, 0, 0, 0)), # conv1..5 per-tap codes
            pl.BlockSpec((7, 2, Cp), lambda n: (0, 0, 0)),        # folded scale/bias
        ],
        out_specs=pl.BlockSpec((1, M, Cp), lambda n: (n, 0, 0)),
        scratch_shapes=[pltpu.VMEM((Ho + 2, Wo + 2, Cp), jnp.float32),
                        pltpu.VMEM((Ho + 2, Wo + 2, Cp), jnp.float32)],
        compiler_params=pltpu.CompilerParams(
            dimension_semantics=("parallel",),
            vmem_limit_bytes=64 * 1024 * 1024,
        ),
        cost_estimate=pl.CostEstimate(flops=int(flops), transcendentals=0,
                                      bytes_accessed=int(bytes_acc)),
    )(p_hi, p_lo, w0, wd, w15, sb)

    out = out[:, :, :Cout].astype(jnp.float32).reshape(N, Ho, Wo, Cout)
    return jnp.transpose(out, (0, 3, 1, 2))        # back to NCHW


# ---------------- deterministic parameter init -------------------------------
def init_params(key, in_planes, out_planes, expansion):
    ks = jax.random.split(key, 16)

    def conv_w(k, cout, cin, ksz):
        return 0.1 * jax.random.normal(k, (cout, cin, ksz, ksz), jnp.float32)

    def bn_p(k, c):
        k1, k2, k3, k4 = jax.random.split(k, 4)
        return dict(
            gamma=1.0 + 0.1 * jax.random.normal(k1, (c,), jnp.float32),
            beta=0.1 * jax.random.normal(k2, (c,), jnp.float32),
            mean=0.1 * jax.random.normal(k3, (c,), jnp.float32),
            var=0.5 + jax.random.uniform(k4, (c,), jnp.float32),
        )

    cexp = out_planes * expansion
    return dict(
        conv0_w=conv_w(ks[0], out_planes, in_planes, 3),
        conv1_w=conv_w(ks[1], out_planes, out_planes, 3),
        conv2_w=conv_w(ks[2], out_planes, out_planes, 3),
        conv3_w=conv_w(ks[3], out_planes, out_planes, 3),
        conv4_w=conv_w(ks[4], out_planes, out_planes, 3),
        conv5_w=conv_w(ks[5], out_planes, out_planes, 3),
        down_w=conv_w(ks[6], cexp, in_planes, 1),
        bn0=bn_p(ks[7], out_planes),
        bn1=bn_p(ks[8], out_planes),
        bn2=bn_p(ks[9], out_planes),
        bn3=bn_p(ks[10], out_planes),
        bn4=bn_p(ks[11], out_planes),
        bn5=bn_p(ks[12], out_planes),
        bn_down=bn_p(ks[13], cexp),
    )


if __name__ == "__main__":
    key = jax.random.PRNGKey(0)
    kx, kp = jax.random.split(key)

    # module config: first=True, stride_first=2, expansion=1 (exercises the
    # conv1x1 + BN downsample branch and the strided first conv)
    N, in_planes, H, W = 2, 4, 16, 16
    out_planes, expansion, stride_first = 8, 1, 2

    x = jax.random.normal(kx, (N, in_planes, H, W), jnp.float32)
    params = init_params(kp, in_planes, out_planes, expansion)

    fwd = jax.jit(group_explore0_forward, static_argnums=2)
    out = jax.block_until_ready(fwd(x, params, stride_first))
    assert out.shape == (N, out_planes * expansion, H // stride_first, W // stride_first)
    assert bool(jnp.all(jnp.isfinite(out)))
    print("KERNEL_OK")
</pallas_src>

<mosaic_0001>
module attributes {stable_mosaic.version = 11 : i64} {
  func.func @_group_kernel(%arg0: i32, %arg1: memref<1x64x128xbf16, #tpu.memory_space<vmem>>, %arg2: memref<1x64x128xbf16, #tpu.memory_space<vmem>>, %arg3: memref<128x128xbf16, #tpu.memory_space<vmem>>, %arg4: memref<128x128xbf16, #tpu.memory_space<vmem>>, %arg5: memref<5x9x128x128xbf16, #tpu.memory_space<vmem>>, %arg6: memref<7x2x128xf32, #tpu.memory_space<vmem>>, %arg7: memref<1x64x128xbf16, #tpu.memory_space<vmem>>, %arg8: memref<10x10x128xf32, #tpu.memory_space<vmem>>, %arg9: memref<10x10x128xf32, #tpu.memory_space<vmem>>) attributes {dimension_semantics = [#tpu.dimension_semantics<parallel>], iteration_bounds = array<i64: 2>, scalar_prefetch = 0 : i64, scratch_operands = 2 : i64, tpu.core_type = #tpu.core_type<tc>, window_params = [{transform_indices = @transform_0, window_bounds = array<i64: 1, 64, 128>}, {transform_indices = @transform_1, window_bounds = array<i64: 1, 64, 128>}, {pipeline_mode = #tpu.pipeline_mode<synchronous>, transform_indices = @transform_2, window_bounds = array<i64: 128, 128>}, {pipeline_mode = #tpu.pipeline_mode<synchronous>, transform_indices = @transform_3, window_bounds = array<i64: 128, 128>}, {pipeline_mode = #tpu.pipeline_mode<synchronous>, transform_indices = @transform_4, window_bounds = array<i64: 5, 9, 128, 128>}, {pipeline_mode = #tpu.pipeline_mode<synchronous>, transform_indices = @transform_5, window_bounds = array<i64: 7, 2, 128>}, {transform_indices = @transform_6, window_bounds = array<i64: 1, 64, 128>}]} {
    %cst = arith.constant 0.000000e+00 : f32
    %0 = vector.broadcast %cst : f32 to vector<10x10x128xf32>
    %c0 = arith.constant 0 : index
    %c0_0 = arith.constant 0 : index
    %c0_1 = arith.constant 0 : index
    %1 = vector.load %arg8[%c0, %c0_0, %c0_1] : memref<10x10x128xf32, #tpu.memory_space<vmem>>, vector<10x10x128xf32>
    tpu.vector_store %arg8[%c0, %c0_0, %c0_1], %0 {strides = array<i32>} : memref<10x10x128xf32, #tpu.memory_space<vmem>>, vector<10x10x128xf32>,
    %cst_2 = arith.constant 0.000000e+00 : f32
    %2 = vector.broadcast %cst_2 : f32 to vector<10x10x128xf32>
    %c0_3 = arith.constant 0 : index
    %c0_4 = arith.constant 0 : index
    %c0_5 = arith.constant 0 : index
    %3 = vector.load %arg9[%c0_3, %c0_4, %c0_5] : memref<10x10x128xf32, #tpu.memory_space<vmem>>, vector<10x10x128xf32>
    tpu.vector_store %arg9[%c0_3, %c0_4, %c0_5], %2 {strides = array<i32>} : memref<10x10x128xf32, #tpu.memory_space<vmem>>, vector<10x10x128xf32>,
    %c0_6 = arith.constant 0 : index
    %c0_7 = arith.constant 0 : index
    %c0_8 = arith.constant 0 : index
    %4 = vector.load %arg1[%c0_6, %c0_7, %c0_8] : memref<1x64x128xbf16, #tpu.memory_space<vmem>>, vector<1x64x128xbf16>
    %5 = vector.shape_cast %4 : vector<1x64x128xbf16> to vector<64x128xbf16>
    %c0_9 = arith.constant 0 : index
    %c0_10 = arith.constant 0 : index
    %c0_11 = arith.constant 0 : index
    %6 = vector.load %arg2[%c0_9, %c0_10, %c0_11] : memref<1x64x128xbf16, #tpu.memory_space<vmem>>, vector<1x64x128xbf16>
    %7 = vector.shape_cast %6 : vector<1x64x128xbf16> to vector<64x128xbf16>
    %c0_12 = arith.constant 0 : index
    %c0_13 = arith.constant 0 : index
    %8 = vector.load %arg3[%c0_12, %c0_13] : memref<128x128xbf16, #tpu.memory_space<vmem>>, vector<128x128xbf16>
    %cst_14 = arith.constant dense<0.000000e+00> : vector<64x128xf32>
    %9 = tpu.matmul %5, %8, %cst_14 {dimension_numbers = #tpu.dot_dimension_numbers<[1], [0], [0], [1], [0, 0, 1, 1], [], []>} : vector<64x128xbf16>, vector<128x128xbf16>, vector<64x128xf32> -> vector<64x128xf32>
    %c0_15 = arith.constant 0 : index
    %c0_16 = arith.constant 0 : index
    %10 = vector.load %arg3[%c0_15, %c0_16] : memref<128x128xbf16, #tpu.memory_space<vmem>>, vector<128x128xbf16>
    %cst_17 = arith.constant dense<0.000000e+00> : vector<64x128xf32>
    %11 = tpu.matmul %7, %10, %cst_17 {dimension_numbers = #tpu.dot_dimension_numbers<[1], [0], [0], [1], [0, 0, 1, 1], [], []>} : vector<64x128xbf16>, vector<128x128xbf16>, vector<64x128xf32> -> vector<64x128xf32>
    %12 = arith.addf %9, %11 : vector<64x128xf32>
    %c0_18 = arith.constant 0 : index
    %c0_19 = arith.constant 0 : index
    %c0_20 = arith.constant 0 : index
    %13 = vector.load %arg6[%c0_18, %c0_19, %c0_20] : memref<7x2x128xf32, #tpu.memory_space<vmem>>, vector<1x1x128xf32>
    %14 = vector.shape_cast %13 : vector<1x1x128xf32> to vector<1x128xf32>
    %15 = vector.broadcast %14 : vector<1x128xf32> to vector<64x128xf32>
    %16 = arith.mulf %12, %15 : vector<64x128xf32>
    %c0_21 = arith.constant 0 : index
    %c1 = arith.constant 1 : index
    %c0_22 = arith.constant 0 : index
    %17 = vector.load %arg6[%c0_21, %c1, %c0_22] : memref<7x2x128xf32, #tpu.memory_space<vmem>>, vector<1x1x128xf32>
    %18 = vector.shape_cast %17 : vector<1x1x128xf32> to vector<1x128xf32>
    %19 = vector.broadcast %18 : vector<1x128xf32> to vector<64x128xf32>
    %20 = arith.addf %16, %19 : vector<64x128xf32>
    %cst_23 = arith.constant 0.000000e+00 : f32
    %21 = vector.broadcast %cst_23 : f32 to vector<64x128xf32>
    %22 = arith.maximumf %20, %21 : vector<64x128xf32>
    %cst_24 = arith.constant 5.000000e-01 : f32
    %23 = vector.broadcast %cst_24 : f32 to vector<64x128xf32>
    %24 = arith.divf %22, %23 : vector<64x128xf32>
    %25 = math.roundeven %24 : vector<64x128xf32>
    %cst_25 = arith.constant 0.000000e+00 : f32
    %cst_26 = arith.constant 3.000000e+00 : f32
    %26 = vector.broadcast %cst_25 : f32 to vector<64x128xf32>
    %27 = arith.maximumf %26, %25 : vector<64x128xf32>
    %28 = vector.broadcast %cst_26 : f32 to vector<64x128xf32>
    %29 = arith.minimumf %28, %27 : vector<64x128xf32>
    %cst_27 = arith.constant 5.000000e-01 : f32
    %30 = vector.broadcast %cst_27 : f32 to vector<64x128xf32>
    %31 = arith.mulf %29, %30 : vector<64x128xf32>
    %32 = vector.shape_cast %31 : vector<64x128xf32> to vector<8x8x128xf32>
    %c1_28 = arith.constant 1 : index
    %c1_29 = arith.constant 1 : index
    %c0_30 = arith.constant 0 : index
    %33 = vector.load %arg8[%c1_28, %c1_29, %c0_30] : memref<10x10x128xf32, #tpu.memory_space<vmem>>, vector<8x8x128xf32>
    tpu.vector_store %arg8[%c1_28, %c1_29, %c0_30], %32 {strides = array<i32>} : memref<10x10x128xf32, #tpu.memory_space<vmem>>, vector<8x8x128xf32>,
    %c0_31 = arith.constant 0 : index
    %c0_32 = arith.constant 0 : index
    %34 = vector.load %arg4[%c0_31, %c0_32] : memref<128x128xbf16, #tpu.memory_space<vmem>>, vector<128x128xbf16>
    %cst_33 = arith.constant dense<0.000000e+00> : vector<64x128xf32>
    %35 = tpu.matmul %5, %34, %cst_33 {dimension_numbers = #tpu.dot_dimension_numbers<[1], [0], [0], [1], [0, 0, 1, 1], [], []>} : vector<64x128xbf16>, vector<128x128xbf16>, vector<64x128xf32> -> vector<64x128xf32>
    %c0_34 = arith.constant 0 : index
    %c0_35 = arith.constant 0 : index
    %36 = vector.load %arg4[%c0_34, %c0_35] : memref<128x128xbf16, #tpu.memory_space<vmem>>, vector<128x128xbf16>
    %cst_36 = arith.constant dense<0.000000e+00> : vector<64x128xf32>
    %37 = tpu.matmul %7, %36, %cst_36 {dimension_numbers = #tpu.dot_dimension_numbers<[1], [0], [0], [1], [0, 0, 1, 1], [], []>} : vector<64x128xbf16>, vector<128x128xbf16>, vector<64x128xf32> -> vector<64x128xf32>
    %38 = arith.addf %35, %37 : vector<64x128xf32>
    %c6 = arith.constant 6 : index
    %c0_37 = arith.constant 0 : index
    %c0_38 = arith.constant 0 : index
    %39 = vector.load %arg6[%c6, %c0_37, %c0_38] : memref<7x2x128xf32, #tpu.memory_space<vmem>>, vector<1x1x128xf32>
    %40 = vector.shape_cast %39 : vector<1x1x128xf32> to vector<1x128xf32>
    %41 = vector.broadcast %40 : vector<1x128xf32> to vector<64x128xf32>
    %42 = arith.mulf %38, %41 : vector<64x128xf32>
    %c6_39 = arith.constant 6 : index
    %c1_40 = arith.constant 1 : index
    %c0_41 = arith.constant 0 : index
    %43 = vector.load %arg6[%c6_39, %c1_40, %c0_41] : memref<7x2x128xf32, #tpu.memory_space<vmem>>, vector<1x1x128xf32>
    %44 = vector.shape_cast %43 : vector<1x1x128xf32> to vector<1x128xf32>
    %45 = vector.broadcast %44 : vector<1x128xf32> to vector<64x128xf32>
    %46 = arith.addf %42, %45 : vector<64x128xf32>
    %cst_42 = arith.constant 0.000000e+00 : f32
    %47 = vector.broadcast %cst_42 : f32 to vector<64x128xf32>
    %c0_43 = arith.constant 0 : index
    %c0_44 = arith.constant 0 : index
    %c0_45 = arith.constant 0 : index
    %48 = vector.load %arg8[%c0_43, %c0_44, %c0_45] : memref<10x10x128xf32, #tpu.memory_space<vmem>>, vector<8x8x128xf32>
    %49 = vector.shape_cast %48 : vector<8x8x128xf32> to vector<64x128xf32>
    %50 = arith.truncf %49 : vector<64x128xf32> to vector<64x128xbf16>
    %c0_46 = arith.constant 0 : index
    %c0_47 = arith.constant 0 : index
    %c0_48 = arith.constant 0 : index
    %c0_49 = arith.constant 0 : index
    %51 = vector.load %arg5[%c0_46, %c0_47, %c0_48, %c0_49] : memref<5x9x128x128xbf16, #tpu.memory_space<vmem>>, vector<1x1x128x128xbf16>
    %52 = vector.shape_cast %51 : vector<1x1x128x128xbf16> to vector<128x128xbf16>
    %cst_50 = arith.constant dense<0.000000e+00> : vector<64x128xf32>
    %53 = tpu.matmul %50, %52, %cst_50 {dimension_numbers = #tpu.dot_dimension_numbers<[1], [0], [0], [1], [0, 0, 1, 1], [], []>} : vector<64x128xbf16>, vector<128x128xbf16>, vector<64x128xf32> -> vector<64x128xf32>
    %54 = arith.addf %47, %53 : vector<64x128xf32>
    %c0_51 = arith.constant 0 : index
    %c1_52 = arith.constant 1 : index
    %c0_53 = arith.constant 0 : index
    %55 = vector.load %arg8[%c0_51, %c1_52, %c0_53] : memref<10x10x128xf32, #tpu.memory_space<vmem>>, vector<8x8x128xf32>
    %56 = vector.shape_cast %55 : vector<8x8x128xf32> to vector<64x128xf32>
    %57 = arith.truncf %56 : vector<64x128xf32> to vector<64x128xbf16>
    %c0_54 = arith.constant 0 : index
    %c1_55 = arith.constant 1 : index
    %c0_56 = arith.constant 0 : index
    %c0_57 = arith.constant 0 : index
    %58 = vector.load %arg5[%c0_54, %c1_55, %c0_56, %c0_57] : memref<5x9x128x128xbf16, #tpu.memory_space<vmem>>, vector<1x1x128x128xbf16>
    %59 = vector.shape_cast %58 : vector<1x1x128x128xbf16> to vector<128x128xbf16>
    %cst_58 = arith.constant dense<0.000000e+00> : vector<64x128xf32>
    %60 = tpu.matmul %57, %59, %cst_58 {dimension_numbers = #tpu.dot_dimension_numbers<[1], [0], [0], [1], [0, 0, 1, 1], [], []>} : vector<64x128xbf16>, vector<128x128xbf16>, vector<64x128xf32> -> vector<64x128xf32>
    %61 = arith.addf %54, %60 : vector<64x128xf32>
    %c0_59 = arith.constant 0 : index
    %c2 = arith.constant 2 : index
    %c0_60 = arith.constant 0 : index
    %62 = vector.load %arg8[%c0_59, %c2, %c0_60] : memref<10x10x128xf32, #tpu.memory_space<vmem>>, vector<8x8x128xf32>
    %63 = vector.shape_cast %62 : vector<8x8x128xf32> to vector<64x128xf32>
    %64 = arith.truncf %63 : vector<64x128xf32> to vector<64x128xbf16>
    %c0_61 = arith.constant 0 : index
    %c2_62 = arith.constant 2 : index
    %c0_63 = arith.constant 0 : index
    %c0_64 = arith.constant 0 : index
    %65 = vector.load %arg5[%c0_61, %c2_62, %c0_63, %c0_64] : memref<5x9x128x128xbf16, #tpu.memory_space<vmem>>, vector<1x1x128x128xbf16>
    %66 = vector.shape_cast %65 : vector<1x1x128x128xbf16> to vector<128x128xbf16>
    %cst_65 = arith.constant dense<0.000000e+00> : vector<64x128xf32>
    %67 = tpu.matmul %64, %66, %cst_65 {dimension_numbers = #tpu.dot_dimension_numbers<[1], [0], [0], [1], [0, 0, 1, 1], [], []>} : vector<64x128xbf16>, vector<128x128xbf16>, vector<64x128xf32> -> vector<64x128xf32>
    %68 = arith.addf %61, %67 : vector<64x128xf32>
    %c1_66 = arith.constant 1 : index
    %c0_67 = arith.constant 0 : index
    %c0_68 = arith.constant 0 : index
    %69 = vector.load %arg8[%c1_66, %c0_67, %c0_68] : memref<10x10x128xf32, #tpu.memory_space<vmem>>, vector<8x8x128xf32>
    %70 = vector.shape_cast %69 : vector<8x8x128xf32> to vector<64x128xf32>
    %71 = arith.truncf %70 : vector<64x128xf32> to vector<64x128xbf16>
    %c0_69 = arith.constant 0 : index
    %c3 = arith.constant 3 : index
    %c0_70 = arith.constant 0 : index
    %c0_71 = arith.constant 0 : index
    %72 = vector.load %arg5[%c0_69, %c3, %c0_70, %c0_71] : memref<5x9x128x128xbf16, #tpu.memory_space<vmem>>, vector<1x1x128x128xbf16>
    %73 = vector.shape_cast %72 : vector<1x1x128x128xbf16> to vector<128x128xbf16>
    %cst_72 = arith.constant dense<0.000000e+00> : vector<64x128xf32>
    %74 = tpu.matmul %71, %73, %cst_72 {dimension_numbers = #tpu.dot_dimension_numbers<[1], [0], [0], [1], [0, 0, 1, 1], [], []>} : vector<64x128xbf16>, vector<128x128xbf16>, vector<64x128xf32> -> vector<64x128xf32>
    %75 = arith.addf %68, %74 : vector<64x128xf32>
    %c1_73 = arith.constant 1 : index
    %c1_74 = arith.constant 1 : index
    %c0_75 = arith.constant 0 : index
    %76 = vector.load %arg8[%c1_73, %c1_74, %c0_75] : memref<10x10x128xf32, #tpu.memory_space<vmem>>, vector<8x8x128xf32>
    %77 = vector.shape_cast %76 : vector<8x8x128xf32> to vector<64x128xf32>
    %78 = arith.truncf %77 : vector<64x128xf32> to vector<64x128xbf16>
    %c0_76 = arith.constant 0 : index
    %c4 = arith.constant 4 : index
    %c0_77 = arith.constant 0 : index
    %c0_78 = arith.constant 0 : index
    %79 = vector.load %arg5[%c0_76, %c4, %c0_77, %c0_78] : memref<5x9x128x128xbf16, #tpu.memory_space<vmem>>, vector<1x1x128x128xbf16>
    %80 = vector.shape_cast %79 : vector<1x1x128x128xbf16> to vector<128x128xbf16>
    %cst_79 = arith.constant dense<0.000000e+00> : vector<64x128xf32>
    %81 = tpu.matmul %78, %80, %cst_79 {dimension_numbers = #tpu.dot_dimension_numbers<[1], [0], [0], [1], [0, 0, 1, 1], [], []>} : vector<64x128xbf16>, vector<128x128xbf16>, vector<64x128xf32> -> vector<64x128xf32>
    %82 = arith.addf %75, %81 : vector<64x128xf32>
    %c1_80 = arith.constant 1 : index
    %c2_81 = arith.constant 2 : index
    %c0_82 = arith.constant 0 : index
    %83 = vector.load %arg8[%c1_80, %c2_81, %c0_82] : memref<10x10x128xf32, #tpu.memory_space<vmem>>, vector<8x8x128xf32>
    %84 = vector.shape_cast %83 : vector<8x8x128xf32> to vector<64x128xf32>
    %85 = arith.truncf %84 : vector<64x128xf32> to vector<64x128xbf16>
    %c0_83 = arith.constant 0 : index
    %c5 = arith.constant 5 : index
    %c0_84 = arith.constant 0 : index
    %c0_85 = arith.constant 0 : index
    %86 = vector.load %arg5[%c0_83, %c5, %c0_84, %c0_85] : memref<5x9x128x128xbf16, #tpu.memory_space<vmem>>, vector<1x1x128x128xbf16>
    %87 = vector.shape_cast %86 : vector<1x1x128x128xbf16> to vector<128x128xbf16>
    %cst_86 = arith.constant dense<0.000000e+00> : vector<64x128xf32>
    %88 = tpu.matmul %85, %87, %cst_86 {dimension_numbers = #tpu.dot_dimension_numbers<[1], [0], [0], [1], [0, 0, 1, 1], [], []>} : vector<64x128xbf16>, vector<128x128xbf16>, vector<64x128xf32> -> vector<64x128xf32>
    %89 = arith.addf %82, %88 : vector<64x128xf32>
    %c2_87 = arith.constant 2 : index
    %c0_88 = arith.constant 0 : index
    %c0_89 = arith.constant 0 : index
    %90 = vector.load %arg8[%c2_87, %c0_88, %c0_89] : memref<10x10x128xf32, #tpu.memory_space<vmem>>, vector<8x8x128xf32>
    %91 = vector.shape_cast %90 : vector<8x8x128xf32> to vector<64x128xf32>
    %92 = arith.truncf %91 : vector<64x128xf32> to vector<64x128xbf16>
    %c0_90 = arith.constant 0 : index
    %c6_91 = arith.constant 6 : index
    %c0_92 = arith.constant 0 : index
    %c0_93 = arith.constant 0 : index
    %93 = vector.load %arg5[%c0_90, %c6_91, %c0_92, %c0_93] : memref<5x9x128x128xbf16, #tpu.memory_space<vmem>>, vector<1x1x128x128xbf16>
    %94 = vector.shape_cast %93 : vector<1x1x128x128xbf16> to vector<128x128xbf16>
    %cst_94 = arith.constant dense<0.000000e+00> : vector<64x128xf32>
    %95 = tpu.matmul %92, %94, %cst_94 {dimension_numbers = #tpu.dot_dimension_numbers<[1], [0], [0], [1], [0, 0, 1, 1], [], []>} : vector<64x128xbf16>, vector<128x128xbf16>, vector<64x128xf32> -> vector<64x128xf32>
    %96 = arith.addf %89, %95 : vector<64x128xf32>
    %c2_95 = arith.constant 2 : index
    %c1_96 = arith.constant 1 : index
    %c0_97 = arith.constant 0 : index
    %97 = vector.load %arg8[%c2_95, %c1_96, %c0_97] : memref<10x10x128xf32, #tpu.memory_space<vmem>>, vector<8x8x128xf32>
    %98 = vector.shape_cast %97 : vector<8x8x128xf32> to vector<64x128xf32>
    %99 = arith.truncf %98 : vector<64x128xf32> to vector<64x128xbf16>
    %c0_98 = arith.constant 0 : index
    %c7 = arith.constant 7 : index
    %c0_99 = arith.constant 0 : index
    %c0_100 = arith.constant 0 : index
    %100 = vector.load %arg5[%c0_98, %c7, %c0_99, %c0_100] : memref<5x9x128x128xbf16, #tpu.memory_space<vmem>>, vector<1x1x128x128xbf16>
    %101 = vector.shape_cast %100 : vector<1x1x128x128xbf16> to vector<128x128xbf16>
    %cst_101 = arith.constant dense<0.000000e+00> : vector<64x128xf32>
    %102 = tpu.matmul %99, %101, %cst_101 {dimension_numbers = #tpu.dot_dimension_numbers<[1], [0], [0], [1], [0, 0, 1, 1], [], []>} : vector<64x128xbf16>, vector<128x128xbf16>, vector<64x128xf32> -> vector<64x128xf32>
    %103 = arith.addf %96, %102 : vector<64x128xf32>
    %c2_102 = arith.constant 2 : index
    %c2_103 = arith.constant 2 : index
    %c0_104 = arith.constant 0 : index
    %104 = vector.load %arg8[%c2_102, %c2_103, %c0_104] : memref<10x10x128xf32, #tpu.memory_space<vmem>>, vector<8x8x128xf32>
    %105 = vector.shape_cast %104 : vector<8x8x128xf32> to vector<64x128xf32>
    %106 = arith.truncf %105 : vector<64x128xf32> to vector<64x128xbf16>
    %c0_105 = arith.constant 0 : index
    %c8 = arith.constant 8 : index
    %c0_106 = arith.constant 0 : index
    %c0_107 = arith.constant 0 : index
    %107 = vector.load %arg5[%c0_105, %c8, %c0_106, %c0_107] : memref<5x9x128x128xbf16, #tpu.memory_space<vmem>>, vector<1x1x128x128xbf16>
    %108 = vector.shape_cast %107 : vector<1x1x128x128xbf16> to vector<128x128xbf16>
    %cst_108 = arith.constant dense<0.000000e+00> : vector<64x128xf32>
    %109 = tpu.matmul %106, %108, %cst_108 {dimension_numbers = #tpu.dot_dimension_numbers<[1], [0], [0], [1], [0, 0, 1, 1], [], []>} : vector<64x128xbf16>, vector<128x128xbf16>, vector<64x128xf32> -> vector<64x128xf32>
    %110 = arith.addf %103, %109 : vector<64x128xf32>
    %c1_109 = arith.constant 1 : index
    %c0_110 = arith.constant 0 : index
    %c0_111 = arith.constant 0 : index
    %111 = vector.load %arg6[%c1_109, %c0_110, %c0_111] : memref<7x2x128xf32, #tpu.memory_space<vmem>>, vector<1x1x128xf32>
    %112 = vector.shape_cast %111 : vector<1x1x128xf32> to vector<1x128xf32>
    %113 = vector.broadcast %112 : vector<1x128xf32> to vector<64x128xf32>
    %114 = arith.mulf %110, %113 : vector<64x128xf32>
    %c1_112 = arith.constant 1 : index
    %c1_113 = arith.constant 1 : index
    %c0_114 = arith.constant 0 : index
    %115 = vector.load %arg6[%c1_112, %c1_113, %c0_114] : memref<7x2x128xf32, #tpu.memory_space<vmem>>, vector<1x1x128xf32>
    %116 = vector.shape_cast %115 : vector<1x1x128xf32> to vector<1x128xf32>
    %117 = vector.broadcast %116 : vector<1x128xf32> to vector<64x128xf32>
    %118 = arith.addf %114, %117 : vector<64x128xf32>
    %cst_115 = arith.constant 0.0787401571 : f32
    %119 = vector.broadcast %cst_115 : f32 to vector<64x128xf32>
    %120 = arith.divf %118, %119 : vector<64x128xf32>
    %121 = math.roundeven %120 : vector<64x128xf32>
    %cst_116 = arith.constant -1.270000e+02 : f32
    %cst_117 = arith.constant 1.270000e+02 : f32
    %122 = vector.broadcast %cst_116 : f32 to vector<64x128xf32>
    %123 = arith.maximumf %122, %121 : vector<64x128xf32>
    %124 = vector.broadcast %cst_117 : f32 to vector<64x128xf32>
    %125 = arith.minimumf %124, %123 : vector<64x128xf32>
    %cst_118 = arith.constant 0.0787401571 : f32
    %126 = vector.broadcast %cst_118 : f32 to vector<64x128xf32>
    %127 = arith.mulf %125, %126 : vector<64x128xf32>
    %cst_119 = arith.constant 0.0787401571 : f32
    %128 = vector.broadcast %cst_119 : f32 to vector<64x128xf32>
    %129 = arith.divf %46, %128 : vector<64x128xf32>
    %130 = math.roundeven %129 : vector<64x128xf32>
    %cst_120 = arith.constant -1.270000e+02 : f32
    %cst_121 = arith.constant 1.270000e+02 : f32
    %131 = vector.broadcast %cst_120 : f32 to vector<64x128xf32>
    %132 = arith.maximumf %131, %130 : vector<64x128xf32>
    %133 = vector.broadcast %cst_121 : f32 to vector<64x128xf32>
    %134 = arith.minimumf %133, %132 : vector<64x128xf32>
    %cst_122 = arith.constant 0.0787401571 : f32
    %135 = vector.broadcast %cst_122 : f32 to vector<64x128xf32>
    %136 = arith.mulf %134, %135 : vector<64x128xf32>
    %137 = arith.addf %127, %136 : vector<64x128xf32>
    %cst_123 = arith.constant 0.000000e+00 : f32
    %138 = vector.broadcast %cst_123 : f32 to vector<64x128xf32>
    %139 = arith.maximumf %137, %138 : vector<64x128xf32>
    %cst_124 = arith.constant 5.000000e-01 : f32
    %140 = vector.broadcast %cst_124 : f32 to vector<64x128xf32>
    %141 = arith.divf %139, %140 : vector<64x128xf32>
    %142 = math.roundeven %141 : vector<64x128xf32>
    %cst_125 = arith.constant 0.000000e+00 : f32
    %cst_126 = arith.constant 3.000000e+00 : f32
    %143 = vector.broadcast %cst_125 : f32 to vector<64x128xf32>
    %144 = arith.maximumf %143, %142 : vector<64x128xf32>
    %145 = vector.broadcast %cst_126 : f32 to vector<64x128xf32>
    %146 = arith.minimumf %145, %144 : vector<64x128xf32>
    %cst_127 = arith.constant 5.000000e-01 : f32
    %147 = vector.broadcast %cst_127 : f32 to vector<64x128xf32>
    %148 = arith.mulf %146, %147 : vector<64x128xf32>
    %149 = vector.shape_cast %148 : vector<64x128xf32> to vector<8x8x128xf32>
    %c1_128 = arith.constant 1 : index
    %c1_129 = arith.constant 1 : index
    %c0_130 = arith.constant 0 : index
    %150 = vector.load %arg9[%c1_128, %c1_129, %c0_130] : memref<10x10x128xf32, #tpu.memory_space<vmem>>, vector<8x8x128xf32>
    tpu.vector_store %arg9[%c1_128, %c1_129, %c0_130], %149 {strides = array<i32>} : memref<10x10x128xf32, #tpu.memory_space<vmem>>, vector<8x8x128xf32>,
    %cst_131 = arith.constant 0.000000e+00 : f32
    %151 = vector.broadcast %cst_131 : f32 to vector<64x128xf32>
    %c0_132 = arith.constant 0 : index
    %c0_133 = arith.constant 0 : index
    %c0_134 = arith.constant 0 : index
    %152 = vector.load %arg9[%c0_132, %c0_133, %c0_134] : memref<10x10x128xf32, #tpu.memory_space<vmem>>, vector<8x8x128xf32>
    %153 = vector.shape_cast %152 : vector<8x8x128xf32> to vector<64x128xf32>
    %154 = arith.truncf %153 : vector<64x128xf32> to vector<64x128xbf16>
    %c1_135 = arith.constant 1 : index
    %c0_136 = arith.constant 0 : index
    %c0_137 = arith.constant 0 : index
    %c0_138 = arith.constant 0 : index
    %155 = vector.load %arg5[%c1_135, %c0_136, %c0_137, %c0_138] : memref<5x9x128x128xbf16, #tpu.memory_space<vmem>>, vector<1x1x128x128xbf16>
    %156 = vector.shape_cast %155 : vector<1x1x128x128xbf16> to vector<128x128xbf16>
    %cst_139 = arith.constant dense<0.000000e+00> : vector<64x128xf32>
    %157 = tpu.matmul %154, %156, %cst_139 {dimension_numbers = #tpu.dot_dimension_numbers<[1], [0], [0], [1], [0, 0, 1, 1], [], []>} : vector<64x128xbf16>, vector<128x128xbf16>, vector<64x128xf32> -> vector<64x128xf32>
    %158 = arith.addf %151, %157 : vector<64x128xf32>
    %c0_140 = arith.constant 0 : index
    %c1_141 = arith.constant 1 : index
    %c0_142 = arith.constant 0 : index
    %159 = vector.load %arg9[%c0_140, %c1_141, %c0_142] : memref<10x10x128xf32, #tpu.memory_space<vmem>>, vector<8x8x128xf32>
    %160 = vector.shape_cast %159 : vector<8x8x128xf32> to vector<64x128xf32>
    %161 = arith.truncf %160 : vector<64x128xf32> to vector<64x128xbf16>
    %c1_143 = arith.constant 1 : index
    %c1_144 = arith.constant 1 : index
    %c0_145 = arith.constant 0 : index
    %c0_146 = arith.constant 0 : index
    %162 = vector.load %arg5[%c1_143, %c1_144, %c0_145, %c0_146] : memref<5x9x128x128xbf16, #tpu.memory_space<vmem>>, vector<1x1x128x128xbf16>
    %163 = vector.shape_cast %162 : vector<1x1x128x128xbf16> to vector<128x128xbf16>
    %cst_147 = arith.constant dense<0.000000e+00> : vector<64x128xf32>
    %164 = tpu.matmul %161, %163, %cst_147 {dimension_numbers = #tpu.dot_dimension_numbers<[1], [0], [0], [1], [0, 0, 1, 1], [], []>} : vector<64x128xbf16>, vector<128x128xbf16>, vector<64x128xf32> -> vector<64x128xf32>
    %165 = arith.addf %158, %164 : vector<64x128xf32>
    %c0_148 = arith.constant 0 : index
    %c2_149 = arith.constant 2 : index
    %c0_150 = arith.constant 0 : index
    %166 = vector.load %arg9[%c0_148, %c2_149, %c0_150] : memref<10x10x128xf32, #tpu.memory_space<vmem>>, vector<8x8x128xf32>
    %167 = vector.shape_cast %166 : vector<8x8x128xf32> to vector<64x128xf32>
    %168 = arith.truncf %167 : vector<64x128xf32> to vector<64x128xbf16>
    %c1_151 = arith.constant 1 : index
    %c2_152 = arith.constant 2 : index
    %c0_153 = arith.constant 0 : index
    %c0_154 = arith.constant 0 : index
    %169 = vector.load %arg5[%c1_151, %c2_152, %c0_153, %c0_154] : memref<5x9x128x128xbf16, #tpu.memory_space<vmem>>, vector<1x1x128x128xbf16>
    %170 = vector.shape_cast %169 : vector<1x1x128x128xbf16> to vector<128x128xbf16>
    %cst_155 = arith.constant dense<0.000000e+00> : vector<64x128xf32>
    %171 = tpu.matmul %168, %170, %cst_155 {dimension_numbers = #tpu.dot_dimension_numbers<[1], [0], [0], [1], [0, 0, 1, 1], [], []>} : vector<64x128xbf16>, vector<128x128xbf16>, vector<64x128xf32> -> vector<64x128xf32>
    %172 = arith.addf %165, %171 : vector<64x128xf32>
    %c1_156 = arith.constant 1 : index
    %c0_157 = arith.constant 0 : index
    %c0_158 = arith.constant 0 : index
    %173 = vector.load %arg9[%c1_156, %c0_157, %c0_158] : memref<10x10x128xf32, #tpu.memory_space<vmem>>, vector<8x8x128xf32>
    %174 = vector.shape_cast %173 : vector<8x8x128xf32> to vector<64x128xf32>
    %175 = arith.truncf %174 : vector<64x128xf32> to vector<64x128xbf16>
    %c1_159 = arith.constant 1 : index
    %c3_160 = arith.constant 3 : index
    %c0_161 = arith.constant 0 : index
    %c0_162 = arith.constant 0 : index
    %176 = vector.load %arg5[%c1_159, %c3_160, %c0_161, %c0_162] : memref<5x9x128x128xbf16, #tpu.memory_space<vmem>>, vector<1x1x128x128xbf16>
    %177 = vector.shape_cast %176 : vector<1x1x128x128xbf16> to vector<128x128xbf16>
    %cst_163 = arith.constant dense<0.000000e+00> : vector<64x128xf32>
    %178 = tpu.matmul %175, %177, %cst_163 {dimension_numbers = #tpu.dot_dimension_numbers<[1], [0], [0], [1], [0, 0, 1, 1], [], []>} : vector<64x128xbf16>, vector<128x128xbf16>, vector<64x128xf32> -> vector<64x128xf32>
    %179 = arith.addf %172, %178 : vector<64x128xf32>
    %c1_164 = arith.constant 1 : index
    %c1_165 = arith.constant 1 : index
    %c0_166 = arith.constant 0 : index
    %180 = vector.load %arg9[%c1_164, %c1_165, %c0_166] : memref<10x10x128xf32, #tpu.memory_space<vmem>>, vector<8x8x128xf32>
    %181 = vector.shape_cast %180 : vector<8x8x128xf32> to vector<64x128xf32>
    %182 = arith.truncf %181 : vector<64x128xf32> to vector<64x128xbf16>
    %c1_167 = arith.constant 1 : index
    %c4_168 = arith.constant 4 : index
    %c0_169 = arith.constant 0 : index
    %c0_170 = arith.constant 0 : index
    %183 = vector.load %arg5[%c1_167, %c4_168, %c0_169, %c0_170] : memref<5x9x128x128xbf16, #tpu.memory_space<vmem>>, vector<1x1x128x128xbf16>
    %184 = vector.shape_cast %183 : vector<1x1x128x128xbf16> to vector<128x128xbf16>
    %cst_171 = arith.constant dense<0.000000e+00> : vector<64x128xf32>
    %185 = tpu.matmul %182, %184, %cst_171 {dimension_numbers = #tpu.dot_dimension_numbers<[1], [0], [0], [1], [0, 0, 1, 1], [], []>} : vector<64x128xbf16>, vector<128x128xbf16>, vector<64x128xf32> -> vector<64x128xf32>
    %186 = arith.addf %179, %185 : vector<64x128xf32>
    %c1_172 = arith.constant 1 : index
    %c2_173 = arith.constant 2 : index
    %c0_174 = arith.constant 0 : index
    %187 = vector.load %arg9[%c1_172, %c2_173, %c0_174] : memref<10x10x128xf32, #tpu.memory_space<vmem>>, vector<8x8x128xf32>
    %188 = vector.shape_cast %187 : vector<8x8x128xf32> to vector<64x128xf32>
    %189 = arith.truncf %188 : vector<64x128xf32> to vector<64x128xbf16>
    %c1_175 = arith.constant 1 : index
    %c5_176 = arith.constant 5 : index
    %c0_177 = arith.constant 0 : index
    %c0_178 = arith.constant 0 : index
    %190 = vector.load %arg5[%c1_175, %c5_176, %c0_177, %c0_178] : memref<5x9x128x128xbf16, #tpu.memory_space<vmem>>, vector<1x1x128x128xbf16>
    %191 = vector.shape_cast %190 : vector<1x1x128x128xbf16> to vector<128x128xbf16>
    %cst_179 = arith.constant dense<0.000000e+00> : vector<64x128xf32>
    %192 = tpu.matmul %189, %191, %cst_179 {dimension_numbers = #tpu.dot_dimension_numbers<[1], [0], [0], [1], [0, 0, 1, 1], [], []>} : vector<64x128xbf16>, vector<128x128xbf16>, vector<64x128xf32> -> vector<64x128xf32>
    %193 = arith.addf %186, %192 : vector<64x128xf32>
    %c2_180 = arith.constant 2 : index
    %c0_181 = arith.constant 0 : index
    %c0_182 = arith.constant 0 : index
    %194 = vector.load %arg9[%c2_180, %c0_181, %c0_182] : memref<10x10x128xf32, #tpu.memory_space<vmem>>, vector<8x8x128xf32>
    %195 = vector.shape_cast %194 : vector<8x8x128xf32> to vector<64x128xf32>
    %196 = arith.truncf %195 : vector<64x128xf32> to vector<64x128xbf16>
    %c1_183 = arith.constant 1 : index
    %c6_184 = arith.constant 6 : index
    %c0_185 = arith.constant 0 : index
    %c0_186 = arith.constant 0 : index
    %197 = vector.load %arg5[%c1_183, %c6_184, %c0_185, %c0_186] : memref<5x9x128x128xbf16, #tpu.memory_space<vmem>>, vector<1x1x128x128xbf16>
    %198 = vector.shape_cast %197 : vector<1x1x128x128xbf16> to vector<128x128xbf16>
    %cst_187 = arith.constant dense<0.000000e+00> : vector<64x128xf32>
    %199 = tpu.matmul %196, %198, %cst_187 {dimension_numbers = #tpu.dot_dimension_numbers<[1], [0], [0], [1], [0, 0, 1, 1], [], []>} : vector<64x128xbf16>, vector<128x128xbf16>, vector<64x128xf32> -> vector<64x128xf32>
    %200 = arith.addf %193, %199 : vector<64x128xf32>
    %c2_188 = arith.constant 2 : index
    %c1_189 = arith.constant 1 : index
    %c0_190 = arith.constant 0 : index
    %201 = vector.load %arg9[%c2_188, %c1_189, %c0_190] : memref<10x10x128xf32, #tpu.memory_space<vmem>>, vector<8x8x128xf32>
    %202 = vector.shape_cast %201 : vector<8x8x128xf32> to vector<64x128xf32>
    %203 = arith.truncf %202 : vector<64x128xf32> to vector<64x128xbf16>
    %c1_191 = arith.constant 1 : index
    %c7_192 = arith.constant 7 : index
    %c0_193 = arith.constant 0 : index
    %c0_194 = arith.constant 0 : index
    %204 = vector.load %arg5[%c1_191, %c7_192, %c0_193, %c0_194] : memref<5x9x128x128xbf16, #tpu.memory_space<vmem>>, vector<1x1x128x128xbf16>
    %205 = vector.shape_cast %204 : vector<1x1x128x128xbf16> to vector<128x128xbf16>
    %cst_195 = arith.constant dense<0.000000e+00> : vector<64x128xf32>
    %206 = tpu.matmul %203, %205, %cst_195 {dimension_numbers = #tpu.dot_dimension_numbers<[1], [0], [0], [1], [0, 0, 1, 1], [], []>} : vector<64x128xbf16>, vector<128x128xbf16>, vector<64x128xf32> -> vector<64x128xf32>
    %207 = arith.addf %200, %206 : vector<64x128xf32>
    %c2_196 = arith.constant 2 : index
    %c2_197 = arith.constant 2 : index
    %c0_198 = arith.constant 0 : index
    %208 = vector.load %arg9[%c2_196, %c2_197, %c0_198] : memref<10x10x128xf32, #tpu.memory_space<vmem>>, vector<8x8x128xf32>
    %209 = vector.shape_cast %208 : vector<8x8x128xf32> to vector<64x128xf32>
    %210 = arith.truncf %209 : vector<64x128xf32> to vector<64x128xbf16>
    %c1_199 = arith.constant 1 : index
    %c8_200 = arith.constant 8 : index
    %c0_201 = arith.constant 0 : index
    %c0_202 = arith.constant 0 : index
    %211 = vector.load %arg5[%c1_199, %c8_200, %c0_201, %c0_202] : memref<5x9x128x128xbf16, #tpu.memory_space<vmem>>, vector<1x1x128x128xbf16>
    %212 = vector.shape_cast %211 : vector<1x1x128x128xbf16> to vector<128x128xbf16>
    %cst_203 = arith.constant dense<0.000000e+00> : vector<64x128xf32>
    %213 = tpu.matmul %210, %212, %cst_203 {dimension_numbers = #tpu.dot_dimension_numbers<[1], [0], [0], [1], [0, 0, 1, 1], [], []>} : vector<64x128xbf16>, vector<128x128xbf16>, vector<64x128xf32> -> vector<64x128xf32>
    %214 = arith.addf %207, %213 : vector<64x128xf32>
    %c2_204 = arith.constant 2 : index
    %c0_205 = arith.constant 0 : index
    %c0_206 = arith.constant 0 : index
    %215 = vector.load %arg6[%c2_204, %c0_205, %c0_206] : memref<7x2x128xf32, #tpu.memory_space<vmem>>, vector<1x1x128xf32>
    %216 = vector.shape_cast %215 : vector<1x1x128xf32> to vector<1x128xf32>
    %217 = vector.broadcast %216 : vector<1x128xf32> to vector<64x128xf32>
    %218 = arith.mulf %214, %217 : vector<64x128xf32>
    %c2_207 = arith.constant 2 : index
    %c1_208 = arith.constant 1 : index
    %c0_209 = arith.constant 0 : index
    %219 = vector.load %arg6[%c2_207, %c1_208, %c0_209] : memref<7x2x128xf32, #tpu.memory_space<vmem>>, vector<1x1x128xf32>
    %220 = vector.shape_cast %219 : vector<1x1x128xf32> to vector<1x128xf32>
    %221 = vector.broadcast %220 : vector<1x128xf32> to vector<64x128xf32>
    %222 = arith.addf %218, %221 : vector<64x128xf32>
    %cst_210 = arith.constant 0.000000e+00 : f32
    %223 = vector.broadcast %cst_210 : f32 to vector<64x128xf32>
    %224 = arith.maximumf %222, %223 : vector<64x128xf32>
    %cst_211 = arith.constant 5.000000e-01 : f32
    %225 = vector.broadcast %cst_211 : f32 to vector<64x128xf32>
    %226 = arith.divf %224, %225 : vector<64x128xf32>
    %227 = math.roundeven %226 : vector<64x128xf32>
    %cst_212 = arith.constant 0.000000e+00 : f32
    %cst_213 = arith.constant 3.000000e+00 : f32
    %228 = vector.broadcast %cst_212 : f32 to vector<64x128xf32>
    %229 = arith.maximumf %228, %227 : vector<64x128xf32>
    %230 = vector.broadcast %cst_213 : f32 to vector<64x128xf32>
    %231 = arith.minimumf %230, %229 : vector<64x128xf32>
    %cst_214 = arith.constant 5.000000e-01 : f32
    %232 = vector.broadcast %cst_214 : f32 to vector<64x128xf32>
    %233 = arith.mulf %231, %232 : vector<64x128xf32>
    %234 = vector.shape_cast %233 : vector<64x128xf32> to vector<8x8x128xf32>
    %c1_215 = arith.constant 1 : index
    %c1_216 = arith.constant 1 : index
    %c0_217 = arith.constant 0 : index
    %235 = vector.load %arg8[%c1_215, %c1_216, %c0_217] : memref<10x10x128xf32, #tpu.memory_space<vmem>>, vector<8x8x128xf32>
    tpu.vector_store %arg8[%c1_215, %c1_216, %c0_217], %234 {strides = array<i32>} : memref<10x10x128xf32, #tpu.memory_space<vmem>>, vector<8x8x128xf32>,
    %cst_218 = arith.constant 0.000000e+00 : f32
    %236 = vector.broadcast %cst_218 : f32 to vector<64x128xf32>
    %c0_219 = arith.constant 0 : index
    %c0_220 = arith.constant 0 : index
    %c0_221 = arith.constant 0 : index
    %237 = vector.load %arg8[%c0_219, %c0_220, %c0_221] : memref<10x10x128xf32, #tpu.memory_space<vmem>>, vector<8x8x128xf32>
    %238 = vector.shape_cast %237 : vector<8x8x128xf32> to vector<64x128xf32>
    %239 = arith.truncf %238 : vector<64x128xf32> to vector<64x128xbf16>
    %c2_222 = arith.constant 2 : index
    %c0_223 = arith.constant 0 : index
    %c0_224 = arith.constant 0 : index
    %c0_225 = arith.constant 0 : index
    %240 = vector.load %arg5[%c2_222, %c0_223, %c0_224, %c0_225] : memref<5x9x128x128xbf16, #tpu.memory_space<vmem>>, vector<1x1x128x128xbf16>
    %241 = vector.shape_cast %240 : vector<1x1x128x128xbf16> to vector<128x128xbf16>
    %cst_226 = arith.constant dense<0.000000e+00> : vector<64x128xf32>
    %242 = tpu.matmul %239, %241, %cst_226 {dimension_numbers = #tpu.dot_dimension_numbers<[1], [0], [0], [1], [0, 0, 1, 1], [], []>} : vector<64x128xbf16>, vector<128x128xbf16>, vector<64x128xf32> -> vector<64x128xf32>
    %243 = arith.addf %236, %242 : vector<64x128xf32>
    %c0_227 = arith.constant 0 : index
    %c1_228 = arith.constant 1 : index
    %c0_229 = arith.constant 0 : index
    %244 = vector.load %arg8[%c0_227, %c1_228, %c0_229] : memref<10x10x128xf32, #tpu.memory_space<vmem>>, vector<8x8x128xf32>
    %245 = vector.shape_cast %244 : vector<8x8x128xf32> to vector<64x128xf32>
    %246 = arith.truncf %245 : vector<64x128xf32> to vector<64x128xbf16>
    %c2_230 = arith.constant 2 : index
    %c1_231 = arith.constant 1 : index
    %c0_232 = arith.constant 0 : index
    %c0_233 = arith.constant 0 : index
    %247 = vector.load %arg5[%c2_230, %c1_231, %c0_232, %c0_233] : memref<5x9x128x128xbf16, #tpu.memory_space<vmem>>, vector<1x1x128x128xbf16>
    %248 = vector.shape_cast %247 : vector<1x1x128x128xbf16> to vector<128x128xbf16>
    %cst_234 = arith.constant dense<0.000000e+00> : vector<64x128xf32>
    %249 = tpu.matmul %246, %248, %cst_234 {dimension_numbers = #tpu.dot_dimension_numbers<[1], [0], [0], [1], [0, 0, 1, 1], [], []>} : vector<64x128xbf16>, vector<128x128xbf16>, vector<64x128xf32> -> vector<64x128xf32>
    %250 = arith.addf %243, %249 : vector<64x128xf32>
    %c0_235 = arith.constant 0 : index
    %c2_236 = arith.constant 2 : index
    %c0_237 = arith.constant 0 : index
    %251 = vector.load %arg8[%c0_235, %c2_236, %c0_237] : memref<10x10x128xf32, #tpu.memory_space<vmem>>, vector<8x8x128xf32>
    %252 = vector.shape_cast %251 : vector<8x8x128xf32> to vector<64x128xf32>
    %253 = arith.truncf %252 : vector<64x128xf32> to vector<64x128xbf16>
    %c2_238 = arith.constant 2 : index
    %c2_239 = arith.constant 2 : index
    %c0_240 = arith.constant 0 : index
    %c0_241 = arith.constant 0 : index
    %254 = vector.load %arg5[%c2_238, %c2_239, %c0_240, %c0_241] : memref<5x9x128x128xbf16, #tpu.memory_space<vmem>>, vector<1x1x128x128xbf16>
    %255 = vector.shape_cast %254 : vector<1x1x128x128xbf16> to vector<128x128xbf16>
    %cst_242 = arith.constant dense<0.000000e+00> : vector<64x128xf32>
    %256 = tpu.matmul %253, %255, %cst_242 {dimension_numbers = #tpu.dot_dimension_numbers<[1], [0], [0], [1], [0, 0, 1, 1], [], []>} : vector<64x128xbf16>, vector<128x128xbf16>, vector<64x128xf32> -> vector<64x128xf32>
    %257 = arith.addf %250, %256 : vector<64x128xf32>
    %c1_243 = arith.constant 1 : index
    %c0_244 = arith.constant 0 : index
    %c0_245 = arith.constant 0 : index
    %258 = vector.load %arg8[%c1_243, %c0_244, %c0_245] : memref<10x10x128xf32, #tpu.memory_space<vmem>>, vector<8x8x128xf32>
    %259 = vector.shape_cast %258 : vector<8x8x128xf32> to vector<64x128xf32>
    %260 = arith.truncf %259 : vector<64x128xf32> to vector<64x128xbf16>
    %c2_246 = arith.constant 2 : index
    %c3_247 = arith.constant 3 : index
    %c0_248 = arith.constant 0 : index
    %c0_249 = arith.constant 0 : index
    %261 = vector.load %arg5[%c2_246, %c3_247, %c0_248, %c0_249] : memref<5x9x128x128xbf16, #tpu.memory_space<vmem>>, vector<1x1x128x128xbf16>
    %262 = vector.shape_cast %261 : vector<1x1x128x128xbf16> to vector<128x128xbf16>
    %cst_250 = arith.constant dense<0.000000e+00> : vector<64x128xf32>
    %263 = tpu.matmul %260, %262, %cst_250 {dimension_numbers = #tpu.dot_dimension_numbers<[1], [0], [0], [1], [0, 0, 1, 1], [], []>} : vector<64x128xbf16>, vector<128x128xbf16>, vector<64x128xf32> -> vector<64x128xf32>
    %264 = arith.addf %257, %263 : vector<64x128xf32>
    %c1_251 = arith.constant 1 : index
    %c1_252 = arith.constant 1 : index
    %c0_253 = arith.constant 0 : index
    %265 = vector.load %arg8[%c1_251, %c1_252, %c0_253] : memref<10x10x128xf32, #tpu.memory_space<vmem>>, vector<8x8x128xf32>
    %266 = vector.shape_cast %265 : vector<8x8x128xf32> to vector<64x128xf32>
    %267 = arith.truncf %266 : vector<64x128xf32> to vector<64x128xbf16>
    %c2_254 = arith.constant 2 : index
    %c4_255 = arith.constant 4 : index
    %c0_256 = arith.constant 0 : index
    %c0_257 = arith.constant 0 : index
    %268 = vector.load %arg5[%c2_254, %c4_255, %c0_256, %c0_257] : memref<5x9x128x128xbf16, #tpu.memory_space<vmem>>, vector<1x1x128x128xbf16>
    %269 = vector.shape_cast %268 : vector<1x1x128x128xbf16> to vector<128x128xbf16>
    %cst_258 = arith.constant dense<0.000000e+00> : vector<64x128xf32>
    %270 = tpu.matmul %267, %269, %cst_258 {dimension_numbers = #tpu.dot_dimension_numbers<[1], [0], [0], [1], [0, 0, 1, 1], [], []>} : vector<64x128xbf16>, vector<128x128xbf16>, vector<64x128xf32> -> vector<64x128xf32>
    %271 = arith.addf %264, %270 : vector<64x128xf32>
    %c1_259 = arith.constant 1 : index
    %c2_260 = arith.constant 2 : index
    %c0_261 = arith.constant 0 : index
    %272 = vector.load %arg8[%c1_259, %c2_260, %c0_261] : memref<10x10x128xf32, #tpu.memory_space<vmem>>, vector<8x8x128xf32>
    %273 = vector.shape_cast %272 : vector<8x8x128xf32> to vector<64x128xf32>
    %274 = arith.truncf %273 : vector<64x128xf32> to vector<64x128xbf16>
    %c2_262 = arith.constant 2 : index
    %c5_263 = arith.constant 5 : index
    %c0_264 = arith.constant 0 : index
    %c0_265 = arith.constant 0 : index
    %275 = vector.load %arg5[%c2_262, %c5_263, %c0_264, %c0_265] : memref<5x9x128x128xbf16, #tpu.memory_space<vmem>>, vector<1x1x128x128xbf16>
    %276 = vector.shape_cast %275 : vector<1x1x128x128xbf16> to vector<128x128xbf16>
    %cst_266 = arith.constant dense<0.000000e+00> : vector<64x128xf32>
    %277 = tpu.matmul %274, %276, %cst_266 {dimension_numbers = #tpu.dot_dimension_numbers<[1], [0], [0], [1], [0, 0, 1, 1], [], []>} : vector<64x128xbf16>, vector<128x128xbf16>, vector<64x128xf32> -> vector<64x128xf32>
    %278 = arith.addf %271, %277 : vector<64x128xf32>
    %c2_267 = arith.constant 2 : index
    %c0_268 = arith.constant 0 : index
    %c0_269 = arith.constant 0 : index
    %279 = vector.load %arg8[%c2_267, %c0_268, %c0_269] : memref<10x10x128xf32, #tpu.memory_space<vmem>>, vector<8x8x128xf32>
    %280 = vector.shape_cast %279 : vector<8x8x128xf32> to vector<64x128xf32>
    %281 = arith.truncf %280 : vector<64x128xf32> to vector<64x128xbf16>
    %c2_270 = arith.constant 2 : index
    %c6_271 = arith.constant 6 : index
    %c0_272 = arith.constant 0 : index
    %c0_273 = arith.constant 0 : index
    %282 = vector.load %arg5[%c2_270, %c6_271, %c0_272, %c0_273] : memref<5x9x128x128xbf16, #tpu.memory_space<vmem>>, vector<1x1x128x128xbf16>
    %283 = vector.shape_cast %282 : vector<1x1x128x128xbf16> to vector<128x128xbf16>
    %cst_274 = arith.constant dense<0.000000e+00> : vector<64x128xf32>
    %284 = tpu.matmul %281, %283, %cst_274 {dimension_numbers = #tpu.dot_dimension_numbers<[1], [0], [0], [1], [0, 0, 1, 1], [], []>} : vector<64x128xbf16>, vector<128x128xbf16>, vector<64x128xf32> -> vector<64x128xf32>
    %285 = arith.addf %278, %284 : vector<64x128xf32>
    %c2_275 = arith.constant 2 : index
    %c1_276 = arith.constant 1 : index
    %c0_277 = arith.constant 0 : index
    %286 = vector.load %arg8[%c2_275, %c1_276, %c0_277] : memref<10x10x128xf32, #tpu.memory_space<vmem>>, vector<8x8x128xf32>
    %287 = vector.shape_cast %286 : vector<8x8x128xf32> to vector<64x128xf32>
    %288 = arith.truncf %287 : vector<64x128xf32> to vector<64x128xbf16>
    %c2_278 = arith.constant 2 : index
    %c7_279 = arith.constant 7 : index
    %c0_280 = arith.constant 0 : index
    %c0_281 = arith.constant 0 : index
    %289 = vector.load %arg5[%c2_278, %c7_279, %c0_280, %c0_281] : memref<5x9x128x128xbf16, #tpu.memory_space<vmem>>, vector<1x1x128x128xbf16>
    %290 = vector.shape_cast %289 : vector<1x1x128x128xbf16> to vector<128x128xbf16>
    %cst_282 = arith.constant dense<0.000000e+00> : vector<64x128xf32>
    %291 = tpu.matmul %288, %290, %cst_282 {dimension_numbers = #tpu.dot_dimension_numbers<[1], [0], [0], [1], [0, 0, 1, 1], [], []>} : vector<64x128xbf16>, vector<128x128xbf16>, vector<64x128xf32> -> vector<64x128xf32>
    %292 = arith.addf %285, %291 : vector<64x128xf32>
    %c2_283 = arith.constant 2 : index
    %c2_284 = arith.constant 2 : index
    %c0_285 = arith.constant 0 : index
    %293 = vector.load %arg8[%c2_283, %c2_284, %c0_285] : memref<10x10x128xf32, #tpu.memory_space<vmem>>, vector<8x8x128xf32>
    %294 = vector.shape_cast %293 : vector<8x8x128xf32> to vector<64x128xf32>
    %295 = arith.truncf %294 : vector<64x128xf32> to vector<64x128xbf16>
    %c2_286 = arith.constant 2 : index
    %c8_287 = arith.constant 8 : index
    %c0_288 = arith.constant 0 : index
    %c0_289 = arith.constant 0 : index
    %296 = vector.load %arg5[%c2_286, %c8_287, %c0_288, %c0_289] : memref<5x9x128x128xbf16, #tpu.memory_space<vmem>>, vector<1x1x128x128xbf16>
    %297 = vector.shape_cast %296 : vector<1x1x128x128xbf16> to vector<128x128xbf16>
    %cst_290 = arith.constant dense<0.000000e+00> : vector<64x128xf32>
    %298 = tpu.matmul %295, %297, %cst_290 {dimension_numbers = #tpu.dot_dimension_numbers<[1], [0], [0], [1], [0, 0, 1, 1], [], []>} : vector<64x128xbf16>, vector<128x128xbf16>, vector<64x128xf32> -> vector<64x128xf32>
    %299 = arith.addf %292, %298 : vector<64x128xf32>
    %c3_291 = arith.constant 3 : index
    %c0_292 = arith.constant 0 : index
    %c0_293 = arith.constant 0 : index
    %300 = vector.load %arg6[%c3_291, %c0_292, %c0_293] : memref<7x2x128xf32, #tpu.memory_space<vmem>>, vector<1x1x128xf32>
    %301 = vector.shape_cast %300 : vector<1x1x128xf32> to vector<1x128xf32>
    %302 = vector.broadcast %301 : vector<1x128xf32> to vector<64x128xf32>
    %303 = arith.mulf %299, %302 : vector<64x128xf32>
    %c3_294 = arith.constant 3 : index
    %c1_295 = arith.constant 1 : index
    %c0_296 = arith.constant 0 : index
    %304 = vector.load %arg6[%c3_294, %c1_295, %c0_296] : memref<7x2x128xf32, #tpu.memory_space<vmem>>, vector<1x1x128xf32>
    %305 = vector.shape_cast %304 : vector<1x1x128xf32> to vector<1x128xf32>
    %306 = vector.broadcast %305 : vector<1x128xf32> to vector<64x128xf32>
    %307 = arith.addf %303, %306 : vector<64x128xf32>
    %cst_297 = arith.constant 0.0787401571 : f32
    %308 = vector.broadcast %cst_297 : f32 to vector<64x128xf32>
    %309 = arith.divf %307, %308 : vector<64x128xf32>
    %310 = math.roundeven %309 : vector<64x128xf32>
    %cst_298 = arith.constant -1.270000e+02 : f32
    %cst_299 = arith.constant 1.270000e+02 : f32
    %311 = vector.broadcast %cst_298 : f32 to vector<64x128xf32>
    %312 = arith.maximumf %311, %310 : vector<64x128xf32>
    %313 = vector.broadcast %cst_299 : f32 to vector<64x128xf32>
    %314 = arith.minimumf %313, %312 : vector<64x128xf32>
    %cst_300 = arith.constant 0.0787401571 : f32
    %315 = vector.broadcast %cst_300 : f32 to vector<64x128xf32>
    %316 = arith.mulf %314, %315 : vector<64x128xf32>
    %c1_301 = arith.constant 1 : index
    %c1_302 = arith.constant 1 : index
    %c0_303 = arith.constant 0 : index
    %317 = vector.load %arg9[%c1_301, %c1_302, %c0_303] : memref<10x10x128xf32, #tpu.memory_space<vmem>>, vector<8x8x128xf32>
    %318 = vector.shape_cast %317 : vector<8x8x128xf32> to vector<64x128xf32>
    %cst_304 = arith.constant 0.0787401571 : f32
    %319 = vector.broadcast %cst_304 : f32 to vector<64x128xf32>
    %320 = arith.divf %318, %319 : vector<64x128xf32>
    %321 = math.roundeven %320 : vector<64x128xf32>
    %cst_305 = arith.constant -1.270000e+02 : f32
    %cst_306 = arith.constant 1.270000e+02 : f32
    %322 = vector.broadcast %cst_305 : f32 to vector<64x128xf32>
    %323 = arith.maximumf %322, %321 : vector<64x128xf32>
    %324 = vector.broadcast %cst_306 : f32 to vector<64x128xf32>
    %325 = arith.minimumf %324, %323 : vector<64x128xf32>
    %cst_307 = arith.constant 0.0787401571 : f32
    %326 = vector.broadcast %cst_307 : f32 to vector<64x128xf32>
    %327 = arith.mulf %325, %326 : vector<64x128xf32>
    %328 = arith.addf %316, %327 : vector<64x128xf32>
    %cst_308 = arith.constant 0.000000e+00 : f32
    %329 = vector.broadcast %cst_308 : f32 to vector<64x128xf32>
    %330 = arith.maximumf %328, %329 : vector<64x128xf32>
    %cst_309 = arith.constant 5.000000e-01 : f32
    %331 = vector.broadcast %cst_309 : f32 to vector<64x128xf32>
    %332 = arith.divf %330, %331 : vector<64x128xf32>
    %333 = math.roundeven %332 : vector<64x128xf32>
    %cst_310 = arith.constant 0.000000e+00 : f32
    %cst_311 = arith.constant 3.000000e+00 : f32
    %334 = vector.broadcast %cst_310 : f32 to vector<64x128xf32>
    %335 = arith.maximumf %334, %333 : vector<64x128xf32>
    %336 = vector.broadcast %cst_311 : f32 to vector<64x128xf32>
    %337 = arith.minimumf %336, %335 : vector<64x128xf32>
    %cst_312 = arith.constant 5.000000e-01 : f32
    %338 = vector.broadcast %cst_312 : f32 to vector<64x128xf32>
    %339 = arith.mulf %337, %338 : vector<64x128xf32>
    %340 = vector.shape_cast %339 : vector<64x128xf32> to vector<8x8x128xf32>
    %c1_313 = arith.constant 1 : index
    %c1_314 = arith.constant 1 : index
    %c0_315 = arith.constant 0 : index
    %341 = vector.load %arg9[%c1_313, %c1_314, %c0_315] : memref<10x10x128xf32, #tpu.memory_space<vmem>>, vector<8x8x128xf32>
    tpu.vector_store %arg9[%c1_313, %c1_314, %c0_315], %340 {strides = array<i32>} : memref<10x10x128xf32, #tpu.memory_space<vmem>>, vector<8x8x128xf32>,
    %cst_316 = arith.constant 0.000000e+00 : f32
    %342 = vector.broadcast %cst_316 : f32 to vector<64x128xf32>
    %c0_317 = arith.constant 0 : index
    %c0_318 = arith.constant 0 : index
    %c0_319 = arith.constant 0 : index
    %343 = vector.load %arg9[%c0_317, %c0_318, %c0_319] : memref<10x10x128xf32, #tpu.memory_space<vmem>>, vector<8x8x128xf32>
    %344 = vector.shape_cast %343 : vector<8x8x128xf32> to vector<64x128xf32>
    %345 = arith.truncf %344 : vector<64x128xf32> to vector<64x128xbf16>
    %c3_320 = arith.constant 3 : index
    %c0_321 = arith.constant 0 : index
    %c0_322 = arith.constant 0 : index
    %c0_323 = arith.constant 0 : index
    %346 = vector.load %arg5[%c3_320, %c0_321, %c0_322, %c0_323] : memref<5x9x128x128xbf16, #tpu.memory_space<vmem>>, vector<1x1x128x128xbf16>
    %347 = vector.shape_cast %346 : vector<1x1x128x128xbf16> to vector<128x128xbf16>
    %cst_324 = arith.constant dense<0.000000e+00> : vector<64x128xf32>
    %348 = tpu.matmul %345, %347, %cst_324 {dimension_numbers = #tpu.dot_dimension_numbers<[1], [0], [0], [1], [0, 0, 1, 1], [], []>} : vector<64x128xbf16>, vector<128x128xbf16>, vector<64x128xf32> -> vector<64x128xf32>
    %349 = arith.addf %342, %348 : vector<64x128xf32>
    %c0_325 = arith.constant 0 : index
    %c1_326 = arith.constant 1 : index
    %c0_327 = arith.constant 0 : index
    %350 = vector.load %arg9[%c0_325, %c1_326, %c0_327] : memref<10x10x128xf32, #tpu.memory_space<vmem>>, vector<8x8x128xf32>
    %351 = vector.shape_cast %350 : vector<8x8x128xf32> to vector<64x128xf32>
    %352 = arith.truncf %351 : vector<64x128xf32> to vector<64x128xbf16>
    %c3_328 = arith.constant 3 : index
    %c1_329 = arith.constant 1 : index
    %c0_330 = arith.constant 0 : index
    %c0_331 = arith.constant 0 : index
    %353 = vector.load %arg5[%c3_328, %c1_329, %c0_330, %c0_331] : memref<5x9x128x128xbf16, #tpu.memory_space<vmem>>, vector<1x1x128x128xbf16>
    %354 = vector.shape_cast %353 : vector<1x1x128x128xbf16> to vector<128x128xbf16>
    %cst_332 = arith.constant dense<0.000000e+00> : vector<64x128xf32>
    %355 = tpu.matmul %352, %354, %cst_332 {dimension_numbers = #tpu.dot_dimension_numbers<[1], [0], [0], [1], [0, 0, 1, 1], [], []>} : vector<64x128xbf16>, vector<128x128xbf16>, vector<64x128xf32> -> vector<64x128xf32>
    %356 = arith.addf %349, %355 : vector<64x128xf32>
    %c0_333 = arith.constant 0 : index
    %c2_334 = arith.constant 2 : index
    %c0_335 = arith.constant 0 : index
    %357 = vector.load %arg9[%c0_333, %c2_334, %c0_335] : memref<10x10x128xf32, #tpu.memory_space<vmem>>, vector<8x8x128xf32>
    %358 = vector.shape_cast %357 : vector<8x8x128xf32> to vector<64x128xf32>
    %359 = arith.truncf %358 : vector<64x128xf32> to vector<64x128xbf16>
    %c3_336 = arith.constant 3 : index
    %c2_337 = arith.constant 2 : index
    %c0_338 = arith.constant 0 : index
    %c0_339 = arith.constant 0 : index
    %360 = vector.load %arg5[%c3_336, %c2_337, %c0_338, %c0_339] : memref<5x9x128x128xbf16, #tpu.memory_space<vmem>>, vector<1x1x128x128xbf16>
    %361 = vector.shape_cast %360 : vector<1x1x128x128xbf16> to vector<128x128xbf16>
    %cst_340 = arith.constant dense<0.000000e+00> : vector<64x128xf32>
    %362 = tpu.matmul %359, %361, %cst_340 {dimension_numbers = #tpu.dot_dimension_numbers<[1], [0], [0], [1], [0, 0, 1, 1], [], []>} : vector<64x128xbf16>, vector<128x128xbf16>, vector<64x128xf32> -> vector<64x128xf32>
    %363 = arith.addf %356, %362 : vector<64x128xf32>
    %c1_341 = arith.constant 1 : index
    %c0_342 = arith.constant 0 : index
    %c0_343 = arith.constant 0 : index
    %364 = vector.load %arg9[%c1_341, %c0_342, %c0_343] : memref<10x10x128xf32, #tpu.memory_space<vmem>>, vector<8x8x128xf32>
    %365 = vector.shape_cast %364 : vector<8x8x128xf32> to vector<64x128xf32>
    %366 = arith.truncf %365 : vector<64x128xf32> to vector<64x128xbf16>
    %c3_344 = arith.constant 3 : index
    %c3_345 = arith.constant 3 : index
    %c0_346 = arith.constant 0 : index
    %c0_347 = arith.constant 0 : index
    %367 = vector.load %arg5[%c3_344, %c3_345, %c0_346, %c0_347] : memref<5x9x128x128xbf16, #tpu.memory_space<vmem>>, vector<1x1x128x128xbf16>
    %368 = vector.shape_cast %367 : vector<1x1x128x128xbf16> to vector<128x128xbf16>
    %cst_348 = arith.constant dense<0.000000e+00> : vector<64x128xf32>
    %369 = tpu.matmul %366, %368, %cst_348 {dimension_numbers = #tpu.dot_dimension_numbers<[1], [0], [0], [1], [0, 0, 1, 1], [], []>} : vector<64x128xbf16>, vector<128x128xbf16>, vector<64x128xf32> -> vector<64x128xf32>
    %370 = arith.addf %363, %369 : vector<64x128xf32>
    %c1_349 = arith.constant 1 : index
    %c1_350 = arith.constant 1 : index
    %c0_351 = arith.constant 0 : index
    %371 = vector.load %arg9[%c1_349, %c1_350, %c0_351] : memref<10x10x128xf32, #tpu.memory_space<vmem>>, vector<8x8x128xf32>
    %372 = vector.shape_cast %371 : vector<8x8x128xf32> to vector<64x128xf32>
    %373 = arith.truncf %372 : vector<64x128xf32> to vector<64x128xbf16>
    %c3_352 = arith.constant 3 : index
    %c4_353 = arith.constant 4 : index
    %c0_354 = arith.constant 0 : index
    %c0_355 = arith.constant 0 : index
    %374 = vector.load %arg5[%c3_352, %c4_353, %c0_354, %c0_355] : memref<5x9x128x128xbf16, #tpu.memory_space<vmem>>, vector<1x1x128x128xbf16>
    %375 = vector.shape_cast %374 : vector<1x1x128x128xbf16> to vector<128x128xbf16>
    %cst_356 = arith.constant dense<0.000000e+00> : vector<64x128xf32>
    %376 = tpu.matmul %373, %375, %cst_356 {dimension_numbers = #tpu.dot_dimension_numbers<[1], [0], [0], [1], [0, 0, 1, 1], [], []>} : vector<64x128xbf16>, vector<128x128xbf16>, vector<64x128xf32> -> vector<64x128xf32>
    %377 = arith.addf %370, %376 : vector<64x128xf32>
    %c1_357 = arith.constant 1 : index
    %c2_358 = arith.constant 2 : index
    %c0_359 = arith.constant 0 : index
    %378 = vector.load %arg9[%c1_357, %c2_358, %c0_359] : memref<10x10x128xf32, #tpu.memory_space<vmem>>, vector<8x8x128xf32>
    %379 = vector.shape_cast %378 : vector<8x8x128xf32> to vector<64x128xf32>
    %380 = arith.truncf %379 : vector<64x128xf32> to vector<64x128xbf16>
    %c3_360 = arith.constant 3 : index
    %c5_361 = arith.constant 5 : index
    %c0_362 = arith.constant 0 : index
    %c0_363 = arith.constant 0 : index
    %381 = vector.load %arg5[%c3_360, %c5_361, %c0_362, %c0_363] : memref<5x9x128x128xbf16, #tpu.memory_space<vmem>>, vector<1x1x128x128xbf16>
    %382 = vector.shape_cast %381 : vector<1x1x128x128xbf16> to vector<128x128xbf16>
    %cst_364 = arith.constant dense<0.000000e+00> : vector<64x128xf32>
    %383 = tpu.matmul %380, %382, %cst_364 {dimension_numbers = #tpu.dot_dimension_numbers<[1], [0], [0], [1], [0, 0, 1, 1], [], []>} : vector<64x128xbf16>, vector<128x128xbf16>, vector<64x128xf32> -> vector<64x128xf32>
    %384 = arith.addf %377, %383 : vector<64x128xf32>
    %c2_365 = arith.constant 2 : index
    %c0_366 = arith.constant 0 : index
    %c0_367 = arith.constant 0 : index
    %385 = vector.load %arg9[%c2_365, %c0_366, %c0_367] : memref<10x10x128xf32, #tpu.memory_space<vmem>>, vector<8x8x128xf32>
    %386 = vector.shape_cast %385 : vector<8x8x128xf32> to vector<64x128xf32>
    %387 = arith.truncf %386 : vector<64x128xf32> to vector<64x128xbf16>
    %c3_368 = arith.constant 3 : index
    %c6_369 = arith.constant 6 : index
    %c0_370 = arith.constant 0 : index
    %c0_371 = arith.constant 0 : index
    %388 = vector.load %arg5[%c3_368, %c6_369, %c0_370, %c0_371] : memref<5x9x128x128xbf16, #tpu.memory_space<vmem>>, vector<1x1x128x128xbf16>
    %389 = vector.shape_cast %388 : vector<1x1x128x128xbf16> to vector<128x128xbf16>
    %cst_372 = arith.constant dense<0.000000e+00> : vector<64x128xf32>
    %390 = tpu.matmul %387, %389, %cst_372 {dimension_numbers = #tpu.dot_dimension_numbers<[1], [0], [0], [1], [0, 0, 1, 1], [], []>} : vector<64x128xbf16>, vector<128x128xbf16>, vector<64x128xf32> -> vector<64x128xf32>
    %391 = arith.addf %384, %390 : vector<64x128xf32>
    %c2_373 = arith.constant 2 : index
    %c1_374 = arith.constant 1 : index
    %c0_375 = arith.constant 0 : index
    %392 = vector.load %arg9[%c2_373, %c1_374, %c0_375] : memref<10x10x128xf32, #tpu.memory_space<vmem>>, vector<8x8x128xf32>
    %393 = vector.shape_cast %392 : vector<8x8x128xf32> to vector<64x128xf32>
    %394 = arith.truncf %393 : vector<64x128xf32> to vector<64x128xbf16>
    %c3_376 = arith.constant 3 : index
    %c7_377 = arith.constant 7 : index
    %c0_378 = arith.constant 0 : index
    %c0_379 = arith.constant 0 : index
    %395 = vector.load %arg5[%c3_376, %c7_377, %c0_378, %c0_379] : memref<5x9x128x128xbf16, #tpu.memory_space<vmem>>, vector<1x1x128x128xbf16>
    %396 = vector.shape_cast %395 : vector<1x1x128x128xbf16> to vector<128x128xbf16>
    %cst_380 = arith.constant dense<0.000000e+00> : vector<64x128xf32>
    %397 = tpu.matmul %394, %396, %cst_380 {dimension_numbers = #tpu.dot_dimension_numbers<[1], [0], [0], [1], [0, 0, 1, 1], [], []>} : vector<64x128xbf16>, vector<128x128xbf16>, vector<64x128xf32> -> vector<64x128xf32>
    %398 = arith.addf %391, %397 : vector<64x128xf32>
    %c2_381 = arith.constant 2 : index
    %c2_382 = arith.constant 2 : index
    %c0_383 = arith.constant 0 : index
    %399 = vector.load %arg9[%c2_381, %c2_382, %c0_383] : memref<10x10x128xf32, #tpu.memory_space<vmem>>, vector<8x8x128xf32>
    %400 = vector.shape_cast %399 : vector<8x8x128xf32> to vector<64x128xf32>
    %401 = arith.truncf %400 : vector<64x128xf32> to vector<64x128xbf16>
    %c3_384 = arith.constant 3 : index
    %c8_385 = arith.constant 8 : index
    %c0_386 = arith.constant 0 : index
    %c0_387 = arith.constant 0 : index
    %402 = vector.load %arg5[%c3_384, %c8_385, %c0_386, %c0_387] : memref<5x9x128x128xbf16, #tpu.memory_space<vmem>>, vector<1x1x128x128xbf16>
    %403 = vector.shape_cast %402 : vector<1x1x128x128xbf16> to vector<128x128xbf16>
    %cst_388 = arith.constant dense<0.000000e+00> : vector<64x128xf32>
    %404 = tpu.matmul %401, %403, %cst_388 {dimension_numbers = #tpu.dot_dimension_numbers<[1], [0], [0], [1], [0, 0, 1, 1], [], []>} : vector<64x128xbf16>, vector<128x128xbf16>, vector<64x128xf32> -> vector<64x128xf32>
    %405 = arith.addf %398, %404 : vector<64x128xf32>
    %c4_389 = arith.constant 4 : index
    %c0_390 = arith.constant 0 : index
    %c0_391 = arith.constant 0 : index
    %406 = vector.load %arg6[%c4_389, %c0_390, %c0_391] : memref<7x2x128xf32, #tpu.memory_space<vmem>>, vector<1x1x128xf32>
    %407 = vector.shape_cast %406 : vector<1x1x128xf32> to vector<1x128xf32>
    %408 = vector.broadcast %407 : vector<1x128xf32> to vector<64x128xf32>
    %409 = arith.mulf %405, %408 : vector<64x128xf32>
    %c4_392 = arith.constant 4 : index
    %c1_393 = arith.constant 1 : index
    %c0_394 = arith.constant 0 : index
    %410 = vector.load %arg6[%c4_392, %c1_393, %c0_394] : memref<7x2x128xf32, #tpu.memory_space<vmem>>, vector<1x1x128xf32>
    %411 = vector.shape_cast %410 : vector<1x1x128xf32> to vector<1x128xf32>
    %412 = vector.broadcast %411 : vector<1x128xf32> to vector<64x128xf32>
    %413 = arith.addf %409, %412 : vector<64x128xf32>
    %cst_395 = arith.constant 0.000000e+00 : f32
    %414 = vector.broadcast %cst_395 : f32 to vector<64x128xf32>
    %415 = arith.maximumf %413, %414 : vector<64x128xf32>
    %cst_396 = arith.constant 5.000000e-01 : f32
    %416 = vector.broadcast %cst_396 : f32 to vector<64x128xf32>
    %417 = arith.divf %415, %416 : vector<64x128xf32>
    %418 = math.roundeven %417 : vector<64x128xf32>
    %cst_397 = arith.constant 0.000000e+00 : f32
    %cst_398 = arith.constant 3.000000e+00 : f32
    %419 = vector.broadcast %cst_397 : f32 to vector<64x128xf32>
    %420 = arith.maximumf %419, %418 : vector<64x128xf32>
    %421 = vector.broadcast %cst_398 : f32 to vector<64x128xf32>
    %422 = arith.minimumf %421, %420 : vector<64x128xf32>
    %cst_399 = arith.constant 5.000000e-01 : f32
    %423 = vector.broadcast %cst_399 : f32 to vector<64x128xf32>
    %424 = arith.mulf %422, %423 : vector<64x128xf32>
    %425 = vector.shape_cast %424 : vector<64x128xf32> to vector<8x8x128xf32>
    %c1_400 = arith.constant 1 : index
    %c1_401 = arith.constant 1 : index
    %c0_402 = arith.constant 0 : index
    %426 = vector.load %arg8[%c1_400, %c1_401, %c0_402] : memref<10x10x128xf32, #tpu.memory_space<vmem>>, vector<8x8x128xf32>
    tpu.vector_store %arg8[%c1_400, %c1_401, %c0_402], %425 {strides = array<i32>} : memref<10x10x128xf32, #tpu.memory_space<vmem>>, vector<8x8x128xf32>,
    %cst_403 = arith.constant 0.000000e+00 : f32
    %427 = vector.broadcast %cst_403 : f32 to vector<64x128xf32>
    %c0_404 = arith.constant 0 : index
    %c0_405 = arith.constant 0 : index
    %c0_406 = arith.constant 0 : index
    %428 = vector.load %arg8[%c0_404, %c0_405, %c0_406] : memref<10x10x128xf32, #tpu.memory_space<vmem>>, vector<8x8x128xf32>
    %429 = vector.shape_cast %428 : vector<8x8x128xf32> to vector<64x128xf32>
    %430 = arith.truncf %429 : vector<64x128xf32> to vector<64x128xbf16>
    %c4_407 = arith.constant 4 : index
    %c0_408 = arith.constant 0 : index
    %c0_409 = arith.constant 0 : index
    %c0_410 = arith.constant 0 : index
    %431 = vector.load %arg5[%c4_407, %c0_408, %c0_409, %c0_410] : memref<5x9x128x128xbf16, #tpu.memory_space<vmem>>, vector<1x1x128x128xbf16>
    %432 = vector.shape_cast %431 : vector<1x1x128x128xbf16> to vector<128x128xbf16>
    %cst_411 = arith.constant dense<0.000000e+00> : vector<64x128xf32>
    %433 = tpu.matmul %430, %432, %cst_411 {dimension_numbers = #tpu.dot_dimension_numbers<[1], [0], [0], [1], [0, 0, 1, 1], [], []>} : vector<64x128xbf16>, vector<128x128xbf16>, vector<64x128xf32> -> vector<64x128xf32>
    %434 = arith.addf %427, %433 : vector<64x128xf32>
    %c0_412 = arith.constant 0 : index
    %c1_413 = arith.constant 1 : index
    %c0_414 = arith.constant 0 : index
    %435 = vector.load %arg8[%c0_412, %c1_413, %c0_414] : memref<10x10x128xf32, #tpu.memory_space<vmem>>, vector<8x8x128xf32>
    %436 = vector.shape_cast %435 : vector<8x8x128xf32> to vector<64x128xf32>
    %437 = arith.truncf %436 : vector<64x128xf32> to vector<64x128xbf16>
    %c4_415 = arith.constant 4 : index
    %c1_416 = arith.constant 1 : index
    %c0_417 = arith.constant 0 : index
    %c0_418 = arith.constant 0 : index
    %438 = vector.load %arg5[%c4_415, %c1_416, %c0_417, %c0_418] : memref<5x9x128x128xbf16, #tpu.memory_space<vmem>>, vector<1x1x128x128xbf16>
    %439 = vector.shape_cast %438 : vector<1x1x128x128xbf16> to vector<128x128xbf16>
    %cst_419 = arith.constant dense<0.000000e+00> : vector<64x128xf32>
    %440 = tpu.matmul %437, %439, %cst_419 {dimension_numbers = #tpu.dot_dimension_numbers<[1], [0], [0], [1], [0, 0, 1, 1], [], []>} : vector<64x128xbf16>, vector<128x128xbf16>, vector<64x128xf32> -> vector<64x128xf32>
    %441 = arith.addf %434, %440 : vector<64x128xf32>
    %c0_420 = arith.constant 0 : index
    %c2_421 = arith.constant 2 : index
    %c0_422 = arith.constant 0 : index
    %442 = vector.load %arg8[%c0_420, %c2_421, %c0_422] : memref<10x10x128xf32, #tpu.memory_space<vmem>>, vector<8x8x128xf32>
    %443 = vector.shape_cast %442 : vector<8x8x128xf32> to vector<64x128xf32>
    %444 = arith.truncf %443 : vector<64x128xf32> to vector<64x128xbf16>
    %c4_423 = arith.constant 4 : index
    %c2_424 = arith.constant 2 : index
    %c0_425 = arith.constant 0 : index
    %c0_426 = arith.constant 0 : index
    %445 = vector.load %arg5[%c4_423, %c2_424, %c0_425, %c0_426] : memref<5x9x128x128xbf16, #tpu.memory_space<vmem>>, vector<1x1x128x128xbf16>
    %446 = vector.shape_cast %445 : vector<1x1x128x128xbf16> to vector<128x128xbf16>
    %cst_427 = arith.constant dense<0.000000e+00> : vector<64x128xf32>
    %447 = tpu.matmul %444, %446, %cst_427 {dimension_numbers = #tpu.dot_dimension_numbers<[1], [0], [0], [1], [0, 0, 1, 1], [], []>} : vector<64x128xbf16>, vector<128x128xbf16>, vector<64x128xf32> -> vector<64x128xf32>
    %448 = arith.addf %441, %447 : vector<64x128xf32>
    %c1_428 = arith.constant 1 : index
    %c0_429 = arith.constant 0 : index
    %c0_430 = arith.constant 0 : index
    %449 = vector.load %arg8[%c1_428, %c0_429, %c0_430] : memref<10x10x128xf32, #tpu.memory_space<vmem>>, vector<8x8x128xf32>
    %450 = vector.shape_cast %449 : vector<8x8x128xf32> to vector<64x128xf32>
    %451 = arith.truncf %450 : vector<64x128xf32> to vector<64x128xbf16>
    %c4_431 = arith.constant 4 : index
    %c3_432 = arith.constant 3 : index
    %c0_433 = arith.constant 0 : index
    %c0_434 = arith.constant 0 : index
    %452 = vector.load %arg5[%c4_431, %c3_432, %c0_433, %c0_434] : memref<5x9x128x128xbf16, #tpu.memory_space<vmem>>, vector<1x1x128x128xbf16>
    %453 = vector.shape_cast %452 : vector<1x1x128x128xbf16> to vector<128x128xbf16>
    %cst_435 = arith.constant dense<0.000000e+00> : vector<64x128xf32>
    %454 = tpu.matmul %451, %453, %cst_435 {dimension_numbers = #tpu.dot_dimension_numbers<[1], [0], [0], [1], [0, 0, 1, 1], [], []>} : vector<64x128xbf16>, vector<128x128xbf16>, vector<64x128xf32> -> vector<64x128xf32>
    %455 = arith.addf %448, %454 : vector<64x128xf32>
    %c1_436 = arith.constant 1 : index
    %c1_437 = arith.constant 1 : index
    %c0_438 = arith.constant 0 : index
    %456 = vector.load %arg8[%c1_436, %c1_437, %c0_438] : memref<10x10x128xf32, #tpu.memory_space<vmem>>, vector<8x8x128xf32>
    %457 = vector.shape_cast %456 : vector<8x8x128xf32> to vector<64x128xf32>
    %458 = arith.truncf %457 : vector<64x128xf32> to vector<64x128xbf16>
    %c4_439 = arith.constant 4 : index
    %c4_440 = arith.constant 4 : index
    %c0_441 = arith.constant 0 : index
    %c0_442 = arith.constant 0 : index
    %459 = vector.load %arg5[%c4_439, %c4_440, %c0_441, %c0_442] : memref<5x9x128x128xbf16, #tpu.memory_space<vmem>>, vector<1x1x128x128xbf16>
    %460 = vector.shape_cast %459 : vector<1x1x128x128xbf16> to vector<128x128xbf16>
    %cst_443 = arith.constant dense<0.000000e+00> : vector<64x128xf32>
    %461 = tpu.matmul %458, %460, %cst_443 {dimension_numbers = #tpu.dot_dimension_numbers<[1], [0], [0], [1], [0, 0, 1, 1], [], []>} : vector<64x128xbf16>, vector<128x128xbf16>, vector<64x128xf32> -> vector<64x128xf32>
    %462 = arith.addf %455, %461 : vector<64x128xf32>
    %c1_444 = arith.constant 1 : index
    %c2_445 = arith.constant 2 : index
    %c0_446 = arith.constant 0 : index
    %463 = vector.load %arg8[%c1_444, %c2_445, %c0_446] : memref<10x10x128xf32, #tpu.memory_space<vmem>>, vector<8x8x128xf32>
    %464 = vector.shape_cast %463 : vector<8x8x128xf32> to vector<64x128xf32>
    %465 = arith.truncf %464 : vector<64x128xf32> to vector<64x128xbf16>
    %c4_447 = arith.constant 4 : index
    %c5_448 = arith.constant 5 : index
    %c0_449 = arith.constant 0 : index
    %c0_450 = arith.constant 0 : index
    %466 = vector.load %arg5[%c4_447, %c5_448, %c0_449, %c0_450] : memref<5x9x128x128xbf16, #tpu.memory_space<vmem>>, vector<1x1x128x128xbf16>
    %467 = vector.shape_cast %466 : vector<1x1x128x128xbf16> to vector<128x128xbf16>
    %cst_451 = arith.constant dense<0.000000e+00> : vector<64x128xf32>
    %468 = tpu.matmul %465, %467, %cst_451 {dimension_numbers = #tpu.dot_dimension_numbers<[1], [0], [0], [1], [0, 0, 1, 1], [], []>} : vector<64x128xbf16>, vector<128x128xbf16>, vector<64x128xf32> -> vector<64x128xf32>
    %469 = arith.addf %462, %468 : vector<64x128xf32>
    %c2_452 = arith.constant 2 : index
    %c0_453 = arith.constant 0 : index
    %c0_454 = arith.constant 0 : index
    %470 = vector.load %arg8[%c2_452, %c0_453, %c0_454] : memref<10x10x128xf32, #tpu.memory_space<vmem>>, vector<8x8x128xf32>
    %471 = vector.shape_cast %470 : vector<8x8x128xf32> to vector<64x128xf32>
    %472 = arith.truncf %471 : vector<64x128xf32> to vector<64x128xbf16>
    %c4_455 = arith.constant 4 : index
    %c6_456 = arith.constant 6 : index
    %c0_457 = arith.constant 0 : index
    %c0_458 = arith.constant 0 : index
    %473 = vector.load %arg5[%c4_455, %c6_456, %c0_457, %c0_458] : memref<5x9x128x128xbf16, #tpu.memory_space<vmem>>, vector<1x1x128x128xbf16>
    %474 = vector.shape_cast %473 : vector<1x1x128x128xbf16> to vector<128x128xbf16>
    %cst_459 = arith.constant dense<0.000000e+00> : vector<64x128xf32>
    %475 = tpu.matmul %472, %474, %cst_459 {dimension_numbers = #tpu.dot_dimension_numbers<[1], [0], [0], [1], [0, 0, 1, 1], [], []>} : vector<64x128xbf16>, vector<128x128xbf16>, vector<64x128xf32> -> vector<64x128xf32>
    %476 = arith.addf %469, %475 : vector<64x128xf32>
    %c2_460 = arith.constant 2 : index
    %c1_461 = arith.constant 1 : index
    %c0_462 = arith.constant 0 : index
    %477 = vector.load %arg8[%c2_460, %c1_461, %c0_462] : memref<10x10x128xf32, #tpu.memory_space<vmem>>, vector<8x8x128xf32>
    %478 = vector.shape_cast %477 : vector<8x8x128xf32> to vector<64x128xf32>
    %479 = arith.truncf %478 : vector<64x128xf32> to vector<64x128xbf16>
    %c4_463 = arith.constant 4 : index
    %c7_464 = arith.constant 7 : index
    %c0_465 = arith.constant 0 : index
    %c0_466 = arith.constant 0 : index
    %480 = vector.load %arg5[%c4_463, %c7_464, %c0_465, %c0_466] : memref<5x9x128x128xbf16, #tpu.memory_space<vmem>>, vector<1x1x128x128xbf16>
    %481 = vector.shape_cast %480 : vector<1x1x128x128xbf16> to vector<128x128xbf16>
    %cst_467 = arith.constant dense<0.000000e+00> : vector<64x128xf32>
    %482 = tpu.matmul %479, %481, %cst_467 {dimension_numbers = #tpu.dot_dimension_numbers<[1], [0], [0], [1], [0, 0, 1, 1], [], []>} : vector<64x128xbf16>, vector<128x128xbf16>, vector<64x128xf32> -> vector<64x128xf32>
    %483 = arith.addf %476, %482 : vector<64x128xf32>
    %c2_468 = arith.constant 2 : index
    %c2_469 = arith.constant 2 : index
    %c0_470 = arith.constant 0 : index
    %484 = vector.load %arg8[%c2_468, %c2_469, %c0_470] : memref<10x10x128xf32, #tpu.memory_space<vmem>>, vector<8x8x128xf32>
    %485 = vector.shape_cast %484 : vector<8x8x128xf32> to vector<64x128xf32>
    %486 = arith.truncf %485 : vector<64x128xf32> to vector<64x128xbf16>
    %c4_471 = arith.constant 4 : index
    %c8_472 = arith.constant 8 : index
    %c0_473 = arith.constant 0 : index
    %c0_474 = arith.constant 0 : index
    %487 = vector.load %arg5[%c4_471, %c8_472, %c0_473, %c0_474] : memref<5x9x128x128xbf16, #tpu.memory_space<vmem>>, vector<1x1x128x128xbf16>
    %488 = vector.shape_cast %487 : vector<1x1x128x128xbf16> to vector<128x128xbf16>
    %cst_475 = arith.constant dense<0.000000e+00> : vector<64x128xf32>
    %489 = tpu.matmul %486, %488, %cst_475 {dimension_numbers = #tpu.dot_dimension_numbers<[1], [0], [0], [1], [0, 0, 1, 1], [], []>} : vector<64x128xbf16>, vector<128x128xbf16>, vector<64x128xf32> -> vector<64x128xf32>
    %490 = arith.addf %483, %489 : vector<64x128xf32>
    %c5_476 = arith.constant 5 : index
    %c0_477 = arith.constant 0 : index
    %c0_478 = arith.constant 0 : index
    %491 = vector.load %arg6[%c5_476, %c0_477, %c0_478] : memref<7x2x128xf32, #tpu.memory_space<vmem>>, vector<1x1x128xf32>
    %492 = vector.shape_cast %491 : vector<1x1x128xf32> to vector<1x128xf32>
    %493 = vector.broadcast %492 : vector<1x128xf32> to vector<64x128xf32>
    %494 = arith.mulf %490, %493 : vector<64x128xf32>
    %c5_479 = arith.constant 5 : index
    %c1_480 = arith.constant 1 : index
    %c0_481 = arith.constant 0 : index
    %495 = vector.load %arg6[%c5_479, %c1_480, %c0_481] : memref<7x2x128xf32, #tpu.memory_space<vmem>>, vector<1x1x128xf32>
    %496 = vector.shape_cast %495 : vector<1x1x128xf32> to vector<1x128xf32>
    %497 = vector.broadcast %496 : vector<1x128xf32> to vector<64x128xf32>
    %498 = arith.addf %494, %497 : vector<64x128xf32>
    %c1_482 = arith.constant 1 : index
    %c1_483 = arith.constant 1 : index
    %c0_484 = arith.constant 0 : index
    %499 = vector.load %arg9[%c1_482, %c1_483, %c0_484] : memref<10x10x128xf32, #tpu.memory_space<vmem>>, vector<8x8x128xf32>
    %500 = vector.shape_cast %499 : vector<8x8x128xf32> to vector<64x128xf32>
    %cst_485 = arith.constant 0.0787401571 : f32
    %501 = vector.broadcast %cst_485 : f32 to vector<64x128xf32>
    %502 = arith.divf %500, %501 : vector<64x128xf32>
    %503 = math.roundeven %502 : vector<64x128xf32>
    %cst_486 = arith.constant -1.270000e+02 : f32
    %cst_487 = arith.constant 1.270000e+02 : f32
    %504 = vector.broadcast %cst_486 : f32 to vector<64x128xf32>
    %505 = arith.maximumf %504, %503 : vector<64x128xf32>
    %506 = vector.broadcast %cst_487 : f32 to vector<64x128xf32>
    %507 = arith.minimumf %506, %505 : vector<64x128xf32>
    %cst_488 = arith.constant 0.0787401571 : f32
    %508 = vector.broadcast %cst_488 : f32 to vector<64x128xf32>
    %509 = arith.mulf %507, %508 : vector<64x128xf32>
    %cst_489 = arith.constant 0.0787401571 : f32
    %510 = vector.broadcast %cst_489 : f32 to vector<64x128xf32>
    %511 = arith.divf %498, %510 : vector<64x128xf32>
    %512 = math.roundeven %511 : vector<64x128xf32>
    %cst_490 = arith.constant -1.270000e+02 : f32
    %cst_491 = arith.constant 1.270000e+02 : f32
    %513 = vector.broadcast %cst_490 : f32 to vector<64x128xf32>
    %514 = arith.maximumf %513, %512 : vector<64x128xf32>
    %515 = vector.broadcast %cst_491 : f32 to vector<64x128xf32>
    %516 = arith.minimumf %515, %514 : vector<64x128xf32>
    %cst_492 = arith.constant 0.0787401571 : f32
    %517 = vector.broadcast %cst_492 : f32 to vector<64x128xf32>
    %518 = arith.mulf %516, %517 : vector<64x128xf32>
    %519 = arith.addf %509, %518 : vector<64x128xf32>
    %cst_493 = arith.constant 0.000000e+00 : f32
    %520 = vector.broadcast %cst_493 : f32 to vector<64x128xf32>
    %521 = arith.maximumf %519, %520 : vector<64x128xf32>
    %cst_494 = arith.constant 5.000000e-01 : f32
    %522 = vector.broadcast %cst_494 : f32 to vector<64x128xf32>
    %523 = arith.divf %521, %522 : vector<64x128xf32>
    %524 = math.roundeven %523 : vector<64x128xf32>
    %cst_495 = arith.constant 0.000000e+00 : f32
    %cst_496 = arith.constant 3.000000e+00 : f32
    %525 = vector.broadcast %cst_495 : f32 to vector<64x128xf32>
    %526 = arith.maximumf %525, %524 : vector<64x128xf32>
    %527 = vector.broadcast %cst_496 : f32 to vector<64x128xf32>
    %528 = arith.minimumf %527, %526 : vector<64x128xf32>
    %cst_497 = arith.constant 5.000000e-01 : f32
    %529 = vector.broadcast %cst_497 : f32 to vector<64x128xf32>
    %530 = arith.mulf %528, %529 : vector<64x128xf32>
    %531 = arith.truncf %530 : vector<64x128xf32> to vector<64x128xbf16>
    %c0_498 = arith.constant 0 : index
    %c0_499 = arith.constant 0 : index
    %c0_500 = arith.constant 0 : index
    %532 = vector.load %arg7[%c0_498, %c0_499, %c0_500] : memref<1x64x128xbf16, #tpu.memory_space<vmem>>, vector<1x64x128xbf16>
    %533 = vector.shape_cast %532 : vector<1x64x128xbf16> to vector<64x128xbf16>
    %534 = vector.shape_cast %531 : vector<64x128xbf16> to vector<1x64x128xbf16>
    tpu.vector_store %arg7[%c0_498, %c0_499, %c0_500], %534 {strides = array<i32>} : memref<1x64x128xbf16, #tpu.memory_space<vmem>>, vector<1x64x128xbf16>,
    return
  }
  func.func @transform_0(%arg0: i32) -> (i32, i32, i32) {
    %c0_i32 = arith.constant 0 : i32
    %c0_i32_0 = arith.constant 0 : i32
    %c0_i32_1 = arith.constant 0 : i32
    return %arg0, %c0_i32, %c0_i32_0 : i32, i32, i32
  }
  func.func @transform_1(%arg0: i32) -> (i32, i32, i32) {
    %c0_i32 = arith.constant 0 : i32
    %c0_i32_0 = arith.constant 0 : i32
    %c0_i32_1 = arith.constant 0 : i32
    return %arg0, %c0_i32, %c0_i32_0 : i32, i32, i32
  }
  func.func @transform_2(%arg0: i32) -> (i32, i32) {
    %c0_i32 = arith.constant 0 : i32
    %c0_i32_0 = arith.constant 0 : i32
    %c0_i32_1 = arith.constant 0 : i32
    return %c0_i32, %c0_i32_0 : i32, i32
  }
  func.func @transform_3(%arg0: i32) -> (i32, i32) {
    %c0_i32 = arith.constant 0 : i32
    %c0_i32_0 = arith.constant 0 : i32
    %c0_i32_1 = arith.constant 0 : i32
    return %c0_i32, %c0_i32_0 : i32, i32
  }
  func.func @transform_4(%arg0: i32) -> (i32, i32, i32, i32) {
    %c0_i32 = arith.constant 0 : i32
    %c0_i32_0 = arith.constant 0 : i32
    %c0_i32_1 = arith.constant 0 : i32
    %c0_i32_2 = arith.constant 0 : i32
    %c0_i32_3 = arith.constant 0 : i32
    return %c0_i32, %c0_i32_0, %c0_i32_1, %c0_i32_2 : i32, i32, i32, i32
  }
  func.func @transform_5(%arg0: i32) -> (i32, i32, i32) {
    %c0_i32 = arith.constant 0 : i32
    %c0_i32_0 = arith.constant 0 : i32
    %c0_i32_1 = arith.constant 0 : i32
    %c0_i32_2 = arith.constant 0 : i32
    return %c0_i32, %c0_i32_0, %c0_i32_1 : i32, i32, i32
  }
  func.func @transform_6(%arg0: i32) -> (i32, i32, i32) {
    %c0_i32 = arith.constant 0 : i32
    %c0_i32_0 = arith.constant 0 : i32
    %c0_i32_1 = arith.constant 0 : i32
    return %arg0, %c0_i32, %c0_i32_0 : i32, i32, i32
  }
}

</mosaic_0001>

<bundles_post_ra>
// kernel: group_explore0_forward.1
= control target key start
LH: loop header
LB: loop body
LE: loop exit
PB: predicated region body
PF: predicated region fallthrough
CT: control target
= control target key end

     0   :  { %s13308_s0 = inlined_call_operand.hbm [shape: bf16[2,64,128], index: 0, kind: input, shape index: {}]   ;;  %s13309_s1 = inlined_call_operand.hbm [shape: bf16[2,64,128], index: 1, kind: input, shape index: {}]   ;;  %s13310_s2 = inlined_call_operand.hbm [shape: bf16[128,128], index: 2, kind: input, shape index: {}]   ;;  %s13311_s3 = inlined_call_operand.hbm [shape: bf16[128,128], index: 3, kind: input, shape index: {}]   ;;  %s13312_s4 = inlined_call_operand.hbm [shape: bf16[5,9,128,128], index: 4, kind: input, shape index: {}]   ;;  %s13313_s5 = inlined_call_operand.hbm [shape: f32[7,2,128], index: 5, kind: input, shape index: {}]   ;;  %s13314_s6 = inlined_call_operand.hbm [shape: bf16[2,64,128], index: 6, kind: output, shape index: {}]  }
   0x1   :  { %13322 = sst [smem:[#allocation22_spill]] %s13308_s0 }
   0x2   :  { %13323 = sst [smem:[#allocation23_spill]] %s13310_s2 }
   0x3   :  { %13324 = sst [smem:[#allocation24_spill]] %s13311_s3 }
   0x4   :  { %11 = vsyncpa [#allocation5], 0 }
   0x5   :  { %13 = vsyncpa [#allocation5 + $0x1], 0 }
   0x6   :  { %14 = vsyncpa [#allocation8], 0 }
   0x7   :  { %16 = vsyncpa [#allocation8 + $0x1], 0 }
   0x8   :  { %17 = vsyncpa [#allocation11], 0 }
   0x9   :  { %18 = vsyncpa [#allocation14], 0 }
   0xa   :  { %19 = vsyncpa [#allocation6], 0 }
   0xb   :  { %21 = vsyncpa [#allocation6 + $0x1], 0  ;;  %s12038_s21 = smov 0   ;;  %s12040_s22 = smov 0  }
   0xc   :  { %s12042_s23 = smov 0   ;;  %s12044_s24 = smov 0  }
   0xd LB: > { %s12059_s25 = sadd.s32 4294967295, %s11987_s24   ;;  %s8520_s26 = sadd.s32 4294967294, %s11987_s24   ;;  %s11987_s24 = sphi %s12044_s24, %s13351_s24   ;;  %s11983_s23 = sphi %s12042_s23, %s13350_s23   ;;  %s11979_s22 = sphi %s12040_s22, %s13349_s22   ;;  %s11975_s21 = sphi %s12038_s21, %s13348_s21  }
   0xe   : > { %p47_p0 = scmp.ne.s32.totalorder %s11979_s22, %s11975_s21  ;;  %p13315_p1 = scmp.eq.s32.totalorder %s12059_s25, 0 }
   0xf   : > { %p187_p3 = scmp.eq.s32.totalorder %s8520_s26, 1  ;;  %p8521_p5 = scmp.ge.s32.totalorder %s11987_s24, 1 }
  0x10   : > { %p12068_p4 = por %p13315_p1, %p47_p0  ;;  %p194_p7 = scmp.lt.s32.totalorder %s11987_s24, 3 }
  0x11   : > { %p12073_p6 = por %p187_p3, %p47_p0  ;;  %s11989_s30 = smov [#allocation9]  }
  0x12   : > { %s13325_s27 = scalar_select %p12068_p4, 1, 0 }
  0x13   : > { %s13326_s28 = scalar_select %p12073_p6, 1, 0 }
  0x14   : > { %p12078_p8 = pnand %p8521_p5, %p194_p7  ;;  %s206_s7 = sshll.u32 %s11989_s30, 4  ;;  %s12082_s7 = int_to_ptr.vmem [resolvable:$true] %s206_s7 }
  0x15   : > { %s11990_s9 = smov [#allocation10]   ;;  %s11991_s11 = smov [#allocation12]  }
  0x16   : > { %s13327_s29 = scalar_select %p12078_p8, 1, 0 }
  0x17   : > { %p11268_p9 = pneg %p12078_p8  ;;  %s219_s10 = sshll.u32 %s11990_s9, 4  ;;  %s12093_s10 = int_to_ptr.vmem [resolvable:$true] %s219_s10 }
  0x18   : > { %s12095_s12 = sshll.u32 %s11991_s11, 4  ;;  %s13329_s2 = sld [smem:[#allocation23_spill]]  ;;  %s233_s12 = int_to_ptr.vmem [resolvable:$true] %s12095_s12 }
  0x19   : > { %p12089_p11 = pnand %p11268_p9, %p13315_p1 }
  0x1b   : > { %p12105_p13 = pneg %p12089_p11 }
  0x1e   : > { %s11733_s15 = scalar_lea.hbm %s13329_s2, 1024 }
  0x1f   : > { %p11734_p12 = scmp.ne.s32.totalorder %s13329_s2, %s11733_s15  ;;  %p11740_p5 = scmp.lt.u32.totalorder %s11733_s15, %s13329_s2 }
  0x21   : > { %p11736_p0 = pnand %p12105_p13, %p11734_p12 }
  0x23   : > { %p11737_p3 = pneg %p11736_p0 }
  0x25   : > { %p11742_p7 = pnand %p11740_p5, %p11737_p3 }
  0x27   : > { %11745 = shalt.err (!%p11742_p7)
}
  0x28   : > { %s11746_s26 = scalar_lea.vmem %s12082_s7, 1024  ;;  %p11754_p2 = scmp.lt.s32.totalorder %s12082_s7, %s12082_s7 }
  0x29   : > { %p11747_p9 = scmp.ne.s32.totalorder %s12082_s7, %s11746_s26  ;;  %p11755_p6 = scmp.lt.s32.totalorder %s11746_s26, %s11746_s26 }
  0x2b   : > { %p11749_p10 = pnand %p11747_p9, %p12105_p13  ;;  %p11756_p12 = por %p11755_p6, %p11754_p2 }
  0x2d   : > { %p11750_p1 = pneg %p11749_p10 }
  0x2f   : > { %p11757_p0 = pnand %p11756_p12, %p11750_p1 }
  0x31   : > { %11760 = shalt.err (!%p11757_p0)
}
  0x32   : > { %s13318_s30 = smov 64   ;;  %s13320_s9 = smov 4  }
  0x33   : > { %11271 = dma.hbm_to_vmem [thread:$0]  (!%p12089_p11), %s13329_s2, 1024, %s12082_s7, [#allocation8], %s13318_s30, %s13318_s30, %s13320_s9  }
  0x34   : > { %s13331_s3 = sld [smem:[#allocation24_spill]] }
  0x3a   : > { %s11761_s16 = scalar_lea.hbm %s13331_s3, 1024 }
  0x3b   : > { %p11762_p1 = scmp.ne.s32.totalorder %s13331_s3, %s11761_s16  ;;  %p11768_p10 = scmp.lt.u32.totalorder %s11761_s16, %s13331_s3 }
  0x3d   : > { %p11764_p2 = pnand %p11762_p1, %p12105_p13 }
  0x3f   : > { %p11765_p6 = pneg %p11764_p2 }
  0x41   : > { %p11770_p3 = pnand %p11768_p10, %p11765_p6 }
  0x43   : > { %11773 = shalt.err (!%p11770_p3)
}
  0x44   : > { %s11774_s7 = scalar_lea.vmem %s12093_s10, 1024  ;;  %p11782_p12 = scmp.lt.s32.totalorder %s12093_s10, %s12093_s10 }
  0x45   : > { %p11775_p5 = scmp.ne.s32.totalorder %s12093_s10, %s11774_s7  ;;  %p11783_p0 = scmp.lt.s32.totalorder %s11774_s7, %s11774_s7 }
  0x47   : > { %p11777_p7 = pnand %p11775_p5, %p12105_p13  ;;  %p11784_p1 = por %p11783_p0, %p11782_p12 }
  0x49   : > { %p11778_p9 = pneg %p11777_p7 }
  0x4b   : > { %p11785_p2 = pnand %p11784_p1, %p11778_p9 }
  0x4d   : > { %11788 = shalt.err (!%p11785_p2)
}
  0x4e   : > { %11274 = dma.hbm_to_vmem [thread:$0]  (!%p12089_p11), %s13331_s3, 1024, %s12093_s10, [#allocation11], %s13318_s30, %s13318_s30, %s13320_s9  }
  0x4f   : > { %s11789_s16 = scalar_lea.hbm %s13312_s4, 46080 }
  0x50   : > { %p11790_p6 = scmp.ne.s32.totalorder %s13312_s4, %s11789_s16  ;;  %p11796_p5 = scmp.lt.u32.totalorder %s11789_s16, %s13312_s4 }
  0x52   : > { %p11792_p10 = pnand %p11790_p6, %p12105_p13 }
  0x54   : > { %p11793_p3 = pneg %p11792_p10 }
  0x56   : > { %p11798_p7 = pnand %p11796_p5, %p11793_p3 }
  0x58   : > { %11801 = shalt.err (!%p11798_p7)
}
  0x59   : > { %s11802_s7 = scalar_lea.vmem %s233_s12, 46080  ;;  %p11810_p1 = scmp.lt.s32.totalorder %s233_s12, %s233_s12 }
  0x5a   : > { %p11803_p9 = scmp.ne.s32.totalorder %s233_s12, %s11802_s7  ;;  %p11811_p2 = scmp.lt.s32.totalorder %s11802_s7, %s11802_s7 }
  0x5c   : > { %p11805_p12 = pnand %p11803_p9, %p12105_p13  ;;  %p11812_p4 = por %p11811_p2, %p11810_p1 }
  0x5e   : > { %p11806_p0 = pneg %p11805_p12 }
  0x60   : > { %p11813_p8 = pnand %p11812_p4, %p11806_p0 }
  0x62   : > { %11816 = shalt.err (!%p11813_p8)
}
  0x63   : > { %11277 = dma.hbm_to_vmem [thread:$0]  (!%p12089_p11), %s13312_s4, 46080, %s233_s12, [#allocation11], %s13318_s30, %s13318_s30, %s13320_s9  }
  0x64   : > { %s11994_s13 = smov [#allocation13]   ;;  %s11817_s17 = scalar_lea.hbm %s13313_s5, 224 }
  0x65   : > { %s245_s14 = sshll.u32 %s11994_s13, 4  ;;  %p11818_p4 = scmp.ne.s32.totalorder %s13313_s5, %s11817_s17  ;;  %s246_s14 = int_to_ptr.vmem [resolvable:$true] %s245_s14 }
  0x66   : > { %p11824_p10 = scmp.lt.u32.totalorder %s11817_s17, %s13313_s5 }
  0x67   : > { %p11820_p8 = pnand %p11818_p4, %p12105_p13 }
  0x69   : > { %p11821_p6 = pneg %p11820_p8 }
  0x6b   : > { %p11826_p3 = pnand %p11824_p10, %p11821_p6 }
  0x6d   : > { %11829 = shalt.err (!%p11826_p3)
}
  0x6e   : > { %s11830_s12 = scalar_lea.vmem %s246_s14, 224  ;;  %p11838_p12 = scmp.lt.s32.totalorder %s246_s14, %s246_s14 }
  0x6f   : > { %p11831_p5 = scmp.ne.s32.totalorder %s246_s14, %s11830_s12  ;;  %p11839_p0 = scmp.lt.s32.totalorder %s11830_s12, %s11830_s12 }
  0x71   : > { %p11833_p7 = pnand %p11831_p5, %p12105_p13  ;;  %p11840_p1 = por %p11839_p0, %p11838_p12 }
  0x73   : > { %p11834_p9 = pneg %p11833_p7 }
  0x75   : > { %p11841_p2 = pnand %p11840_p1, %p11834_p9 }
  0x77   : > { %11844 = shalt.err (!%p11841_p2)
}
  0x78   : > { %s11995_s10 = smov 32   ;;  %s11996_s18 = smov 2  }
  0x79   : > { %11280 = dma.hbm_to_vmem [thread:$0]  (!%p12089_p11), %s13313_s5, 224, %s246_s14, [#allocation14], %s11995_s10, %s11995_s10, %s11996_s18  }
  0x7a   : > { %s12196_s15 = sadd.s32 1, %s11987_s24   ;;  %s34_s17 = sadd.s32 1, %s11983_s23 }
  0x7b   : > { %s31_s16 = ssub.s32 %s11987_s24, %s12196_s15  ;;  %p41_p4 = scmp.ne.s32.totalorder %s11983_s23, %s11979_s22 }
  0x7c   : > { %p32_p13 = scmp.eq.s32.totalorder %s31_s16, 0  ;;  %p42_p8 = scmp.eq.s32.totalorder %s11987_s24, 0 }
  0x7d   : > { %p13332_p10 = scmp.eq.s32.totalorder %s12059_s25, 1  ;;  %p11296_p5 = scmp.lt.s32.totalorder %s11987_s24, 2 }
  0x7e   : > { %s12205_s19 = scalar_select %p32_p13, %s11983_s23, %s34_s17  }
  0x7f   : > { %p43_p6 = por %p42_p8, %p41_p4  ;;  %p12209_p3 = por %p13332_p10, %p41_p4 }
  0x80   : > { %s259_s8 = sand.u32 1, %s11983_s23   ;;  %s9000_s14 = sshll.u32 %s11987_s24, 9 }
  0x81   : > { %s8527_s26 = sshll.u32 %s259_s8, 5  ;;  %s13334_s0 = sld [smem:[#allocation22_spill]] }
  0x82   : > { %s263_s18 = scalar_lea.vmem [#allocation4], %s8527_s26  ;;  %p12223_p11 = pnand %p11296_p5, %p43_p6 }
  0x83   : > { %s270_s11 = sshll.u32 %s263_s18, 4  ;;  %s12230_s7 = scalar_lea.hbm %s13309_s1, %s9000_s14  ;;  %s12221_s11 = int_to_ptr.vmem [resolvable:$true] %s270_s11 }
  0x84   : > { %s284_s12 = scalar_lea.vmem [#allocation7], %s8527_s26  ;;  %s12234_s9 = scalar_lea.sflag [#allocation5], %s259_s8 }
  0x85   : > { %s12232_s30 = sshll.u32 %s284_s12, 4  ;;  %p11847_p9 = pneg %p12223_p11  ;;  %s12266_s30 = int_to_ptr.vmem [resolvable:$true] %s12232_s30 }
  0x87   : > { %s12219_s10 = scalar_lea.hbm %s13334_s0, %s9000_s14  ;;  %s11850_s16 = scalar_lea.hbm %s13334_s0, 1024 }
  0x88   : > { %s11845_s18 = scalar_lea.hbm %s12219_s10, 512  ;;  %p11851_p1 = scmp.lt.u32.totalorder %s12219_s10, %s13334_s0 }
  0x89   : > { %p11846_p7 = scmp.ne.s32.totalorder %s12219_s10, %s11845_s18  ;;  %p11852_p2 = scmp.lt.u32.totalorder %s11850_s16, %s11845_s18 }
  0x8a   : > { %p11854_p4 = scmp.lt.u32.totalorder %s11845_s18, %s12219_s10 }
  0x8b   : > { %p11848_p12 = pnand %p11847_p9, %p11846_p7  ;;  %p11853_p13 = por %p11852_p2, %p11851_p1 }
  0x8d   : > { %p11849_p0 = pneg %p11848_p12  ;;  %p11855_p8 = por %p11854_p4, %p11853_p13 }
  0x8f   : > { %p11856_p6 = pnand %p11855_p8, %p11849_p0 }
  0x91   : > { %11859 = shalt.err (!%p11856_p6)
}
  0x92   : > { %s11860_s8 = scalar_lea.vmem %s12221_s11, 512  ;;  %s11997_s2 = smov [#allocation4]  }
  0x93   : > { %p11861_p10 = scmp.ne.s32.totalorder %s12221_s11, %s11860_s8  ;;  %s11865_s3 = sshll.u32 %s11997_s2, 4  ;;  %s11866_s3 = int_to_ptr.vmem [resolvable:$false] %s11865_s3 }
  0x94   : > { %s11867_s26 = scalar_lea.vmem %s11866_s3, 1024  ;;  %p11868_p12 = scmp.lt.s32.totalorder %s12221_s11, %s11866_s3 }
  0x95   : > { %p11863_p5 = pnand %p11861_p10, %p11847_p9  ;;  %p11869_p1 = scmp.lt.s32.totalorder %s11867_s26, %s11860_s8 }
  0x97   : > { %p11864_p7 = pneg %p11863_p5  ;;  %p11870_p2 = por %p11869_p1, %p11868_p12 }
  0x99   : > { %p11871_p13 = pnand %p11870_p2, %p11864_p7 }
  0x9b   : > { %11874 = shalt.err (!%p11871_p13)
}
  0x9c   : > { %s13336_s12 = smov 4   ;;  %s13337_s18 = smov 64  }
  0x9d   : > { %11284 = dma.hbm_to_vmem [thread:$0]  (!%p12223_p11), %s12219_s10, 512, %s12221_s11, %s12234_s9, %s13337_s18, %s13337_s18, %s13336_s12  }
  0x9e   : > { %s280_s16 = sand.u32 1, %s11987_s24   ;;  %s11875_s14 = scalar_lea.hbm %s12230_s7, 512 }
  0x9f   : > { %s12269_s17 = scalar_lea.sflag [#allocation8], %s280_s16  ;;  %p11876_p0 = scmp.ne.s32.totalorder %s12230_s7, %s11875_s14 }
  0xa0   : > { %s11880_s3 = scalar_lea.hbm %s13309_s1, 1024  ;;  %p11881_p6 = scmp.lt.u32.totalorder %s12230_s7, %s13309_s1 }
  0xa1   : > { %p11878_p4 = pnand %p11876_p0, %p11847_p9  ;;  %p11882_p10 = scmp.lt.u32.totalorder %s11880_s3, %s11875_s14 }
  0xa2   : > { %p11884_p7 = scmp.lt.u32.totalorder %s11875_s14, %s12230_s7 }
  0xa3   : > { %p11879_p8 = pneg %p11878_p4  ;;  %p11883_p5 = por %p11882_p10, %p11881_p6 }
  0xa5   : > { %p11885_p12 = por %p11884_p7, %p11883_p5 }
  0xa7   : > { %p11886_p1 = pnand %p11885_p12, %p11879_p8 }
  0xa9   : > { %11889 = shalt.err (!%p11886_p1)
}
  0xaa   : > { %s11890_s9 = scalar_lea.vmem %s12266_s30, 512  ;;  %s11998_s10 = smov [#allocation7]  }
  0xab   : > { %p11891_p2 = scmp.ne.s32.totalorder %s12266_s30, %s11890_s9  ;;  %s11895_s11 = sshll.u32 %s11998_s10, 4  ;;  %s11896_s11 = int_to_ptr.vmem [resolvable:$false] %s11895_s11 }
  0xac   : > { %s11897_s0 = scalar_lea.vmem %s11896_s11, 1024  ;;  %p11898_p4 = scmp.lt.s32.totalorder %s12266_s30, %s11896_s11 }
  0xad   : > { %p11893_p13 = pnand %p11891_p2, %p11847_p9  ;;  %p11899_p6 = scmp.lt.s32.totalorder %s11897_s0, %s11890_s9 }
  0xaf   : > { %p11894_p0 = pneg %p11893_p13  ;;  %p11900_p10 = por %p11899_p6, %p11898_p4 }
  0xb1   : > { %p11901_p5 = pnand %p11900_p10, %p11894_p0 }
  0xb3   : > { %11904 = shalt.err (!%p11901_p5)
}
  0xb4   : > { %11287 = dma.hbm_to_vmem [thread:$0]  (!%p12223_p11), %s12230_s7, 512, %s12266_s30, %s12269_s17, %s13337_s18, %s13337_s18, %s13336_s12  }
  0xb5   : > { %p13338_p9 = scmp.ne.s32.totalorder %s13327_s29, 0 }
  0xb6   : > { %s12301_s16 = sand.u32 (!%p13338_p9), 1, %s11979_s22   ;;  %p13339_p8 = scmp.ne.s32.totalorder (!%p13338_p9), %s13325_s27, 0 }
  0xb7   : > { %303 = sbr.rel (%p13338_p9) target bundleno = 2938 (0xb7a), region = 44  ;;  %s12304_s14 = sshll.u32 (!%p13338_p9), %s12301_s16, 5 }
  0xb8   : > { %s306_s13 = scalar_lea.sflag (!%p13338_p9), [#allocation5], %s12301_s16  ;;  %s12308_s8 = scalar_lea.vmem (!%p13338_p9), [#allocation4], %s12304_s14 }
  0xbe   : > { %11950 = dma.done.wait (%p13339_p8), %s306_s13, 512  }
  0xbf   : > { %11952 = vsyncadd (%p13339_p8), %s306_s13, 4294966784  ;;  %s314_s29 = sand.u32 1, %s12059_s25   ;;  %s12316_s7 = scalar_lea.vmem [#allocation7], %s12304_s14 }
  0xc0   : > { %s315_s30 = scalar_lea.sflag [#allocation8], %s314_s29 }
  0xc1   : > { %11954 = dma.done.wait (%p13339_p8), %s315_s30, 512  }
  0xc2   : > { %11956 = vsyncadd (%p13339_p8), %s315_s30, 4294966784  ;;  %p13340_p11 = scmp.eq.s32.totalorder %s12059_s25, 0 }
  0xc4   : > { %11958 = dma.done.wait (%p13340_p11), [#allocation8], 1024   ;;  %p13341_p7 = pmov %p13340_p11 }
  0xc6   : > { %11960 = vsyncadd (%p13341_p7), [#allocation8], 4294966272  ;;  %p13342_p12 = pmov %p13341_p7 }
  0xc7   : > { %p13343_p1 = pmov %p13341_p7 }
  0xc8   : > { %11962 = dma.done.wait (%p13342_p12), [#allocation11], 47104  }
  0xc9   : > { %11964 = vsyncadd (%p13343_p1), [#allocation11], 4294920192  ;;  %p13344_p2 = pmov %p13343_p1 }
  0xca   : > { %p13345_p13 = pmov %p13343_p1 }
  0xcb   : > { %11966 = dma.done.wait (%p13344_p2), [#allocation14], 224  }
  0xcc   : > { %11968 = vsyncadd (%p13345_p13), [#allocation14], 4294967072  ;;  %v12334_v0 = vld [vmem:[#allocation9] sm:$0xff]   ;;  %v12336_v1 = vld [vmem:[#allocation9 + $0x8] sm:$0xff]   ;;  %v11999_v3 = vmov 0.0   ;;  %s13251_s27 = scalar_lea.vmem [#allocation15], %s12304_s14 }
  0xcd   : > { %9622 = vmatprep.subr.bf16.mxu1 %v12334_v0  ;;  %v12341_v2 = vld [vmem:[#allocation9 + $0x10] sm:$0xff]   ;;  %375 = vst [vmem:[#allocation2 + $0x30] sm:$0xff] %v11999_v3  ;;  %376 = vst [vmem:[#allocation2 + $0x38] sm:$0x3] %v11999_v3  ;;  %v11348_v4 = vld [vmem:[#allocation9 + $0x18] sm:$0xff]   ;;  %s9010_s12 = sshll.u32 %s12059_s25, 9 }
  0xce   : > { %9623 = vmatpush3.bf16.msra.mxu1 %v12334_v0  ;;  %369 = vst [vmem:[#allocation2] sm:$0xff] %v11999_v3  ;;  %370 = vst [vmem:[#allocation2 + $0x8] sm:$0x3] %v11999_v3  ;;  %v11353_v5 = vld [vmem:[%s12316_s7] sm:$0xff]   ;;  %v11350_v7 = vld [vmem:[#allocation9 + $0x28] sm:$0xff]   ;;  %s8386_s18 = sshll.u32 %s13251_s27, 4  ;;  %s13260_s3 = scalar_lea.hbm %s13314_s6, %s9010_s12  ;;  %s13262_s18 = int_to_ptr.vmem [resolvable:$true] %s8386_s18 }
  0xcf   : > { %9624 = vmatprep.subr.bf16.mxu1 %v12336_v1  ;;  %371 = vst [vmem:[#allocation2 + $0x10] sm:$0xff] %v11999_v3  ;;  %372 = vst [vmem:[#allocation2 + $0x18] sm:$0x3] %v11999_v3  ;;  %9638 = vmatprep.mubr.bf16.mxu1 %v11353_v5  ;;  %v11349_v6 = vld [vmem:[#allocation9 + $0x20] sm:$0xff]   ;;  %v11351_v8 = vld [vmem:[#allocation9 + $0x30] sm:$0xff]   ;;  %s8373_s25 = scalar_lea.sflag [#allocation6], %s12301_s16 }
  0xd0   : > { %373 = vst [vmem:[#allocation2 + $0x20] sm:$0xff] %v11999_v3  ;;  %374 = vst [vmem:[#allocation2 + $0x28] sm:$0x3] %v11999_v3  ;;  %v11352_v9 = vld [vmem:[#allocation9 + $0x38] sm:$0xff]   ;;  %v11370_v10 = vld [vmem:[#allocation12 + $0x80] sm:$0xff]   ;;  %s11905_s26 = scalar_lea.vmem %s13262_s18, 512 }
  0xd1   : > { %377 = vst [vmem:[#allocation2 + $0x40] sm:$0xff] %v11999_v3  ;;  %378 = vst [vmem:[#allocation2 + $0x48] sm:$0x3] %v11999_v3  ;;  %9766 = vmatprep.subr.bf16.mxu0 %v11370_v10  ;;  %v11354_v11 = vld [vmem:[%s12316_s7 + $0x8] sm:$0xff]   ;;  %v11355_v12 = vld [vmem:[%s12316_s7 + $0x10] sm:$0xff]   ;;  %p11906_p0 = scmp.ne.s32.totalorder %s13262_s18, %s11905_s26  ;;  %s12000_s9 = smov [#allocation15]  }
  0xd2   : > { %379 = vst [vmem:[#allocation2 + $0x50] sm:$0xff] %v11999_v3  ;;  %380 = vst [vmem:[#allocation2 + $0x58] sm:$0x3] %v11999_v3  ;;  %9625 = vmatpush3.bf16.msra.mxu1 %v12336_v1  ;;  %9767 = vmatpush3.bf16.msra.mxu0 %v11370_v10  ;;  %v11356_v13 = vld [vmem:[%s12316_s7 + $0x18] sm:$0xff]   ;;  %v11357_v14 = vld [vmem:[%s12308_s8] sm:$0xff]   ;;  %s11909_s10 = sshll.u32 %s12000_s9, 4  ;;  %s11910_s10 = int_to_ptr.vmem [resolvable:$false] %s11909_s10 }
  0xd3   : > { %381 = vst [vmem:[#allocation2 + $0x60] sm:$0xff] %v11999_v3  ;;  %382 = vst [vmem:[#allocation2 + $0x68] sm:$0x3] %v11999_v3  ;;  %9626 = vmatprep.subr.bf16.mxu1 %v12341_v2  ;;  %v11361_v15 = vld [vmem:[#allocation10] sm:$0xff]   ;;  %v11358_v16 = vld [vmem:[%s12308_s8 + $0x8] sm:$0xff]   ;;  %p11907_p4 = pnand %p11906_p0, %p12209_p3  ;;  %s11911_s11 = scalar_lea.vmem %s11910_s10, 1024 }
  0xd4   : > { %383 = vst [vmem:[#allocation2 + $0x70] sm:$0xff] %v11999_v3  ;;  %384 = vst [vmem:[#allocation2 + $0x78] sm:$0x3] %v11999_v3  ;;  %v11359_v17 = vld [vmem:[%s12308_s8 + $0x10] sm:$0xff]   ;;  %v11362_v18 = vld [vmem:[#allocation10 + $0x8] sm:$0xff]   ;;  %p11912_p10 = scmp.lt.s32.totalorder %s13262_s18, %s11910_s10  ;;  %p11913_p5 = scmp.lt.s32.totalorder %s11911_s11, %s11905_s26 }
  0xd5   : > { %385 = vst [vmem:[#allocation2 + $0x80] sm:$0xff] %v11999_v3  ;;  %386 = vst [vmem:[#allocation2 + $0x88] sm:$0x3] %v11999_v3  ;;  %v11363_v19 = vld [vmem:[#allocation10 + $0x10] sm:$0xff]   ;;  %v11360_v20 = vld [vmem:[%s12308_s8 + $0x18] sm:$0xff]   ;;  %p11908_p6 = pneg %p11907_p4 }
  0xd6   : > { %387 = vst [vmem:[#allocation2 + $0x90] sm:$0xff] %v11999_v3  ;;  %388 = vst [vmem:[#allocation2 + $0x98] sm:$0x3] %v11999_v3  ;;  %9627 = vmatpush3.bf16.msra.mxu1 %v12341_v2  ;;  %v11364_v21 = vld [vmem:[#allocation10 + $0x18] sm:$0xff]   ;;  %v11365_v22 = vld [vmem:[#allocation10 + $0x20] sm:$0xff]   ;;  %p11914_p9 = por %p11913_p5, %p11912_p10 }
  0xd7   : > { %389 = vst [vmem:[#allocation3] sm:$0xff] %v11999_v3  ;;  %390 = vst [vmem:[#allocation3 + $0x8] sm:$0x3] %v11999_v3  ;;  %9628 = vmatprep.subr.bf16.mxu1 %v11348_v4  ;;  %v11366_v23 = vld [vmem:[#allocation10 + $0x28] sm:$0xff]   ;;  %v11367_v24 = vld [vmem:[#allocation10 + $0x30] sm:$0xff]  }
  0xd8   : > { %391 = vst [vmem:[#allocation3 + $0x10] sm:$0xff] %v11999_v3  ;;  %392 = vst [vmem:[#allocation3 + $0x18] sm:$0x3] %v11999_v3  ;;  %v11368_v25 = vld [vmem:[#allocation10 + $0x38] sm:$0xff]   ;;  %v11369_v26 = vld [vmem:[#allocation12 + $0x40] sm:$0xff]   ;;  %p11915_p8 = pnand %p11914_p9, %p11908_p6 }
  0xd9   : > { %393 = vst [vmem:[#allocation3 + $0x20] sm:$0xff] %v11999_v3  ;;  %394 = vst [vmem:[#allocation3 + $0x28] sm:$0x3] %v11999_v3  ;;  %v11371_v27 = vld [vmem:[#allocation12 + $0x48] sm:$0xff]   ;;  %v11373_v28 = vld [vmem:[#allocation12 + $0x50] sm:$0xff]  }
  0xda   : > { %395 = vst [vmem:[#allocation3 + $0x30] sm:$0xff] %v11999_v3  ;;  %396 = vst [vmem:[#allocation3 + $0x38] sm:$0x3] %v11999_v3  ;;  %9629 = vmatpush3.bf16.msra.mxu1 %v11348_v4  ;;  %v11372_v29 = vld [vmem:[#allocation12 + $0x88] sm:$0xff]   ;;  %v11375_v30 = vld [vmem:[#allocation12 + $0x58] sm:$0xff]  }
  0xdb   : > { %397 = vst [vmem:[#allocation3 + $0x40] sm:$0xff] %v11999_v3  ;;  %398 = vst [vmem:[#allocation3 + $0x48] sm:$0x3] %v11999_v3  ;;  %9630 = vmatprep.subr.bf16.mxu1 %v11349_v6  ;;  %9768 = vmatprep.subr.bf16.mxu0 %v11372_v29  ;;  %v11374_v31 = vld [vmem:[#allocation12 + $0x90] sm:$0xff]   ;;  %v11377_v32 = vld [vmem:[#allocation12 + $0x60] sm:$0xff]  }
  0xdc   : > { %399 = vst [vmem:[#allocation3 + $0x50] sm:$0xff] %v11999_v3  ;;  %400 = vst [vmem:[#allocation3 + $0x58] sm:$0x3] %v11999_v3  ;;  %9769 = vmatpush3.bf16.msra.mxu0 %v11372_v29  ;;  %v11376_v33 = vld [vmem:[#allocation12 + $0x98] sm:$0xff]   ;;  %v11379_v34 = vld [vmem:[#allocation12 + $0x68] sm:$0xff]  }
  0xdd   : > { %401 = vst [vmem:[#allocation3 + $0x60] sm:$0xff] %v11999_v3  ;;  %402 = vst [vmem:[#allocation3 + $0x68] sm:$0x3] %v11999_v3  ;;  %9770 = vmatprep.subr.bf16.mxu0 %v11374_v31  ;;  %v11378_v35 = vld [vmem:[#allocation12 + $0xa0] sm:$0xff]   ;;  %v11381_v36 = vld [vmem:[#allocation12 + $0x70] sm:$0xff]  }
  0xde   : > { %403 = vst [vmem:[#allocation3 + $0x70] sm:$0xff] %v11999_v3  ;;  %404 = vst [vmem:[#allocation3 + $0x78] sm:$0x3] %v11999_v3  ;;  %9631 = vmatpush3.bf16.msra.mxu1 %v11349_v6  ;;  %v11380_v37 = vld [vmem:[#allocation12 + $0xa8] sm:$0xff]   ;;  %v11383_v38 = vld [vmem:[#allocation12 + $0x78] sm:$0xff]  }
  0xdf   : > { %405 = vst [vmem:[#allocation3 + $0x80] sm:$0xff] %v11999_v3  ;;  %406 = vst [vmem:[#allocation3 + $0x88] sm:$0x3] %v11999_v3  ;;  %9632 = vmatprep.subr.bf16.mxu1 %v11350_v7  ;;  %v11382_v39 = vld [vmem:[#allocation12 + $0xb0] sm:$0xff]   ;;  %v12360_v40 = vld [vmem:[#allocation12] sm:$0xff]  }
  0xe0   : > { %407 = vst [vmem:[#allocation3 + $0x90] sm:$0xff] %v11999_v3  ;;  %408 = vst [vmem:[#allocation3 + $0x98] sm:$0x3] %v11999_v3  ;;  %9771 = vmatpush3.bf16.msra.mxu0 %v11374_v31  ;;  %v11384_v41 = vld [vmem:[#allocation12 + $0xb8] sm:$0xff]   ;;  %v12363_v42 = vld [vmem:[#allocation12 + $0xc0] sm:$0xff]  }
  0xe1   : > { %9772 = vmatprep.subr.bf16.mxu0 %v11376_v33  ;;  %v8557_v43 = vld [vmem:[#allocation13] ss:$0 sm:$0xff]  ;;  %v8558_v44 = vld [vmem:[#allocation13 + $0x1] ss:$0 sm:$0xff] }
  0xe2   : > { %9633 = vmatpush3.bf16.msra.mxu1 %v11350_v7  ;;  %v1000_v29 = vld [vmem:[#allocation2 + $0x1] sm:$0xff] }
  0xe3   : > { %9634 = vmatprep.subr.bf16.mxu1 %v11351_v8 }
  0xe4   : > { %9773 = vmatpush3.bf16.msra.mxu0 %v11376_v33 }
  0xe5   : > { %9774 = vmatprep.subr.bf16.mxu0 %v11378_v35 }
  0xe6   : > { %9635 = vmatpush3.bf16.msra.mxu1 %v11351_v8 }
  0xe7   : > { %9636 = vmatprep.subr.bf16.mxu1 %v11352_v9 }
  0xe8   : > { %9775 = vmatpush3.bf16.msra.mxu0 %v11378_v35 }
  0xe9   : > { %9776 = vmatprep.subr.bf16.mxu0 %v11380_v37 }
  0xea   : > { %9637 = vmatpush3.bf16.msra.mxu1 %v11352_v9 }
  0xeb   : > { %9646 = vmatprep.subr.bf16.mxu1 %v12334_v0 }
  0xec   : > { %9777 = vmatpush3.bf16.msra.mxu0 %v11380_v37 }
  0xed   : > { %9639 = vmatmul.mubr.bf16.vlgmr.msra.gmra.mrb[0].mxu1 %v11354_v11  ;;  %9778 = vmatprep.subr.bf16.mxu0 %v11382_v39 }
  0xee   : > { %9647 = vmatpush3.bf16.msra.mxu1 %v12334_v0  ;;  %9642 = vmatprep.mubr.bf16.mxu1 %v11355_v12 }
  0xef   : > { %9648 = vmatprep.subr.bf16.mxu1 %v12336_v1 }
  0xf0   : > { %9779 = vmatpush3.bf16.msra.mxu0 %v11382_v39 }
  0xf1   : > { %9780 = vmatprep.subr.bf16.mxu0 %v11384_v41 }
  0xf2   : > { %9649 = vmatpush3.bf16.msra.mxu1 %v12336_v1 }
  0xf3   : > { %9650 = vmatprep.subr.bf16.mxu1 %v12341_v2 }
  0xf4   : > { %9781 = vmatpush3.bf16.msra.mxu0 %v11384_v41 }
  0xf5   : > { %9643 = vmatmul.mubr.bf16.gmra.mrb[4].mxu1 %v11356_v13  ;;  %9790 = vmatprep.subr.bf16.mxu0 %v12363_v42 }
  0xf6   : > { %9651 = vmatpush3.bf16.msra.mxu1 %v12341_v2  ;;  %9662 = vmatprep.mubr.bf16.mxu1 %v11357_v14 }
  0xf7   : > { %9652 = vmatprep.subr.bf16.mxu1 %v11348_v4 }
  0xfa   : > { %9653 = vmatpush3.bf16.msra.mxu1 %v11348_v4 }
  0xfb   : > { %9654 = vmatprep.subr.bf16.mxu1 %v11349_v6 }
  0xfe   : > { %9655 = vmatpush3.bf16.msra.mxu1 %v11349_v6 }
  0xff   : > { %9656 = vmatprep.subr.bf16.mxu1 %v11350_v7 }
 0x102   : > { %9657 = vmatpush3.bf16.msra.mxu1 %v11350_v7 }
 0x103   : > { %9658 = vmatprep.subr.bf16.mxu1 %v11351_v8 }
 0x106   : > { %9659 = vmatpush3.bf16.msra.mxu1 %v11351_v8 }
 0x107   : > { %9660 = vmatprep.subr.bf16.mxu1 %v11352_v9 }
 0x10a   : > { %9661 = vmatpush3.bf16.msra.mxu1 %v11352_v9 }
 0x10b   : > { %9670 = vmatprep.subr.bf16.mxu1 %v11361_v15 }
 0x10d   : > { %9663 = vmatmul.mubr.bf16.vlgmr.msra.gmra.mrb[0].mxu1 %v11358_v16 }
 0x10e   : > { %9666 = vmatprep.mubr.bf16.mxu1 %v11359_v17  ;;  %9671 = vmatpush3.bf16.msra.mxu1 %v11361_v15 }
 0x10f   : > { %9672 = vmatprep.subr.bf16.mxu1 %v11362_v18 }
 0x112   : > { %9673 = vmatpush3.bf16.msra.mxu1 %v11362_v18 }
 0x113   : > { %9674 = vmatprep.subr.bf16.mxu1 %v11363_v19 }
 0x115   : > { %9667 = vmatmul.mubr.bf16.gmra.mrb[4].mxu1 %v11360_v20 }
 0x116   : > { %9675 = vmatpush3.bf16.msra.mxu1 %v11363_v19  ;;  %9686 = vmatprep.mubr.bf16.mxu1 %v11353_v5 }
 0x117   : > { %9676 = vmatprep.subr.bf16.mxu1 %v11364_v21 }
 0x11a   : > { %9677 = vmatpush3.bf16.msra.mxu1 %v11364_v21 }
 0x11b   : > { %9678 = vmatprep.subr.bf16.mxu1 %v11365_v22 }
 0x11e   : > { %9679 = vmatpush3.bf16.msra.mxu1 %v11365_v22 }
 0x11f   : > { %9680 = vmatprep.subr.bf16.mxu1 %v11366_v23 }
 0x122   : > { %9681 = vmatpush3.bf16.msra.mxu1 %v11366_v23 }
 0x123   : > { %9682 = vmatprep.subr.bf16.mxu1 %v11367_v24 }
 0x126   : > { %9683 = vmatpush3.bf16.msra.mxu1 %v11367_v24 }
 0x127   : > { %9684 = vmatprep.subr.bf16.mxu1 %v11368_v25 }
 0x12a   : > { %9685 = vmatpush3.bf16.msra.mxu1 %v11368_v25 }
 0x12b   : > { %9694 = vmatprep.subr.bf16.mxu1 %v11361_v15 }
 0x12d   : > { %9687 = vmatmul.mubr.bf16.vlgmr.msra.gmra.mrb[8].mxu1 %v11354_v11 }
 0x12e   : > { %9695 = vmatpush3.bf16.msra.mxu1 %v11361_v15  ;;  %9690 = vmatprep.mubr.bf16.mxu1 %v11355_v12 }
 0x12f   : > { %9696 = vmatprep.subr.bf16.mxu1 %v11362_v18 }
 0x132   : > { %9697 = vmatpush3.bf16.msra.mxu1 %v11362_v18 }
 0x133   : > { %9698 = vmatprep.subr.bf16.mxu1 %v11363_v19 }
 0x135   : > { %9691 = vmatmul.mubr.bf16.gmra.mrb[12].mxu1 %v11356_v13 }
 0x136   : > { %9699 = vmatpush3.bf16.msra.mxu1 %v11363_v19  ;;  %9710 = vmatprep.mubr.bf16.mxu1 %v11357_v14 }
 0x137   : > { %9700 = vmatprep.subr.bf16.mxu1 %v11364_v21 }
 0x13a   : > { %9701 = vmatpush3.bf16.msra.mxu1 %v11364_v21 }
 0x13b   : > { %9702 = vmatprep.subr.bf16.mxu1 %v11365_v22 }
 0x13e   : > { %9703 = vmatpush3.bf16.msra.mxu1 %v11365_v22 }
 0x13f   : > { %9704 = vmatprep.subr.bf16.mxu1 %v11366_v23 }
 0x142   : > { %9705 = vmatpush3.bf16.msra.mxu1 %v11366_v23 }
 0x143   : > { %9706 = vmatprep.subr.bf16.mxu1 %v11367_v24 }
 0x146   : > { %9707 = vmatpush3.bf16.msra.mxu1 %v11367_v24 }
 0x147   : > { %9708 = vmatprep.subr.bf16.mxu1 %v11368_v25 }
 0x14a   : > { %9709 = vmatpush3.bf16.msra.mxu1 %v11368_v25 }
 0x14b   : > { %9718 = vmatprep.subr.bf16.mxu1 %v11369_v26 }
 0x14d   : > { %9711 = vmatmul.mubr.bf16.vlgmr.msra.gmra.mrb[8].mxu1 %v11358_v16 }
 0x14e   : > { %9719 = vmatpush3.bf16.msra.mxu1 %v11369_v26  ;;  %9714 = vmatprep.mubr.bf16.mxu1 %v11359_v17 }
 0x14f   : > { %9720 = vmatprep.subr.bf16.mxu1 %v11371_v27 }
 0x152   : > { %9721 = vmatpush3.bf16.msra.mxu1 %v11371_v27 }
 0x153   : > { %9722 = vmatprep.subr.bf16.mxu1 %v11373_v28 }
 0x155   : > { %9715 = vmatmul.mubr.bf16.gmra.mrb[12].mxu1 %v11360_v20 }
 0x156   : > { %9723 = vmatpush3.bf16.msra.mxu1 %v11373_v28 }
 0x157   : > { %9724 = vmatprep.subr.bf16.mxu1 %v11375_v30 }
 0x15a   : > { %9725 = vmatpush3.bf16.msra.mxu1 %v11375_v30 }
 0x15b   : > { %9726 = vmatprep.subr.bf16.mxu1 %v11377_v32 }
 0x15e   : > { %9727 = vmatpush3.bf16.msra.mxu1 %v11377_v32 }
 0x15f   : > { %9728 = vmatprep.subr.bf16.mxu1 %v11379_v34 }
 0x162   : > { %9729 = vmatpush3.bf16.msra.mxu1 %v11379_v34 }
 0x163   : > { %9730 = vmatprep.subr.bf16.mxu1 %v11381_v36 }
 0x166   : > { %9731 = vmatpush3.bf16.msra.mxu1 %v11381_v36 }
 0x167   : > { %9732 = vmatprep.subr.bf16.mxu1 %v11383_v38 }
 0x16a   : > { %9733 = vmatpush3.bf16.msra.mxu1 %v11383_v38 }
 0x16b   : > { %9742 = vmatprep.subr.bf16.mxu1 %v12360_v40 }
 0x1e0   : > { %v9664_v45 = vpop.f32.mrb[0].mxu1 }
 0x1e1   : > { %v674_v46 = vmul.f32 %v9664_v45, %v8557_v43  ;;  %v636_v47 = vpop.f32.mrb[1].mxu1 }
 0x1e2   : > { %v672_v48 = vmul.f32 %v8557_v43, %v636_v47  ;;  %v9665_v49 = vpop.f32.mrb[2].mxu1 }
 0x1e3   : > { %v687_v50 = vadd.f32 %v8558_v44, %v674_v46  ;;  %v675_v51 = vmul.f32 %v9665_v49, %v8557_v43  ;;  %v639_v52 = vpop.f32.mrb[3].mxu1  ;;  %v11387_v49 = vld [vmem:[#allocation12 + $0x8] sm:$0xff]  }
 0x1e4   : > { %v685_v53 = vadd.f32 %v8558_v44, %v672_v48  ;;  %v673_v54 = vmul.f32 %v8557_v43, %v639_v52 }
 0x1e5   : > { %v695_v55 = vmax.f32 %v687_v50, 0.0  ;;  %v688_v56 = vadd.f32 %v8558_v44, %v675_v51 }
 0x1e6   : > { %v693_v57 = vmax.f32 %v685_v53, 0.0  ;;  %v686_v58 = vadd.f32 %v8558_v44, %v673_v54 }
 0x1e7   : > { %v704_v59 = vmul.f32 2.0, %v695_v55  ;;  %v696_v60 = vmax.f32 %v688_v56, 0.0 }
 0x1e8   : > { %v702_v61 = vmul.f32 2.0, %v693_v57  ;;  %v694_v62 = vmax.f32 %v686_v58, 0.0  ;;  %v9668_v63 = vpop.f32.mrb[4].mxu1  ;;  %v1255_v57 = vld [vmem:[#allocation2 + $0x2] sm:$0xff] }
 0x1e9   : > { %v11152_v0 = vround.rtne.f32 %v704_v59  ;;  %v705_v1 = vmul.f32 2.0, %v696_v60  ;;  %v678_v2 = vmul.f32 %v9668_v63, %v8557_v43  ;;  %v652_v3 = vpop.f32.mrb[5].mxu1 }
 0x1ea   : > { %v11150_v4 = vround.rtne.f32 %v702_v61  ;;  %v703_v5 = vmul.f32 2.0, %v694_v62  ;;  %v676_v6 = vmul.f32 %v8557_v43, %v652_v3  ;;  %v9669_v7 = vpop.f32.mrb[6].mxu1  ;;  %v11389_v62 = vld [vmem:[#allocation12 + $0x10] sm:$0xff]  }
 0x1eb   : > { %v720_v8 = vmax.f32 %v11152_v0, 0.0  ;;  %v11153_v9 = vround.rtne.f32 %v705_v1  ;;  %v691_v10 = vadd.f32 %v8558_v44, %v678_v2  ;;  %v679_v11 = vmul.f32 %v9669_v7, %v8557_v43  ;;  %v655_v12 = vpop.f32.mrb[7].mxu1 }
 0x1ec   : > { %v718_v13 = vmax.f32 %v11150_v4, 0.0  ;;  %v11151_v14 = vround.rtne.f32 %v703_v5  ;;  %v689_v15 = vadd.f32 %v8558_v44, %v676_v6  ;;  %v677_v16 = vmul.f32 %v8557_v43, %v655_v12  ;;  %v11388_v6 = vld [vmem:[#allocation12 + $0xc8] sm:$0xff]   ;;  %v11390_v12 = vld [vmem:[#allocation12 + $0xd0] sm:$0xff]  }
 0x1ed   : > { %v728_v17 = vmin.f32 %v720_v8, 3.0  ;;  %v721_v18 = vmax.f32 %v11153_v9, 0.0  ;;  %v699_v19 = vmax.f32 %v691_v10, 0.0  ;;  %v692_v20 = vadd.f32 %v8558_v44, %v679_v11  ;;  %v11391_v8 = vld [vmem:[#allocation12 + $0x18] sm:$0xff]   ;;  %v12427_v10 = vld [vmem:[#allocation2] sm:$0xff] }
 0x1ee   : > { %v726_v21 = vmin.f32 %v718_v13, 3.0  ;;  %v719_v22 = vmax.f32 %v11151_v14, 0.0  ;;  %v697_v23 = vmax.f32 %v689_v15, 0.0  ;;  %v690_v24 = vadd.f32 %v8558_v44, %v677_v16  ;;  %v11393_v15 = vld [vmem:[#allocation12 + $0x20] sm:$0xff]  }
 0x1ef   : > { %v12366_v25 = vmul.f32 0.5, %v728_v17  ;;  %v729_v26 = vmin.f32 %v721_v18, 3.0  ;;  %v708_v27 = vmul.f32 2.0, %v699_v19  ;;  %v700_v28 = vmax.f32 %v692_v20, 0.0  ;;  %v11392_v20 = vld [vmem:[#allocation12 + $0xd8] sm:$0xff]  }
 0x1f0   : > { %v12368_v30 = vmul.f32 0.5, %v726_v21  ;;  %v727_v31 = vmin.f32 %v719_v22, 3.0  ;;  %v706_v32 = vmul.f32 2.0, %v697_v23  ;;  %v698_v33 = vmax.f32 %v690_v24, 0.0  ;;  %v11395_v22 = vld [vmem:[#allocation12 + $0x28] sm:$0xff]   ;;  %v11394_v23 = vld [vmem:[#allocation12 + $0xe0] sm:$0xff]  }
 0x1f1   : > { %745 = vst [vmem:[#allocation2 + $0x31] sm:$0xff] %v12366_v25  ;;  %v12371_v34 = vmul.f32 0.5, %v729_v26  ;;  %v11156_v35 = vround.rtne.f32 %v708_v27  ;;  %v709_v36 = vmul.f32 2.0, %v700_v28  ;;  %v11397_v24 = vld [vmem:[#allocation12 + $0x30] sm:$0xff]   ;;  %v11396_v26 = vld [vmem:[#allocation12 + $0xe8] sm:$0xff]   ;;  %v11399_v27 = vld [vmem:[#allocation12 + $0x38] sm:$0xff]  }
 0x1f2   : > { %743 = vst [vmem:[#allocation2 + $0x11] sm:$0xff] %v12368_v30  ;;  %v12374_v37 = vmul.f32 0.5, %v727_v31  ;;  %v11154_v38 = vround.rtne.f32 %v706_v32  ;;  %v707_v39 = vmul.f32 2.0, %v698_v33  ;;  %v1008_v41 = vpack.c.bf16 %v12368_v30, %v1000_v29  ;;  %v11398_v28 = vld [vmem:[#allocation12 + $0xf0] sm:$0xff]   ;;  %v11400_v31 = vld [vmem:[#allocation12 + $0xf8] sm:$0xff]  }
 0x1f3   : > { %746 = vst [vmem:[#allocation2 + $0x41] sm:$0xff] %v12371_v34  ;;  %v724_v43 = vmax.f32 %v11156_v35, 0.0  ;;  %v11157_v44 = vround.rtne.f32 %v709_v36  ;;  %v1564_v45 = vpack.c.bf16 %v12371_v34, %v12366_v25 }
 0x1f4   : > { %744 = vst [vmem:[#allocation2 + $0x21] sm:$0xff] %v12374_v37  ;;  %v722_v46 = vmax.f32 %v11154_v38, 0.0  ;;  %v11155_v47 = vround.rtne.f32 %v707_v39  ;;  %9734 = vmatprep.mubr.bf16.mxu1 %v1008_v41  ;;  %v12383_v48 = vpack.c.bf16 %v12366_v25, %v12374_v37  ;;  %v1563_v50 = vpack.c.bf16 %v12374_v37, %v12368_v30  ;;  %v11401_v38 = vld [vmem:[#allocation12 + $0x100] sm:$0xff]   ;;  %v11411_v30 = vld [vmem:[#allocation12 + $0x150] sm:$0xff]   ;;  %v11412_v37 = vld [vmem:[#allocation12 + $0x158] sm:$0xff]  }
 0x1f5   : > { %v732_v51 = vmin.f32 %v724_v43, 3.0  ;;  %v725_v52 = vmax.f32 %v11157_v44, 0.0  ;;  %v11402_v43 = vld [vmem:[#allocation12 + $0x108] sm:$0xff]  }
 0x1f6   : > { %v730_v53 = vmin.f32 %v722_v46, 3.0  ;;  %v723_v54 = vmax.f32 %v11155_v47, 0.0  ;;  %9735 = vmatmul.mubr.bf16.vlgmr.msra.gmra.mrb[16].mxu1 %v12383_v48 }
 0x1f7   : > { %v12388_v55 = vmul.f32 0.5, %v732_v51  ;;  %v733_v56 = vmin.f32 %v725_v52, 3.0  ;;  %9743 = vmatpush3.bf16.msra.mxu1 %v12360_v40 }
 0x1f8   : > { %v12391_v58 = vmul.f32 0.5, %v730_v53  ;;  %v731_v59 = vmin.f32 %v723_v54, 3.0  ;;  %9744 = vmatprep.subr.bf16.mxu1 %v11387_v49  ;;  %v12409_v2 = vld [vmem:[#allocation2 + $0x32] sm:$0xff]  ;;  %v11405_v54 = vld [vmem:[#allocation12 + $0x120] sm:$0xff]  }
 0x1f9   : > { %749 = vst [vmem:[#allocation2 + $0x71] sm:$0xff] %v12388_v55  ;;  %v12394_v60 = vmul.f32 0.5, %v733_v56  ;;  %v12396_v61 = vld [vmem:[#allocation2 + $0x12] sm:$0xff]  ;;  %v11406_v56 = vld [vmem:[#allocation12 + $0x128] sm:$0xff]  }
 0x1fa   : > { %747 = vst [vmem:[#allocation2 + $0x51] sm:$0xff] %v12391_v58  ;;  %v12399_v63 = vmul.f32 0.5, %v731_v59  ;;  %v1263_v0 = vpack.c.bf16 %v12396_v61, %v1255_v57  ;;  %v12404_v40 = vpack.c.bf16 %v12391_v58, %v12371_v34  ;;  %v973_v3 = vld [vmem:[#allocation2 + $0x10] sm:$0xff]  ;;  %v12431_v13 = vld [vmem:[#allocation2 + $0x42] sm:$0xff]  ;;  %v11404_v53 = vld [vmem:[#allocation12 + $0x118] sm:$0xff]  }
 0x1fb   : > { %750 = vst [vmem:[#allocation2 + $0x81] sm:$0xff] %v12394_v60  ;;  %v12407_v1 = vld [vmem:[#allocation2 + $0x22] sm:$0xff]  ;;  %9745 = vmatpush3.bf16.msra.mxu1 %v11387_v49  ;;  %v1566_v4 = vpack.c.bf16 %v12394_v60, %v12388_v55  ;;  %v980_v11 = vpack.c.bf16 %v973_v3, %v12427_v10  ;;  %v975_v32 = vld [vmem:[#allocation2 + $0x30] sm:$0xff]  ;;  %v11408_v59 = vld [vmem:[#allocation12 + $0x138] sm:$0xff]  }
 0x1fc   : > { %748 = vst [vmem:[#allocation2 + $0x61] sm:$0xff] %v12399_v63  ;;  %9782 = vmatprep.mubr.bf16.mxu0 %v1263_v0  ;;  %v12416_v5 = vpack.c.bf16 %v12409_v2, %v12407_v1  ;;  %9738 = vmatprep.mubr.bf16.mxu1 %v12404_v40  ;;  %v12421_v7 = vpack.c.bf16 %v12388_v55, %v12399_v63  ;;  %v1406_v17 = vld [vmem:[#allocation2 + $0x20] sm:$0xff]  ;;  %v11403_v49 = vld [vmem:[#allocation12 + $0x110] sm:$0xff]   ;;  %v11410_v0 = vld [vmem:[#allocation12 + $0x148] sm:$0xff]  }
 0x1fd   : > { %9746 = vmatprep.subr.bf16.mxu1 %v11389_v62  ;;  %v1565_v9 = vpack.c.bf16 %v12399_v63, %v12391_v58  ;;  %v1413_v21 = vpack.c.bf16 %v1406_v17, %v973_v3  ;;  %v12449_v33 = vpack.c.bf16 %v975_v32, %v1406_v17  ;;  %v1408_v35 = vld [vmem:[#allocation2 + $0x40] sm:$0xff]  ;;  %v11407_v57 = vld [vmem:[#allocation12 + $0x130] sm:$0xff]   ;;  %v11414_v55 = vld [vmem:[#allocation12 + $0x168] sm:$0xff]  }
 0x1fe   : > { %9783 = vmatmul.mubr.bf16.vlgmr.msra.gmra.mrb[0].mxu0 %v12416_v5  ;;  %9739 = vmatmul.mubr.bf16.gmra.mrb[20].mxu1 %v12421_v7  ;;  %v1414_v41 = vpack.c.bf16 %v1408_v35, %v975_v32  ;;  %v11413_v34 = vld [vmem:[#allocation12 + $0x160] sm:$0xff]   ;;  %v11419_v17 = vld [vmem:[#allocation12 + $0x190] sm:$0xff]   ;;  %v11432_v32 = vld [vmem:[#allocation12 + $0x1f8] sm:$0xff]  }
 0x1ff   : > { %9791 = vmatpush3.bf16.msra.mxu0 %v12363_v42  ;;  %9747 = vmatpush3.bf16.msra.mxu1 %v11389_v62  ;;  %v11409_v62 = vld [vmem:[#allocation12 + $0x140] sm:$0xff]  }
 0x200   : > { %9792 = vmatprep.subr.bf16.mxu0 %v11388_v6  ;;  %9758 = vmatprep.mubr.bf16.mxu1 %v980_v11  ;;  %v12441_v19 = vld [vmem:[#allocation2 + $0x72] sm:$0xff]  ;;  %v1714_v11 = vpack.c.bf16 %v12431_v13, %v12409_v2  ;;  %v11421_v2 = vld [vmem:[#allocation12 + $0x1a0] sm:$0xff]  }
 0x201   : > { %v12433_v14 = vld [vmem:[#allocation2 + $0x52] sm:$0xff]  ;;  %9748 = vmatprep.subr.bf16.mxu1 %v11391_v8 }
 0x202   : > { %v12437_v16 = vpack.c.bf16 %v12433_v14, %v12431_v13  ;;  %v977_v29 = vld [vmem:[#allocation2 + $0x50] sm:$0xff]  ;;  %v12458_v51 = vld [vmem:[#allocation2 + $0x80] sm:$0xff]  ;;  %v11422_v13 = vld [vmem:[#allocation12 + $0x1a8] sm:$0xff]  }
 0x203   : > { %9793 = vmatpush3.bf16.msra.mxu0 %v11388_v6  ;;  %v12439_v18 = vld [vmem:[#allocation2 + $0x62] sm:$0xff]  ;;  %9749 = vmatpush3.bf16.msra.mxu1 %v11391_v8  ;;  %v12451_v36 = vpack.c.bf16 %v977_v29, %v1408_v35  ;;  %v979_v46 = vld [vmem:[#allocation2 + $0x70] sm:$0xff]  ;;  %v11416_v8 = vld [vmem:[#allocation12 + $0x178] sm:$0xff]  }
 0x204   : > { %9786 = vmatprep.mubr.bf16.mxu0 %v12437_v16  ;;  %9794 = vmatprep.subr.bf16.mxu0 %v11390_v12  ;;  %v12446_v42 = vpack.c.bf16 %v12441_v19, %v12439_v18  ;;  %v1410_v39 = vld [vmem:[#allocation2 + $0x60] sm:$0xff]  ;;  %v1416_v52 = vpack.c.bf16 %v12458_v51, %v979_v46  ;;  %v11415_v6 = vld [vmem:[#allocation12 + $0x170] sm:$0xff]   ;;  %v11434_v35 = vld [vmem:[#allocation12 + $0x208] sm:$0xff]  }
 0x205   : > { %9750 = vmatprep.subr.bf16.mxu1 %v11393_v15  ;;  %v1415_v44 = vpack.c.bf16 %v1410_v39, %v977_v29  ;;  %v12455_v47 = vpack.c.bf16 %v979_v46, %v1410_v39  ;;  %v11430_v29 = vld [vmem:[#allocation12 + $0x1e8] sm:$0xff]   ;;  %v11436_v39 = vld [vmem:[#allocation12 + $0x218] sm:$0xff]  }
 0x206   : > { %9787 = vmatmul.mubr.bf16.gmra.mrb[4].mxu0 %v12446_v42 }
 0x207   : > { %9795 = vmatpush3.bf16.msra.mxu0 %v11390_v12  ;;  %9806 = vmatprep.mubr.bf16.mxu0 %v1413_v21  ;;  %v11418_v12 = vld [vmem:[#allocation12 + $0x188] sm:$0xff]  }
 0x208   : > { %9796 = vmatprep.subr.bf16.mxu0 %v11392_v20  ;;  %9751 = vmatpush3.bf16.msra.mxu1 %v11393_v15  ;;  %v1715_v15 = vpack.c.bf16 %v12439_v18, %v12433_v14  ;;  %v11423_v14 = vld [vmem:[#allocation12 + $0x1b0] sm:$0xff]   ;;  %v11424_v18 = vld [vmem:[#allocation12 + $0x1b8] sm:$0xff]  }
 0x209   : > { %9752 = vmatprep.subr.bf16.mxu1 %v11395_v22 }
 0x20b   : > { %9797 = vmatpush3.bf16.msra.mxu0 %v11392_v20  ;;  %v12495_v20 = vld [vmem:[#allocation2 + $0x82] sm:$0xff] }
 0x20c   : > { %9798 = vmatprep.subr.bf16.mxu0 %v11394_v23  ;;  %9753 = vmatpush3.bf16.msra.mxu1 %v11395_v22  ;;  %v1716_v21 = vpack.c.bf16 %v12495_v20, %v12441_v19  ;;  %v11420_v22 = vld [vmem:[#allocation12 + $0x198] sm:$0xff]   ;;  %v11425_v19 = vld [vmem:[#allocation12 + $0x1c0] sm:$0xff]  }
 0x20d   : > { %9754 = vmatprep.subr.bf16.mxu1 %v11397_v24 }
 0x20f   : > { %9799 = vmatpush3.bf16.msra.mxu0 %v11394_v23  ;;  %v11426_v23 = vld [vmem:[#allocation12 + $0x1c8] sm:$0xff]  }
 0x210   : > { %9800 = vmatprep.subr.bf16.mxu0 %v11396_v26  ;;  %9755 = vmatpush3.bf16.msra.mxu1 %v11397_v24  ;;  %v11427_v24 = vld [vmem:[#allocation12 + $0x1d0] sm:$0xff]  }
 0x211   : > { %9756 = vmatprep.subr.bf16.mxu1 %v11399_v27 }
 0x213   : > { %9801 = vmatpush3.bf16.msra.mxu0 %v11396_v26  ;;  %v1867_v26 = vpack.c.bf16 %v12427_v10, %v12458_v51 }
 0x214   : > { %9802 = vmatprep.subr.bf16.mxu0 %v11398_v28  ;;  %9757 = vmatpush3.bf16.msra.mxu1 %v11399_v27  ;;  %v11428_v27 = vld [vmem:[#allocation12 + $0x1d8] sm:$0xff]  }
 0x217   : > { %9803 = vmatpush3.bf16.msra.mxu0 %v11398_v28  ;;  %9759 = vmatmul.mubr.bf16.vlgmr.msra.gmra.mrb[16].mxu1 %v12449_v33  ;;  %v11429_v28 = vld [vmem:[#allocation12 + $0x1e0] sm:$0xff]  }
 0x218   : > { %9804 = vmatprep.subr.bf16.mxu0 %v11400_v31  ;;  %9762 = vmatprep.mubr.bf16.mxu1 %v12451_v36 }
 0x21b   : > { %9805 = vmatpush3.bf16.msra.mxu0 %v11400_v31  ;;  %v11431_v31 = vld [vmem:[#allocation12 + $0x1f0] sm:$0xff]  }
 0x21c   : > { %9814 = vmatprep.subr.bf16.mxu0 %v11401_v38 }
 0x21e   : > { %9807 = vmatmul.mubr.bf16.vlgmr.msra.gmra.mrb[0].mxu0 %v1414_v41  ;;  %v11437_v41 = vld [vmem:[#allocation12 + $0x220] sm:$0xff]  }
 0x21f   : > { %9810 = vmatprep.mubr.bf16.mxu0 %v1415_v44  ;;  %9815 = vmatpush3.bf16.msra.mxu0 %v11401_v38 }
 0x220   : > { %9816 = vmatprep.subr.bf16.mxu0 %v11402_v43  ;;  %9763 = vmatmul.mubr.bf16.gmra.mrb[20].mxu1 %v12455_v47  ;;  %v12475_v3 = vpop.f32.mrb[8].mxu1 }
 0x221   : > { %v12477_v25 = vpop.f32.mrb[9].mxu1 }
 0x223   : > { %9817 = vmatpush3.bf16.msra.mxu0 %v11402_v43  ;;  %v11440_v43 = vld [vmem:[#allocation12 + $0x238] sm:$0xff]  }
 0x224   : > { %9818 = vmatprep.subr.bf16.mxu0 %v11403_v49 }
 0x226   : > { %9811 = vmatmul.mubr.bf16.gmra.mrb[4].mxu0 %v1416_v52 }
 0x227   : > { %9819 = vmatpush3.bf16.msra.mxu0 %v11403_v49  ;;  %9830 = vmatprep.mubr.bf16.mxu0 %v1563_v50  ;;  %v1713_v50 = vpack.c.bf16 %v12407_v1, %v12396_v61 }
 0x228   : > { %9820 = vmatprep.subr.bf16.mxu0 %v11404_v53 }
 0x22b   : > { %9821 = vmatpush3.bf16.msra.mxu0 %v11404_v53 }
 0x22c   : > { %9822 = vmatprep.subr.bf16.mxu0 %v11405_v54 }
 0x22f   : > { %9823 = vmatpush3.bf16.msra.mxu0 %v11405_v54  ;;  %v11442_v54 = vld [vmem:[#allocation12 + $0x288] sm:$0xff]  }
 0x230   : > { %9824 = vmatprep.subr.bf16.mxu0 %v11406_v56 }
 0x233   : > { %9825 = vmatpush3.bf16.msra.mxu0 %v11406_v56  ;;  %v11443_v56 = vld [vmem:[#allocation12 + $0x290] sm:$0xff]  }
 0x234   : > { %9826 = vmatprep.subr.bf16.mxu0 %v11407_v57 }
 0x237   : > { %9827 = vmatpush3.bf16.msra.mxu0 %v11407_v57  ;;  %v11444_v57 = vld [vmem:[#allocation12 + $0x298] sm:$0xff]  }
 0x238   : > { %9828 = vmatprep.subr.bf16.mxu0 %v11408_v59 }
 0x23b   : > { %9829 = vmatpush3.bf16.msra.mxu0 %v11408_v59  ;;  %v11445_v59 = vld [vmem:[#allocation12 + $0x2a0] sm:$0xff]  }
 0x23c   : > { %9838 = vmatprep.subr.bf16.mxu0 %v11409_v62 }
 0x23e   : > { %9831 = vmatmul.mubr.bf16.vlgmr.msra.gmra.mrb[0].mxu0 %v1564_v45  ;;  %v12479_v45 = vpop.f32.mrb[10].mxu1 }
 0x23f   : > { %9834 = vmatprep.mubr.bf16.mxu0 %v1565_v9  ;;  %9839 = vmatpush3.bf16.msra.mxu0 %v11409_v62  ;;  %v12481_v58 = vpop.f32.mrb[11].mxu1  ;;  %v11417_v9 = vld [vmem:[#allocation12 + $0x180] sm:$0xff]   ;;  %v11446_v62 = vld [vmem:[#allocation12 + $0x2a8] sm:$0xff]  }
 0x240   : > { %9840 = vmatprep.subr.bf16.mxu0 %v11410_v0  ;;  %v12483_v63 = vpop.f32.mrb[12].mxu1 }
 0x241   : > { %v12485_v61 = vpop.f32.mrb[13].mxu1 }
 0x242   : > { %v12487_v1 = vpop.f32.mrb[14].mxu1 }
 0x243   : > { %9841 = vmatpush3.bf16.msra.mxu0 %v11410_v0  ;;  %v11447_v0 = vld [vmem:[#allocation12 + $0x2b0] sm:$0xff]  }
 0x244   : > { %9842 = vmatprep.subr.bf16.mxu0 %v11411_v30 }
 0x246   : > { %9835 = vmatmul.mubr.bf16.gmra.mrb[4].mxu0 %v1566_v4  ;;  %v12489_v4 = vpop.f32.mrb[15].mxu1 }
 0x247   : > { %9843 = vmatpush3.bf16.msra.mxu0 %v11411_v30  ;;  %9854 = vmatprep.mubr.bf16.mxu0 %v1713_v50  ;;  %v11448_v30 = vld [vmem:[#allocation12 + $0x2b8] sm:$0xff]   ;;  %v8567_v50 = vld [vmem:[#allocation13 + $0xc] ss:$0 sm:$0xff] }
 0x248   : > { %9844 = vmatprep.subr.bf16.mxu0 %v11412_v37 }
 0x24b   : > { %9845 = vmatpush3.bf16.msra.mxu0 %v11412_v37  ;;  %v12528_v37 = vld [vmem:[#allocation12 + $0x240] sm:$0xff]  }
 0x24c   : > { %9846 = vmatprep.subr.bf16.mxu0 %v11413_v34 }
 0x24f   : > { %9847 = vmatpush3.bf16.msra.mxu0 %v11413_v34  ;;  %v953_v34 = vmul.f32 %v12475_v3, %v8567_v50 }
 0x250   : > { %9848 = vmatprep.subr.bf16.mxu0 %v11414_v55 }
 0x253   : > { %9849 = vmatpush3.bf16.msra.mxu0 %v11414_v55  ;;  %v8568_v55 = vld [vmem:[#allocation13 + $0xd] ss:$0 sm:$0xff] }
 0x254   : > { %9850 = vmatprep.subr.bf16.mxu0 %v11415_v6 }
 0x257   : > { %9851 = vmatpush3.bf16.msra.mxu0 %v11415_v6  ;;  %v951_v6 = vmul.f32 %v8567_v50, %v12477_v25 }
 0x258   : > { %9852 = vmatprep.subr.bf16.mxu0 %v11416_v8 }
 0x25b   : > { %9853 = vmatpush3.bf16.msra.mxu0 %v11416_v8  ;;  %v954_v8 = vmul.f32 %v12479_v45, %v8567_v50 }
 0x25c   : > { %9862 = vmatprep.subr.bf16.mxu0 %v11417_v9 }
 0x25e   : > { %9855 = vmatmul.mubr.bf16.vlgmr.msra.gmra.mrb[0].mxu0 %v1714_v11  ;;  %v957_v11 = vmul.f32 %v12483_v63, %v8567_v50 }
 0x25f   : > { %9858 = vmatprep.mubr.bf16.mxu0 %v1715_v15  ;;  %9863 = vmatpush3.bf16.msra.mxu0 %v11417_v9  ;;  %v952_v9 = vmul.f32 %v8567_v50, %v12481_v58  ;;  %v955_v15 = vmul.f32 %v8567_v50, %v12485_v61 }
 0x260   : > { %9864 = vmatprep.subr.bf16.mxu0 %v11418_v12  ;;  %v970_v3 = vadd.f32 %v8568_v55, %v957_v11 }
 0x263   : > { %9865 = vmatpush3.bf16.msra.mxu0 %v11418_v12  ;;  %v966_v12 = vadd.f32 %v8568_v55, %v953_v34 }
 0x264   : > { %9866 = vmatprep.subr.bf16.mxu0 %v11419_v17 }
 0x266   : > { %9859 = vmatmul.mubr.bf16.gmra.mrb[4].mxu0 %v1716_v21  ;;  %v967_v21 = vadd.f32 %v8568_v55, %v954_v8 }
 0x267   : > { %9867 = vmatpush3.bf16.msra.mxu0 %v11419_v17  ;;  %9878 = vmatprep.mubr.bf16.mxu0 %v12449_v33  ;;  %v11433_v33 = vld [vmem:[#allocation12 + $0x200] sm:$0xff]   ;;  %v964_v17 = vadd.f32 %v8568_v55, %v951_v6 }
 0x268   : > { %9868 = vmatprep.subr.bf16.mxu0 %v11420_v22  ;;  %v2377_v45 = vmul.f32 12.7, %v967_v21 }
 0x269   : > { %v2374_v25 = vmul.f32 12.7, %v964_v17 }
 0x26b   : > { %9869 = vmatpush3.bf16.msra.mxu0 %v11420_v22  ;;  %v956_v22 = vmul.f32 %v8567_v50, %v12489_v4 }
 0x26c   : > { %9870 = vmatprep.subr.bf16.mxu0 %v11421_v2 }
 0x26f   : > { %9871 = vmatpush3.bf16.msra.mxu0 %v11421_v2  ;;  %v965_v2 = vadd.f32 %v8568_v55, %v952_v9 }
 0x270   : > { %9872 = vmatprep.subr.bf16.mxu0 %v11422_v13 }
 0x271   : > { %v2375_v58 = vmul.f32 12.7, %v965_v2 }
 0x273   : > { %9873 = vmatpush3.bf16.msra.mxu0 %v11422_v13  ;;  %v2376_v13 = vmul.f32 12.7, %v966_v12 }
 0x274   : > { %9874 = vmatprep.subr.bf16.mxu0 %v11423_v14 }
 0x275   : > { %v11168_v63 = vround.rtne.f32 %v2376_v13 }
 0x277   : > { %9875 = vmatpush3.bf16.msra.mxu0 %v11423_v14  ;;  %v968_v14 = vadd.f32 %v8568_v55, %v955_v15 }
 0x278   : > { %9876 = vmatprep.subr.bf16.mxu0 %v11424_v18 }
 0x27b   : > { %9877 = vmatpush3.bf16.msra.mxu0 %v11424_v18 }
 0x27c   : > { %9886 = vmatprep.subr.bf16.mxu0 %v11425_v19 }
 0x27e   : > { %9879 = vmatmul.mubr.bf16.vlgmr.msra.gmra.mrb[0].mxu0 %v12451_v36  ;;  %v2013_v36 = vld [vmem:[#allocation2 + $0x91] sm:$0xff] }
 0x27f   : > { %9882 = vmatprep.mubr.bf16.mxu0 %v12455_v47  ;;  %9887 = vmatpush3.bf16.msra.mxu0 %v11425_v19  ;;  %v2017_v38 = vpack.c.bf16 %v2013_v36, %v12394_v60  ;;  %v2163_v60 = vld [vmem:[#allocation2 + $0x92] sm:$0xff]  ;;  %v969_v19 = vadd.f32 %v8568_v55, %v956_v22 }
 0x280   : > { %9888 = vmatprep.subr.bf16.mxu0 %v11426_v23 }
 0x283   : > { %9889 = vmatpush3.bf16.msra.mxu0 %v11426_v23  ;;  %v2380_v23 = vmul.f32 12.7, %v970_v3 }
 0x284   : > { %9890 = vmatprep.subr.bf16.mxu0 %v11427_v24 }
 0x286   : > { %9883 = vmatmul.mubr.bf16.gmra.mrb[4].mxu0 %v1867_v26  ;;  %v11166_v26 = vround.rtne.f32 %v2374_v25 }
 0x287   : > { %9891 = vmatpush3.bf16.msra.mxu0 %v11427_v24  ;;  %9902 = vmatprep.mubr.bf16.mxu0 %v12383_v48  ;;  %v11435_v48 = vld [vmem:[#allocation12 + $0x210] sm:$0xff]   ;;  %v2378_v24 = vmul.f32 12.7, %v968_v14 }
 0x288   : > { %9892 = vmatprep.subr.bf16.mxu0 %v11428_v27 }
 0x289   : > { %v11170_v4 = vround.rtne.f32 %v2378_v24 }
 0x28b   : > { %9893 = vmatpush3.bf16.msra.mxu0 %v11428_v27  ;;  %v11169_v27 = vround.rtne.f32 %v2377_v45 }
 0x28c   : > { %9894 = vmatprep.subr.bf16.mxu0 %v11429_v28 }
 0x28f   : > { %9895 = vmatpush3.bf16.msra.mxu0 %v11429_v28  ;;  %v2379_v28 = vmul.f32 12.7, %v969_v19 }
 0x290   : > { %9896 = vmatprep.subr.bf16.mxu0 %v11430_v29 }
 0x293   : > { %9897 = vmatpush3.bf16.msra.mxu0 %v11430_v29  ;;  %v11172_v29 = vround.rtne.f32 %v2380_v23 }
 0x294   : > { %9898 = vmatprep.subr.bf16.mxu0 %v11431_v31 }
 0x297   : > { %9899 = vmatpush3.bf16.msra.mxu0 %v11431_v31  ;;  %v8653_v31 = vclamps-f32 %v11168_v63, 127.0 }
 0x298   : > { %9900 = vmatprep.subr.bf16.mxu0 %v11432_v32 }
 0x29b   : > { %9901 = vmatpush3.bf16.msra.mxu0 %v11432_v32 }
 0x29c   : > { %9910 = vmatprep.subr.bf16.mxu0 %v11433_v33 }
 0x29e   : > { %9903 = vmatmul.mubr.bf16.vlgmr.msra.gmra.mrb[0].mxu0 %v12404_v40  ;;  %v11438_v40 = vld [vmem:[#allocation12 + $0x228] sm:$0xff]  }
 0x29f   : > { %9906 = vmatprep.mubr.bf16.mxu0 %v12421_v7  ;;  %9911 = vmatpush3.bf16.msra.mxu0 %v11433_v33  ;;  %v11439_v7 = vld [vmem:[#allocation12 + $0x230] sm:$0xff]   ;;  %v8641_v33 = vld [vmem:[#allocation13 + $0x2] ss:$0 sm:$0xff] }
 0x2a0   : > { %9912 = vmatprep.subr.bf16.mxu0 %v11434_v35 }
 0x2a3   : > { %9913 = vmatpush3.bf16.msra.mxu0 %v11434_v35  ;;  %v8651_v35 = vclamps-f32 %v11166_v26, 127.0 }
 0x2a4   : > { %9914 = vmatprep.subr.bf16.mxu0 %v11435_v48 }
 0x2a6   : > { %9907 = vmatmul.mubr.bf16.gmra.mrb[4].mxu0 %v2017_v38 }
 0x2a7   : > { %9915 = vmatpush3.bf16.msra.mxu0 %v11435_v48  ;;  %9926 = vmatprep.mubr.bf16.mxu0 %v12416_v5  ;;  %v2167_v5 = vpack.c.bf16 %v2163_v60, %v12495_v20  ;;  %v958_v20 = vmul.f32 %v12487_v1, %v8567_v50  ;;  %v11167_v1 = vround.rtne.f32 %v2375_v58 }
 0x2a8   : > { %9916 = vmatprep.subr.bf16.mxu0 %v11436_v39 }
 0x2a9   : > { %v971_v18 = vadd.f32 %v8568_v55, %v958_v20  ;;  %v8652_v60 = vclamps-f32 %v11167_v1, 127.0 }
 0x2ab   : > { %9917 = vmatpush3.bf16.msra.mxu0 %v11436_v39  ;;  %v2381_v61 = vmul.f32 12.7, %v971_v18  ;;  %v8654_v39 = vclamps-f32 %v11169_v27, 127.0  ;;  %v2407_v9 = vmul.f32 0.07874016, %v8652_v60 }
 0x2ac   : > { %9918 = vmatprep.subr.bf16.mxu0 %v11437_v41 }
 0x2ad   : > { %v11173_v48 = vround.rtne.f32 %v2381_v61  ;;  %v2409_v55 = vmul.f32 0.07874016, %v8654_v39 }
 0x2af   : > { %9919 = vmatpush3.bf16.msra.mxu0 %v11437_v41  ;;  %v11171_v41 = vround.rtne.f32 %v2379_v28 }
 0x2b0   : > { %9920 = vmatprep.subr.bf16.mxu0 %v11438_v40 }
 0x2b1   : > { %v8656_v6 = vclamps-f32 %v11171_v41, 127.0 }
 0x2b3   : > { %9921 = vmatpush3.bf16.msra.mxu0 %v11438_v40  ;;  %v8642_v40 = vld [vmem:[#allocation13 + $0x3] ss:$0 sm:$0xff]  ;;  %v12550_v14 = vmul.f32 0.07874016, %v8656_v6 }
 0x2b4   : > { %9922 = vmatprep.subr.bf16.mxu0 %v11439_v7 }
 0x2b7   : > { %9923 = vmatpush3.bf16.msra.mxu0 %v11439_v7 }
 0x2b8   : > { %9924 = vmatprep.subr.bf16.mxu0 %v11440_v43 }
 0x2bb   : > { %9925 = vmatpush3.bf16.msra.mxu0 %v11440_v43 }
 0x2be   : > { %9927 = vmatmul.mubr.bf16.vlgmr.msra.gmra.mrb[0].mxu0 %v12437_v16 }
 0x2bf   : > { %9930 = vmatprep.mubr.bf16.mxu0 %v12446_v42  ;;  %v11441_v42 = vld [vmem:[#allocation12 + $0x280] sm:$0xff]  }
 0x2c0   : > { %9934 = vmatprep.subr.bf16.mxu1 %v11441_v42 }
 0x2c1   : > { %9935 = vmatpush3.bf16.msra.mxu1 %v11441_v42 }
 0x2c2   : > { %9936 = vmatprep.subr.bf16.mxu1 %v11442_v54 }
 0x2c5   : > { %9937 = vmatpush3.bf16.msra.mxu1 %v11442_v54 }
 0x2c6   : > { %9931 = vmatmul.mubr.bf16.gmra.mrb[4].mxu0 %v2167_v5  ;;  %9938 = vmatprep.subr.bf16.mxu1 %v11443_v56  ;;  %v8657_v5 = vclamps-f32 %v11172_v29, 127.0 }
 0x2c8   : > { %v12543_v11 = vmul.f32 0.07874016, %v8657_v5 }
 0x2c9   : > { %9939 = vmatpush3.bf16.msra.mxu1 %v11443_v56 }
 0x2ca   : > { %9940 = vmatprep.subr.bf16.mxu1 %v11444_v57 }
 0x2cd   : > { %9941 = vmatpush3.bf16.msra.mxu1 %v11444_v57  ;;  %v2408_v57 = vmul.f32 0.07874016, %v8653_v31 }
 0x2ce   : > { %9942 = vmatprep.subr.bf16.mxu1 %v11445_v59 }
 0x2d1   : > { %9943 = vmatpush3.bf16.msra.mxu1 %v11445_v59  ;;  %v8655_v59 = vclamps-f32 %v11170_v4, 127.0 }
 0x2d2   : > { %9944 = vmatprep.subr.bf16.mxu1 %v11446_v62 }
 0x2d5   : > { %9945 = vmatpush3.bf16.msra.mxu1 %v11446_v62 }
 0x2d6   : > { %9946 = vmatprep.subr.bf16.mxu1 %v11447_v0 }
 0x2d9   : > { %9947 = vmatpush3.bf16.msra.mxu1 %v11447_v0 }
 0x2da   : > { %9948 = vmatprep.subr.bf16.mxu1 %v11448_v30 }
 0x2dd   : > { %9949 = vmatpush3.bf16.msra.mxu1 %v11448_v30  ;;  %v2406_v30 = vmul.f32 0.07874016, %v8651_v35 }
 0x2de   : > { %9958 = vmatprep.subr.bf16.mxu1 %v12528_v37 }
 0x2ea   : > { %v12512_v44 = vpop.f32.mrb[16].mxu1 }
 0x2eb   : > { %v12514_v46 = vpop.f32.mrb[17].mxu1 }
 0x2ec   : > { %v12516_v47 = vpop.f32.mrb[18].mxu1 }
 0x2ed   : > { %v12518_v49 = vpop.f32.mrb[19].mxu1 }
 0x2f3   : > { %v12520_v51 = vpop.f32.mrb[20].mxu1 }
 0x2f4   : > { %v12522_v52 = vpop.f32.mrb[21].mxu1 }
 0x2f5   : > { %v12524_v53 = vpop.f32.mrb[22].mxu1 }
 0x2f6   : > { %v12526_v16 = vpop.f32.mrb[23].mxu1 }
 0x391   : > { %v9928_v32 = vpop.f32.mrb[0].mxu0 }
 0x392   : > { %v10814_v36 = vadd.f32 %v9928_v32, %v12512_v44  ;;  %v2267_v38 = vpop.f32.mrb[1].mxu0  ;;  %v8658_v44 = vclamps-f32 %v11173_v48, 127.0 }
 0x393   : > { %v10815_v7 = vadd.f32 %v2267_v38, %v12514_v46  ;;  %v9929_v43 = vpop.f32.mrb[2].mxu0 }
 0x394   : > { %v2314_v42 = vmul.f32 %v10814_v36, %v8641_v33  ;;  %v10816_v54 = vadd.f32 %v9929_v43, %v12516_v47  ;;  %v2270_v56 = vpop.f32.mrb[3].mxu0  ;;  %v12545_v47 = vmul.f32 0.07874016, %v8655_v59  ;;  %v12547_v22 = vmul.f32 0.07874016, %v8658_v44 }
 0x395   : > { %v2312_v62 = vmul.f32 %v10815_v7, %v8641_v33  ;;  %v10817_v0 = vadd.f32 %v2270_v56, %v12518_v49 }
 0x396   : > { %v2327_v50 = vadd.f32 %v8642_v40, %v2314_v42  ;;  %v2315_v34 = vmul.f32 %v10816_v54, %v8641_v33 }
 0x397   : > { %v2325_v8 = vadd.f32 %v8642_v40, %v2312_v62  ;;  %v2313_v46 = vmul.f32 %v10817_v0, %v8641_v33 }
 0x398   : > { %v2336_v12 = vmul.f32 12.7, %v2327_v50  ;;  %v2328_v15 = vadd.f32 %v8642_v40, %v2315_v34 }
 0x399   : > { %v2334_v17 = vmul.f32 12.7, %v2325_v8  ;;  %v2326_v20 = vadd.f32 %v8642_v40, %v2313_v46  ;;  %v9932_v21 = vpop.f32.mrb[4].mxu0 }
 0x39a   : > { %v11160_v49 = vround.rtne.f32 %v2336_v12  ;;  %v2337_v2 = vmul.f32 12.7, %v2328_v15  ;;  %v10818_v3 = vadd.f32 %v9932_v21, %v12520_v51  ;;  %v2283_v13 = vpop.f32.mrb[5].mxu0 }
 0x39b   : > { %v11158_v25 = vround.rtne.f32 %v2334_v17  ;;  %v2335_v18 = vmul.f32 12.7, %v2326_v20  ;;  %v10819_v45 = vadd.f32 %v2283_v13, %v12522_v52  ;;  %v9933_v19 = vpop.f32.mrb[6].mxu0 }
 0x39c   : > { %v8645_v58 = vclamps-f32 %v11160_v49, 127.0  ;;  %v11161_v23 = vround.rtne.f32 %v2337_v2  ;;  %v2318_v63 = vmul.f32 %v10818_v3, %v8641_v33  ;;  %v10820_v24 = vadd.f32 %v9933_v19, %v12524_v53  ;;  %v2286_v26 = vpop.f32.mrb[7].mxu0 }
 0x39d   : > { %v8643_v61 = vclamps-f32 %v11158_v25, 127.0  ;;  %v11159_v27 = vround.rtne.f32 %v2335_v18  ;;  %v2316_v28 = vmul.f32 %v10819_v45, %v8641_v33  ;;  %v10821_v1 = vadd.f32 %v2286_v26, %v12526_v16 }
 0x39e   : > { %v2368_v51 = vmul.f32 0.07874016, %v8645_v58  ;;  %v8646_v29 = vclamps-f32 %v11161_v23, 127.0  ;;  %v2331_v31 = vadd.f32 %v8642_v40, %v2318_v63  ;;  %v2319_v4 = vmul.f32 %v10820_v24, %v8641_v33 }
 0x39f   : > { %v2366_v32 = vmul.f32 0.07874016, %v8643_v61  ;;  %v8644_v35 = vclamps-f32 %v11159_v27, 127.0  ;;  %v2329_v48 = vadd.f32 %v8642_v40, %v2316_v28  ;;  %v2317_v52 = vmul.f32 %v10821_v1, %v8641_v33 }
 0x3a0   : > { %v2416_v36 = vadd.f32 %v2408_v57, %v2368_v51  ;;  %v2369_v38 = vmul.f32 0.07874016, %v8646_v29  ;;  %v2340_v39 = vmul.f32 12.7, %v2331_v31  ;;  %v2332_v41 = vadd.f32 %v8642_v40, %v2319_v4  ;;  %v2508_v29 = vld [vmem:[#allocation3 + $0x1] sm:$0xff] }
 0x3a1   : > { %v2414_v7 = vadd.f32 %v2406_v30, %v2366_v32  ;;  %v2367_v53 = vmul.f32 0.07874016, %v8644_v35  ;;  %v2338_v43 = vmul.f32 12.7, %v2329_v48  ;;  %v2330_v60 = vadd.f32 %v8642_v40, %v2317_v52 }
 0x3a2   : > { %v2424_v5 = vmax.f32 %v2416_v36, 0.0  ;;  %v2417_v42 = vadd.f32 %v2409_v55, %v2369_v38  ;;  %v11164_v54 = vround.rtne.f32 %v2340_v39  ;;  %v2341_v16 = vmul.f32 12.7, %v2332_v41 }
 0x3a3   : > { %v2422_v56 = vmax.f32 %v2414_v7, 0.0  ;;  %v2415_v59 = vadd.f32 %v2407_v9, %v2367_v53  ;;  %v11162_v62 = vround.rtne.f32 %v2338_v43  ;;  %v2339_v0 = vmul.f32 12.7, %v2330_v60 }
 0x3a4   : > { %v2432_v44 = vmul.f32 2.0, %v2424_v5  ;;  %v2425_v50 = vmax.f32 %v2417_v42, 0.0  ;;  %v8649_v34 = vclamps-f32 %v11164_v54, 127.0  ;;  %v11165_v33 = vround.rtne.f32 %v2341_v16  ;;  %v11450_v5 = vld [vmem:[#allocation12 + $0x248] sm:$0xff]  }
 0x3a5   : > { %v2430_v57 = vmul.f32 2.0, %v2422_v56  ;;  %v2423_v6 = vmax.f32 %v2415_v59, 0.0  ;;  %v8647_v8 = vclamps-f32 %v11162_v62, 127.0  ;;  %v11163_v46 = vround.rtne.f32 %v2339_v0 }
 0x3a6   : > { %v11176_v30 = vround.rtne.f32 %v2432_v44  ;;  %v2433_v12 = vmul.f32 2.0, %v2425_v50  ;;  %v2372_v15 = vmul.f32 0.07874016, %v8649_v34  ;;  %v8650_v40 = vclamps-f32 %v11165_v33, 127.0  ;;  %v11451_v34 = vld [vmem:[#allocation12 + $0x250] sm:$0xff]  }
 0x3a7   : > { %v11174_v17 = vround.rtne.f32 %v2430_v57  ;;  %v2431_v55 = vmul.f32 2.0, %v2423_v6  ;;  %v2370_v20 = vmul.f32 0.07874016, %v8647_v8  ;;  %v8648_v21 = vclamps-f32 %v11163_v46, 127.0 }
 0x3a8   : > { %v2448_v49 = vmax.f32 %v11176_v30, 0.0  ;;  %v11177_v9 = vround.rtne.f32 %v2433_v12  ;;  %v2420_v2 = vadd.f32 %v12543_v11, %v2372_v15  ;;  %v2373_v3 = vmul.f32 0.07874016, %v8650_v40  ;;  %v11452_v30 = vld [vmem:[#allocation12 + $0x258] sm:$0xff]   ;;  %v11453_v40 = vld [vmem:[#allocation12 + $0x260] sm:$0xff]  }
 0x3a9   : > { %v2446_v13 = vmax.f32 %v11174_v17, 0.0  ;;  %v11175_v25 = vround.rtne.f32 %v2431_v55  ;;  %v2418_v18 = vadd.f32 %v12545_v47, %v2370_v20  ;;  %v2371_v45 = vmul.f32 0.07874016, %v8648_v21  ;;  %v11454_v17 = vld [vmem:[#allocation12 + $0x268] sm:$0xff]   ;;  %v11455_v55 = vld [vmem:[#allocation12 + $0x270] sm:$0xff]   ;;  %v11456_v20 = vld [vmem:[#allocation12 + $0x278] sm:$0xff]  }
 0x3aa   : > { %v2456_v19 = vmin.f32 %v2448_v49, 3.0  ;;  %v2449_v58 = vmax.f32 %v11177_v9, 0.0  ;;  %v2428_v23 = vmax.f32 %v2420_v2, 0.0  ;;  %v2421_v63 = vadd.f32 %v12547_v22, %v2373_v3 }
 0x3ab   : > { %v2454_v24 = vmin.f32 %v2446_v13, 3.0  ;;  %v2447_v26 = vmax.f32 %v11175_v25, 0.0  ;;  %v2426_v61 = vmax.f32 %v2418_v18, 0.0  ;;  %v2419_v27 = vadd.f32 %v12550_v14, %v2371_v45  ;;  %v11458_v13 = vld [vmem:[#allocation12 + $0x2c8] sm:$0xff]   ;;  %v11459_v18 = vld [vmem:[#allocation12 + $0x2d0] sm:$0xff]  }
 0x3ac   : > { %v12559_v28 = vmul.f32 0.5, %v2456_v19  ;;  %v2457_v1 = vmin.f32 %v2449_v58, 3.0  ;;  %v2436_v11 = vmul.f32 2.0, %v2428_v23  ;;  %v2429_v51 = vmax.f32 %v2421_v63, 0.0  ;;  %v2763_v19 = vld [vmem:[#allocation3 + $0x2] sm:$0xff] }
 0x3ad   : > { %v12561_v31 = vmul.f32 0.5, %v2454_v24  ;;  %v2455_v47 = vmin.f32 %v2447_v26, 3.0  ;;  %v2434_v4 = vmul.f32 2.0, %v2426_v61  ;;  %v2427_v32 = vmax.f32 %v2419_v27, 0.0  ;;  %v11460_v24 = vld [vmem:[#allocation12 + $0x2d8] sm:$0xff]   ;;  %v11461_v61 = vld [vmem:[#allocation12 + $0x2e0] sm:$0xff]  }
 0x3ae   : > { %2473 = vst [vmem:[#allocation3 + $0x31] sm:$0xff] %v12559_v28  ;;  %v12564_v35 = vmul.f32 0.5, %v2457_v1  ;;  %v11180_v22 = vround.rtne.f32 %v2436_v11  ;;  %v2437_v48 = vmul.f32 2.0, %v2429_v51  ;;  %v11462_v27 = vld [vmem:[#allocation12 + $0x2e8] sm:$0xff]   ;;  %v11463_v1 = vld [vmem:[#allocation12 + $0x2f0] sm:$0xff]   ;;  %v11464_v11 = vld [vmem:[#allocation12 + $0x2f8] sm:$0xff]  }
 0x3af   : > { %2471 = vst [vmem:[#allocation3 + $0x11] sm:$0xff] %v12561_v31  ;;  %v12567_v14 = vmul.f32 0.5, %v2455_v47  ;;  %v11178_v52 = vround.rtne.f32 %v2434_v4  ;;  %v2435_v36 = vmul.f32 2.0, %v2427_v32  ;;  %v2516_v38 = vpack.c.bf16 %v12561_v31, %v2508_v29  ;;  %v11465_v51 = vld [vmem:[#allocation12 + $0x300] sm:$0xff]  }
 0x3b0   : > { %2474 = vst [vmem:[#allocation3 + $0x41] sm:$0xff] %v12564_v35  ;;  %v2452_v39 = vmax.f32 %v11180_v22, 0.0  ;;  %v11181_v41 = vround.rtne.f32 %v2437_v48  ;;  %v3072_v7 = vpack.c.bf16 %v12564_v35, %v12559_v28  ;;  %v11466_v48 = vld [vmem:[#allocation12 + $0x308] sm:$0xff]  }
 0x3b1   : > { %2472 = vst [vmem:[#allocation3 + $0x21] sm:$0xff] %v12567_v14  ;;  %v2450_v53 = vmax.f32 %v11178_v52, 0.0  ;;  %v11179_v43 = vround.rtne.f32 %v2435_v36  ;;  %9950 = vmatprep.mubr.bf16.mxu1 %v2516_v38  ;;  %v2517_v60 = vpack.c.bf16 %v12559_v28, %v12567_v14  ;;  %v3071_v42 = vpack.c.bf16 %v12567_v14, %v12561_v31  ;;  %v11467_v36 = vld [vmem:[#allocation12 + $0x310] sm:$0xff]   ;;  %v11485_v28 = vld [vmem:[#allocation12 + $0x3a0] sm:$0xff]  }
 0x3b2   : > { %v2460_v54 = vmin.f32 %v2452_v39, 3.0  ;;  %v2453_v16 = vmax.f32 %v11181_v41, 0.0  ;;  %v11483_v31 = vld [vmem:[#allocation12 + $0x390] sm:$0xff]  }
 0x3b3   : > { %v2458_v56 = vmin.f32 %v2450_v53, 3.0  ;;  %v2451_v59 = vmax.f32 %v11179_v43, 0.0  ;;  %9951 = vmatmul.mubr.bf16.vlgmr.msra.gmra.mrb[24].mxu1 %v2517_v60  ;;  %v11468_v53 = vld [vmem:[#allocation12 + $0x318] sm:$0xff]   ;;  %v11469_v60 = vld [vmem:[#allocation12 + $0x320] sm:$0xff]  }
 0x3b4   : > { %v12578_v62 = vmul.f32 0.5, %v2460_v54  ;;  %v2461_v0 = vmin.f32 %v2453_v16, 3.0  ;;  %9959 = vmatpush3.bf16.msra.mxu1 %v12528_v37  ;;  %v11471_v54 = vld [vmem:[#allocation12 + $0x330] sm:$0xff]   ;;  %v11472_v16 = vld [vmem:[#allocation12 + $0x338] sm:$0xff]  }
 0x3b5   : > { %v12581_v44 = vmul.f32 0.5, %v2458_v56  ;;  %v2459_v50 = vmin.f32 %v2451_v59, 3.0  ;;  %9960 = vmatprep.subr.bf16.mxu1 %v11450_v5  ;;  %v12610_v9 = vld [vmem:[#allocation3 + $0x30] sm:$0xff]  ;;  %v11473_v56 = vld [vmem:[#allocation12 + $0x340] sm:$0xff]  }
 0x3b6   : > { %2477 = vst [vmem:[#allocation3 + $0x71] sm:$0xff] %v12578_v62  ;;  %v12584_v33 = vmul.f32 0.5, %v2461_v0  ;;  %v12591_v8 = vld [vmem:[#allocation3 + $0x10] sm:$0xff]  ;;  %v11474_v0 = vld [vmem:[#allocation12 + $0x348] sm:$0xff]  }
 0x3b7   : > { %2475 = vst [vmem:[#allocation3 + $0x51] sm:$0xff] %v12581_v44  ;;  %v12587_v57 = vmul.f32 0.5, %v2459_v50  ;;  %v2518_v6 = vpack.c.bf16 %v12581_v44, %v12564_v35  ;;  %v2487_v12 = vpack.c.bf16 %v12591_v8, %v12427_v10  ;;  %v11457_v10 = vld [vmem:[#allocation12 + $0x2c0] sm:$0xff]   ;;  %v12626_v58 = vld [vmem:[#allocation3 + $0x12] sm:$0xff]  ;;  %v11486_v35 = vld [vmem:[#allocation12 + $0x3a8] sm:$0xff]  }
 0x3b8   : > { %2478 = vst [vmem:[#allocation3 + $0x81] sm:$0xff] %v12584_v33  ;;  %9961 = vmatpush3.bf16.msra.mxu1 %v11450_v5  ;;  %v3074_v37 = vpack.c.bf16 %v12584_v33, %v12578_v62  ;;  %v12606_v21 = vld [vmem:[#allocation3 + $0x20] sm:$0xff]  ;;  %v2771_v26 = vpack.c.bf16 %v12626_v58, %v2763_v19  ;;  %v12640_v4 = vld [vmem:[#allocation3 + $0x32] sm:$0xff]  ;;  %v11470_v5 = vld [vmem:[#allocation12 + $0x328] sm:$0xff]  }
 0x3b9   : > { %2476 = vst [vmem:[#allocation3 + $0x61] sm:$0xff] %v12587_v57  ;;  %9954 = vmatprep.mubr.bf16.mxu1 %v2518_v6  ;;  %9962 = vmatprep.subr.bf16.mxu1 %v11451_v34  ;;  %v12599_v46 = vpack.c.bf16 %v12578_v62, %v12587_v57  ;;  %v3073_v15 = vpack.c.bf16 %v12587_v57, %v12581_v44  ;;  %v12616_v3 = vld [vmem:[#allocation3 + $0x40] sm:$0xff]  ;;  %v11488_v57 = vld [vmem:[#allocation12 + $0x3b8] sm:$0xff]  }
 0x3ba   : > { %v12614_v2 = vpack.c.bf16 %v12610_v9, %v12606_v21  ;;  %v12636_v29 = vld [vmem:[#allocation3 + $0x22] sm:$0xff]  ;;  %v2921_v43 = vpack.c.bf16 %v12606_v21, %v12591_v8  ;;  %v2922_v59 = vpack.c.bf16 %v12616_v3, %v12610_v9 }
 0x3bb   : > { %9955 = vmatmul.mubr.bf16.gmra.mrb[28].mxu1 %v12599_v46  ;;  %v12644_v32 = vpack.c.bf16 %v12640_v4, %v12636_v29  ;;  %v12646_v22 = vld [vmem:[#allocation3 + $0x42] sm:$0xff]  ;;  %v3221_v21 = vpack.c.bf16 %v12636_v29, %v12626_v58 }
 0x3bc   : > { %9963 = vmatpush3.bf16.msra.mxu1 %v11451_v34  ;;  %9974 = vmatprep.mubr.bf16.mxu1 %v2487_v12  ;;  %v11475_v34 = vld [vmem:[#allocation12 + $0x350] sm:$0xff]   ;;  %v11477_v12 = vld [vmem:[#allocation12 + $0x360] sm:$0xff]   ;;  %v11494_v58 = vld [vmem:[#allocation12 + $0x3e8] sm:$0xff]  }
 0x3bd   : > { %9964 = vmatprep.subr.bf16.mxu1 %v11452_v30  ;;  %v12628_v23 = vld [vmem:[#allocation3 + $0x70] sm:$0xff]  ;;  %v11489_v62 = vld [vmem:[#allocation12 + $0x3c0] sm:$0xff]  }
 0x3be   : > { %v12608_v49 = vld [vmem:[#allocation3 + $0x50] sm:$0xff]  ;;  %v11493_v19 = vld [vmem:[#allocation12 + $0x3e0] sm:$0xff]  }
 0x3bf   : > { %v12620_v25 = vpack.c.bf16 %v12608_v49, %v12616_v3  ;;  %v12638_v47 = vld [vmem:[#allocation3 + $0x52] sm:$0xff]  ;;  %v12669_v6 = vld [vmem:[#allocation3 + $0x80] sm:$0xff] }
 0x3c0   : > { %9965 = vmatpush3.bf16.msra.mxu1 %v11452_v30  ;;  %v12624_v45 = vld [vmem:[#allocation3 + $0x60] sm:$0xff]  ;;  %v12650_v52 = vpack.c.bf16 %v12638_v47, %v12646_v22  ;;  %v12656_v39 = vld [vmem:[#allocation3 + $0x72] sm:$0xff]  ;;  %v2924_v8 = vpack.c.bf16 %v12669_v6, %v12628_v23 }
 0x3c1   : > { %9966 = vmatprep.subr.bf16.mxu1 %v11453_v40  ;;  %v12632_v63 = vpack.c.bf16 %v12628_v23, %v12624_v45  ;;  %v12654_v38 = vld [vmem:[#allocation3 + $0x62] sm:$0xff]  ;;  %v2923_v50 = vpack.c.bf16 %v12624_v45, %v12608_v49  ;;  %v11476_v30 = vld [vmem:[#allocation12 + $0x358] sm:$0xff]   ;;  %v11491_v3 = vld [vmem:[#allocation12 + $0x3d0] sm:$0xff]  }
 0x3c2   : > { %v12660_v41 = vpack.c.bf16 %v12656_v39, %v12654_v38  ;;  %v11513_v49 = vld [vmem:[#allocation12 + $0x4c0] sm:$0xff]   ;;  %v3223_v9 = vpack.c.bf16 %v12654_v38, %v12638_v47  ;;  %v11492_v45 = vld [vmem:[#allocation12 + $0x3d8] sm:$0xff]   ;;  %v11495_v23 = vld [vmem:[#allocation12 + $0x3f0] sm:$0xff]  }
 0x3c3   : > { %10150 = vmatprep.subr.bf16.mxu0 %v11513_v49  ;;  %v11503_v47 = vld [vmem:[#allocation12 + $0x430] sm:$0xff]  }
 0x3c4   : > { %9967 = vmatpush3.bf16.msra.mxu1 %v11453_v40  ;;  %v11478_v40 = vld [vmem:[#allocation12 + $0x368] sm:$0xff]   ;;  %10151 = vmatpush3.bf16.msra.mxu0 %v11513_v49  ;;  %v11507_v38 = vld [vmem:[#allocation12 + $0x450] sm:$0xff]  }
 0x3c5   : > { %9968 = vmatprep.subr.bf16.mxu1 %v11454_v17 }
 0x3c8   : > { %9969 = vmatpush3.bf16.msra.mxu1 %v11454_v17  ;;  %v11479_v17 = vld [vmem:[#allocation12 + $0x370] sm:$0xff]  }
 0x3c9   : > { %9970 = vmatprep.subr.bf16.mxu1 %v11455_v55 }
 0x3cc   : > { %9971 = vmatpush3.bf16.msra.mxu1 %v11455_v55  ;;  %v11480_v55 = vld [vmem:[#allocation12 + $0x378] sm:$0xff]  }
 0x3cd   : > { %9972 = vmatprep.subr.bf16.mxu1 %v11456_v20 }
 0x3d0   : > { %9973 = vmatpush3.bf16.msra.mxu1 %v11456_v20  ;;  %v11481_v20 = vld [vmem:[#allocation12 + $0x380] sm:$0xff]  }
 0x3d1   : > { %9982 = vmatprep.subr.bf16.mxu1 %v11457_v10 }
 0x3d3   : > { %9975 = vmatmul.mubr.bf16.vlgmr.msra.gmra.mrb[24].mxu1 %v12614_v2 }
 0x3d4   : > { %9978 = vmatprep.mubr.bf16.mxu1 %v12620_v25  ;;  %9983 = vmatpush3.bf16.msra.mxu1 %v11457_v10  ;;  %v11482_v10 = vld [vmem:[#allocation12 + $0x388] sm:$0xff]  }
 0x3d5   : > { %9984 = vmatprep.subr.bf16.mxu1 %v11458_v13 }
 0x3d8   : > { %9985 = vmatpush3.bf16.msra.mxu1 %v11458_v13  ;;  %v12691_v13 = vld [vmem:[#allocation3 + $0x82] sm:$0xff] }
 0x3d9   : > { %9986 = vmatprep.subr.bf16.mxu1 %v11459_v18 }
 0x3db   : > { %9979 = vmatmul.mubr.bf16.gmra.mrb[28].mxu1 %v12632_v63 }
 0x3dc   : > { %9987 = vmatpush3.bf16.msra.mxu1 %v11459_v18  ;;  %9998 = vmatprep.mubr.bf16.mxu1 %v2771_v26  ;;  %v3224_v18 = vpack.c.bf16 %v12691_v13, %v12656_v39  ;;  %v11497_v26 = vld [vmem:[#allocation12 + $0x400] sm:$0xff]   ;;  %v3521_v39 = vld [vmem:[#allocation3 + $0x91] sm:$0xff] }
 0x3dd   : > { %9988 = vmatprep.subr.bf16.mxu1 %v11460_v24 }
 0x3e0   : > { %9989 = vmatpush3.bf16.msra.mxu1 %v11460_v24  ;;  %v11496_v24 = vld [vmem:[#allocation12 + $0x3f8] sm:$0xff]  }
 0x3e1   : > { %9990 = vmatprep.subr.bf16.mxu1 %v11461_v61 }
 0x3e4   : > { %9991 = vmatpush3.bf16.msra.mxu1 %v11461_v61  ;;  %v11498_v61 = vld [vmem:[#allocation12 + $0x408] sm:$0xff]  }
 0x3e5   : > { %9992 = vmatprep.subr.bf16.mxu1 %v11462_v27 }
 0x3e8   : > { %9993 = vmatpush3.bf16.msra.mxu1 %v11462_v27  ;;  %v3515_v27 = vld [vmem:[#allocation3 + $0x31] sm:$0xff] }
 0x3e9   : > { %9994 = vmatprep.subr.bf16.mxu1 %v11463_v1  ;;  %v3522_v29 = vpack.c.bf16 %v3515_v27, %v12567_v14 }
 0x3ec   : > { %9995 = vmatpush3.bf16.msra.mxu1 %v11463_v1  ;;  %v12698_v1 = vld [vmem:[#allocation2] sm:$0xff] }
 0x3ed   : > { %9996 = vmatprep.subr.bf16.mxu1 %v11464_v11 }
 0x3f0   : > { %9997 = vmatpush3.bf16.msra.mxu1 %v11464_v11  ;;  %v3375_v11 = vpack.c.bf16 %v12698_v1, %v12669_v6 }
 0x3f1   : > { %10006 = vmatprep.subr.bf16.mxu1 %v11465_v51 }
 0x3f3   : > { %9999 = vmatmul.mubr.bf16.vlgmr.msra.gmra.mrb[24].mxu1 %v12644_v32 }
 0x3f4   : > { %10002 = vmatprep.mubr.bf16.mxu1 %v12650_v52  ;;  %10007 = vmatpush3.bf16.msra.mxu1 %v11465_v51  ;;  %v11500_v51 = vld [vmem:[#allocation12 + $0x418] sm:$0xff]  }
 0x3f5   : > { %10008 = vmatprep.subr.bf16.mxu1 %v11466_v48 }
 0x3f8   : > { %10009 = vmatpush3.bf16.msra.mxu1 %v11466_v48  ;;  %v3516_v48 = vld [vmem:[#allocation3 + $0x41] sm:$0xff] }
 0x3f9   : > { %10010 = vmatprep.subr.bf16.mxu1 %v11467_v36  ;;  %v3523_v14 = vpack.c.bf16 %v12581_v44, %v3516_v48  ;;  %v11509_v44 = vld [vmem:[#allocation12 + $0x460] sm:$0xff]  }
 0x3fb   : > { %10003 = vmatmul.mubr.bf16.gmra.mrb[28].mxu1 %v12660_v41 }
 0x3fc   : > { %10011 = vmatpush3.bf16.msra.mxu1 %v11467_v36  ;;  %10022 = vmatprep.mubr.bf16.mxu1 %v2921_v43  ;;  %v11506_v36 = vld [vmem:[#allocation12 + $0x448] sm:$0xff]   ;;  %v11508_v43 = vld [vmem:[#allocation12 + $0x458] sm:$0xff]  }
 0x3fd   : > { %10012 = vmatprep.subr.bf16.mxu1 %v11468_v53 }
 0x400   : > { %10013 = vmatpush3.bf16.msra.mxu1 %v11468_v53  ;;  %v3525_v53 = vpack.c.bf16 %v3521_v39, %v12584_v33  ;;  %v3671_v33 = vld [vmem:[#allocation3 + $0x92] sm:$0xff] }
 0x401   : > { %10014 = vmatprep.subr.bf16.mxu1 %v11469_v60 }
 0x404   : > { %10015 = vmatpush3.bf16.msra.mxu1 %v11469_v60  ;;  %v11510_v60 = vld [vmem:[#allocation12 + $0x468] sm:$0xff]  }
 0x405   : > { %10016 = vmatprep.subr.bf16.mxu1 %v11470_v5 }
 0x408   : > { %10017 = vmatpush3.bf16.msra.mxu1 %v11470_v5  ;;  %v11512_v5 = vld [vmem:[#allocation12 + $0x478] sm:$0xff]  }
 0x409   : > { %10018 = vmatprep.subr.bf16.mxu1 %v11471_v54 }
 0x40c   : > { %10019 = vmatpush3.bf16.msra.mxu1 %v11471_v54  ;;  %v11514_v54 = vld [vmem:[#allocation12 + $0x4c8] sm:$0xff]  }
 0x40d   : > { %10020 = vmatprep.subr.bf16.mxu1 %v11472_v16  ;;  %10152 = vmatprep.subr.bf16.mxu0 %v11514_v54 }
 0x40e   : > { %10153 = vmatpush3.bf16.msra.mxu0 %v11514_v54 }
 0x410   : > { %10021 = vmatpush3.bf16.msra.mxu1 %v11472_v16  ;;  %v11515_v16 = vld [vmem:[#allocation12 + $0x4d0] sm:$0xff]  }
 0x411   : > { %10030 = vmatprep.subr.bf16.mxu1 %v11473_v56  ;;  %10154 = vmatprep.subr.bf16.mxu0 %v11515_v16 }
 0x412   : > { %10155 = vmatpush3.bf16.msra.mxu0 %v11515_v16 }
 0x413   : > { %10023 = vmatmul.mubr.bf16.vlgmr.msra.gmra.mrb[24].mxu1 %v2922_v59  ;;  %v11517_v59 = vld [vmem:[#allocation12 + $0x4e0] sm:$0xff]  }
 0x414   : > { %10026 = vmatprep.mubr.bf16.mxu1 %v2923_v50  ;;  %10031 = vmatpush3.bf16.msra.mxu1 %v11473_v56  ;;  %v11516_v56 = vld [vmem:[#allocation12 + $0x4d8] sm:$0xff]   ;;  %v12710_v50 = vld [vmem:[#allocation12 + $0x480] sm:$0xff]  }
 0x415   : > { %10032 = vmatprep.subr.bf16.mxu1 %v11474_v0  ;;  %10156 = vmatprep.subr.bf16.mxu0 %v11516_v56 }
 0x416   : > { %10157 = vmatpush3.bf16.msra.mxu0 %v11516_v56 }
 0x417   : > { %10158 = vmatprep.subr.bf16.mxu0 %v11517_v59 }
 0x418   : > { %10033 = vmatpush3.bf16.msra.mxu1 %v11474_v0  ;;  %v11518_v0 = vld [vmem:[#allocation12 + $0x4e8] sm:$0xff]  }
 0x419   : > { %10034 = vmatprep.subr.bf16.mxu1 %v11475_v34 }
 0x41a   : > { %10159 = vmatpush3.bf16.msra.mxu0 %v11517_v59 }
 0x41b   : > { %10027 = vmatmul.mubr.bf16.gmra.mrb[28].mxu1 %v2924_v8  ;;  %10160 = vmatprep.subr.bf16.mxu0 %v11518_v0  ;;  %v8732_v8 = vld [vmem:[#allocation13 + $0x5] ss:$0 sm:$0xff] }
 0x41c   : > { %10035 = vmatpush3.bf16.msra.mxu1 %v11475_v34  ;;  %10046 = vmatprep.mubr.bf16.mxu1 %v3071_v42  ;;  %v11484_v42 = vld [vmem:[#allocation12 + $0x398] sm:$0xff]   ;;  %v8731_v34 = vld [vmem:[#allocation13 + $0x4] ss:$0 sm:$0xff] }
 0x41d   : > { %10036 = vmatprep.subr.bf16.mxu1 %v11476_v30 }
 0x41e   : > { %10161 = vmatpush3.bf16.msra.mxu0 %v11518_v0 }
 0x420   : > { %10037 = vmatpush3.bf16.msra.mxu1 %v11476_v30 }
 0x421   : > { %10038 = vmatprep.subr.bf16.mxu1 %v11477_v12 }
 0x424   : > { %10039 = vmatpush3.bf16.msra.mxu1 %v11477_v12 }
 0x425   : > { %10040 = vmatprep.subr.bf16.mxu1 %v11478_v40 }
 0x428   : > { %10041 = vmatpush3.bf16.msra.mxu1 %v11478_v40 }
 0x429   : > { %10042 = vmatprep.subr.bf16.mxu1 %v11479_v17 }
 0x42c   : > { %10043 = vmatpush3.bf16.msra.mxu1 %v11479_v17 }
 0x42d   : > { %10044 = vmatprep.subr.bf16.mxu1 %v11480_v55 }
 0x430   : > { %10045 = vmatpush3.bf16.msra.mxu1 %v11480_v55 }
 0x431   : > { %10054 = vmatprep.subr.bf16.mxu1 %v11481_v20 }
 0x433   : > { %10047 = vmatmul.mubr.bf16.vlgmr.msra.gmra.mrb[24].mxu1 %v3072_v7  ;;  %v11487_v7 = vld [vmem:[#allocation12 + $0x3b0] sm:$0xff]  }
 0x434   : > { %10050 = vmatprep.mubr.bf16.mxu1 %v3073_v15  ;;  %10055 = vmatpush3.bf16.msra.mxu1 %v11481_v20  ;;  %v11490_v15 = vld [vmem:[#allocation12 + $0x3c8] sm:$0xff]  }
 0x435   : > { %10056 = vmatprep.subr.bf16.mxu1 %v11482_v10 }
 0x438   : > { %10057 = vmatpush3.bf16.msra.mxu1 %v11482_v10 }
 0x439   : > { %10058 = vmatprep.subr.bf16.mxu1 %v11483_v31 }
 0x43b   : > { %10051 = vmatmul.mubr.bf16.gmra.mrb[28].mxu1 %v3074_v37  ;;  %v3222_v37 = vpack.c.bf16 %v12646_v22, %v12640_v4  ;;  %v11504_v4 = vld [vmem:[#allocation12 + $0x438] sm:$0xff]   ;;  %v11505_v22 = vld [vmem:[#allocation12 + $0x440] sm:$0xff]  }
 0x43c   : > { %10059 = vmatpush3.bf16.msra.mxu1 %v11483_v31  ;;  %10070 = vmatprep.mubr.bf16.mxu1 %v3221_v21 }
 0x43d   : > { %10060 = vmatprep.subr.bf16.mxu1 %v11484_v42 }
 0x440   : > { %10061 = vmatpush3.bf16.msra.mxu1 %v11484_v42 }
 0x441   : > { %10062 = vmatprep.subr.bf16.mxu1 %v11485_v28 }
 0x444   : > { %10063 = vmatpush3.bf16.msra.mxu1 %v11485_v28 }
 0x445   : > { %10064 = vmatprep.subr.bf16.mxu1 %v11486_v35 }
 0x448   : > { %10065 = vmatpush3.bf16.msra.mxu1 %v11486_v35 }
 0x449   : > { %10066 = vmatprep.subr.bf16.mxu1 %v11487_v7 }
 0x44c   : > { %10067 = vmatpush3.bf16.msra.mxu1 %v11487_v7 }
 0x44d   : > { %10068 = vmatprep.subr.bf16.mxu1 %v11488_v57 }
 0x450   : > { %10069 = vmatpush3.bf16.msra.mxu1 %v11488_v57 }
 0x451   : > { %10078 = vmatprep.subr.bf16.mxu1 %v11489_v62 }
 0x453   : > { %10071 = vmatmul.mubr.bf16.vlgmr.msra.gmra.mrb[24].mxu1 %v3222_v37 }
 0x454   : > { %10074 = vmatprep.mubr.bf16.mxu1 %v3223_v9  ;;  %10079 = vmatpush3.bf16.msra.mxu1 %v11489_v62 }
 0x455   : > { %10080 = vmatprep.subr.bf16.mxu1 %v11490_v15 }
 0x458   : > { %10081 = vmatpush3.bf16.msra.mxu1 %v11490_v15 }
 0x459   : > { %10082 = vmatprep.subr.bf16.mxu1 %v11491_v3 }
 0x45b   : > { %10075 = vmatmul.mubr.bf16.gmra.mrb[28].mxu1 %v3224_v18 }
 0x45c   : > { %10083 = vmatpush3.bf16.msra.mxu1 %v11491_v3  ;;  %10094 = vmatprep.mubr.bf16.mxu1 %v12614_v2  ;;  %v11499_v2 = vld [vmem:[#allocation12 + $0x410] sm:$0xff]  }
 0x45d   : > { %10084 = vmatprep.subr.bf16.mxu1 %v11492_v45 }
 0x460   : > { %10085 = vmatpush3.bf16.msra.mxu1 %v11492_v45 }
 0x461   : > { %10086 = vmatprep.subr.bf16.mxu1 %v11493_v19 }
 0x464   : > { %10087 = vmatpush3.bf16.msra.mxu1 %v11493_v19 }
 0x465   : > { %10088 = vmatprep.subr.bf16.mxu1 %v11494_v58 }
 0x468   : > { %10089 = vmatpush3.bf16.msra.mxu1 %v11494_v58 }
 0x469   : > { %10090 = vmatprep.subr.bf16.mxu1 %v11495_v23 }
 0x46c   : > { %10091 = vmatpush3.bf16.msra.mxu1 %v11495_v23 }
 0x46d   : > { %10092 = vmatprep.subr.bf16.mxu1 %v11496_v24 }
 0x470   : > { %10093 = vmatpush3.bf16.msra.mxu1 %v11496_v24 }
 0x471   : > { %10102 = vmatprep.subr.bf16.mxu1 %v11497_v26 }
 0x473   : > { %10095 = vmatmul.mubr.bf16.vlgmr.msra.gmra.mrb[24].mxu1 %v12620_v25  ;;  %v11501_v25 = vld [vmem:[#allocation12 + $0x420] sm:$0xff]  }
 0x474   : > { %10098 = vmatprep.mubr.bf16.mxu1 %v12632_v63  ;;  %10103 = vmatpush3.bf16.msra.mxu1 %v11497_v26  ;;  %v11502_v63 = vld [vmem:[#allocation12 + $0x428] sm:$0xff]  }
 0x475   : > { %10104 = vmatprep.subr.bf16.mxu1 %v11498_v61 }
 0x478   : > { %10105 = vmatpush3.bf16.msra.mxu1 %v11498_v61 }
 0x479   : > { %10106 = vmatprep.subr.bf16.mxu1 %v11499_v2 }
 0x47b   : > { %10099 = vmatmul.mubr.bf16.gmra.mrb[28].mxu1 %v3375_v11 }
 0x47c   : > { %10107 = vmatpush3.bf16.msra.mxu1 %v11499_v2  ;;  %10118 = vmatprep.mubr.bf16.mxu1 %v3522_v29 }
 0x47d   : > { %10108 = vmatprep.subr.bf16.mxu1 %v11500_v51 }
 0x480   : > { %10109 = vmatpush3.bf16.msra.mxu1 %v11500_v51 }
 0x481   : > { %10110 = vmatprep.subr.bf16.mxu1 %v11501_v25 }
 0x484   : > { %10111 = vmatpush3.bf16.msra.mxu1 %v11501_v25 }
 0x485   : > { %10112 = vmatprep.subr.bf16.mxu1 %v11502_v63 }
 0x488   : > { %10113 = vmatpush3.bf16.msra.mxu1 %v11502_v63 }
 0x489   : > { %10114 = vmatprep.subr.bf16.mxu1 %v11503_v47 }
 0x48c   : > { %10115 = vmatpush3.bf16.msra.mxu1 %v11503_v47 }
 0x48d   : > { %10116 = vmatprep.subr.bf16.mxu1 %v11504_v4 }
 0x490   : > { %10117 = vmatpush3.bf16.msra.mxu1 %v11504_v4 }
 0x491   : > { %10126 = vmatprep.subr.bf16.mxu1 %v11505_v22 }
 0x493   : > { %10119 = vmatmul.mubr.bf16.vlgmr.msra.gmra.mrb[24].mxu1 %v3523_v14 }
 0x494   : > { %10122 = vmatprep.mubr.bf16.mxu1 %v12599_v46  ;;  %10127 = vmatpush3.bf16.msra.mxu1 %v11505_v22  ;;  %v11511_v46 = vld [vmem:[#allocation12 + $0x470] sm:$0xff]  }
 0x495   : > { %10128 = vmatprep.subr.bf16.mxu1 %v11506_v36 }
 0x498   : > { %10129 = vmatpush3.bf16.msra.mxu1 %v11506_v36 }
 0x499   : > { %10130 = vmatprep.subr.bf16.mxu1 %v11507_v38 }
 0x49b   : > { %10123 = vmatmul.mubr.bf16.gmra.mrb[28].mxu1 %v3525_v53 }
 0x49c   : > { %10131 = vmatpush3.bf16.msra.mxu1 %v11507_v38  ;;  %10142 = vmatprep.mubr.bf16.mxu1 %v12644_v32  ;;  %v3675_v32 = vpack.c.bf16 %v3671_v33, %v12691_v13 }
 0x49d   : > { %10132 = vmatprep.subr.bf16.mxu1 %v11508_v43 }
 0x4a0   : > { %10133 = vmatpush3.bf16.msra.mxu1 %v11508_v43 }
 0x4a1   : > { %10134 = vmatprep.subr.bf16.mxu1 %v11509_v44 }
 0x4a4   : > { %10135 = vmatpush3.bf16.msra.mxu1 %v11509_v44 }
 0x4a5   : > { %10136 = vmatprep.subr.bf16.mxu1 %v11510_v60 }
 0x4a8   : > { %10137 = vmatpush3.bf16.msra.mxu1 %v11510_v60  ;;  %v3926_v60 = vld [vmem:[#allocation2 + $0x1] sm:$0xff] }
 0x4a9   : > { %10138 = vmatprep.subr.bf16.mxu1 %v11511_v46 }
 0x4ac   : > { %10139 = vmatpush3.bf16.msra.mxu1 %v11511_v46 }
 0x4ad   : > { %10140 = vmatprep.subr.bf16.mxu1 %v11512_v5 }
 0x4b0   : > { %10141 = vmatpush3.bf16.msra.mxu1 %v11512_v5 }
 0x4b3   : > { %10143 = vmatmul.mubr.bf16.vlgmr.msra.gmra.mrb[24].mxu1 %v12650_v52  ;;  %v11519_v52 = vld [vmem:[#allocation12 + $0x4f0] sm:$0xff]  }
 0x4b4   : > { %10146 = vmatprep.mubr.bf16.mxu1 %v12660_v41  ;;  %10162 = vmatprep.subr.bf16.mxu0 %v11519_v52  ;;  %v11520_v41 = vld [vmem:[#allocation12 + $0x4f8] sm:$0xff]  }
 0x4b5   : > { %10163 = vmatpush3.bf16.msra.mxu0 %v11519_v52 }
 0x4b6   : > { %10164 = vmatprep.subr.bf16.mxu0 %v11520_v41 }
 0x4b9   : > { %10165 = vmatpush3.bf16.msra.mxu0 %v11520_v41 }
 0x4ba   : > { %10174 = vmatprep.subr.bf16.mxu0 %v12710_v50 }
 0x4bb   : > { %10147 = vmatmul.mubr.bf16.gmra.mrb[28].mxu1 %v3675_v32 }
 0x586   : > { %v10144_v6 = vpop.f32.mrb[24].mxu1 }
 0x587   : > { %v3822_v30 = vmul.f32 %v10144_v6, %v8731_v34  ;;  %v3775_v12 = vpop.f32.mrb[25].mxu1 }
 0x588   : > { %v3820_v40 = vmul.f32 %v8731_v34, %v3775_v12  ;;  %v10145_v17 = vpop.f32.mrb[26].mxu1 }
 0x589   : > { %v3835_v55 = vadd.f32 %v8732_v8, %v3822_v30  ;;  %v3823_v20 = vmul.f32 %v10145_v17, %v8731_v34  ;;  %v3778_v10 = vpop.f32.mrb[27].mxu1  ;;  %v11522_v17 = vld [vmem:[#allocation12 + $0x488] sm:$0xff]  }
 0x58a   : > { %v3833_v31 = vadd.f32 %v8732_v8, %v3820_v40  ;;  %v3821_v42 = vmul.f32 %v8731_v34, %v3778_v10 }
 0x58b   : > { %v3843_v21 = vmax.f32 %v3835_v55, 0.0  ;;  %v3836_v49 = vadd.f32 %v8732_v8, %v3823_v20 }
 0x58c   : > { %v3841_v28 = vmax.f32 %v3833_v31, 0.0  ;;  %v3834_v35 = vadd.f32 %v8732_v8, %v3821_v42 }
 0x58d   : > { %v3851_v7 = vmul.f32 2.0, %v3843_v21  ;;  %v3844_v57 = vmax.f32 %v3836_v49, 0.0 }
 0x58e   : > { %v3849_v62 = vmul.f32 2.0, %v3841_v28  ;;  %v3842_v37 = vmax.f32 %v3834_v35, 0.0  ;;  %v10148_v15 = vpop.f32.mrb[28].mxu1 }
 0x58f   : > { %v11184_v9 = vround.rtne.f32 %v3851_v7  ;;  %v3852_v3 = vmul.f32 2.0, %v3844_v57  ;;  %v3826_v13 = vmul.f32 %v10148_v15, %v8731_v34  ;;  %v3791_v18 = vpop.f32.mrb[29].mxu1  ;;  %v11523_v7 = vld [vmem:[#allocation12 + $0x490] sm:$0xff]  }
 0x590   : > { %v11182_v45 = vround.rtne.f32 %v3849_v62  ;;  %v3850_v19 = vmul.f32 2.0, %v3842_v37  ;;  %v3824_v58 = vmul.f32 %v8731_v34, %v3791_v18  ;;  %v10149_v23 = vpop.f32.mrb[30].mxu1 }
 0x591   : > { %v3867_v24 = vmax.f32 %v11184_v9, 0.0  ;;  %v11185_v26 = vround.rtne.f32 %v3852_v3  ;;  %v3839_v61 = vadd.f32 %v8732_v8, %v3826_v13  ;;  %v3827_v2 = vmul.f32 %v10149_v23, %v8731_v34  ;;  %v3794_v27 = vpop.f32.mrb[31].mxu1  ;;  %v11524_v3 = vld [vmem:[#allocation12 + $0x498] sm:$0xff]  }
 0x592   : > { %v3865_v11 = vmax.f32 %v11182_v45, 0.0  ;;  %v11183_v51 = vround.rtne.f32 %v3850_v19  ;;  %v3837_v29 = vadd.f32 %v8732_v8, %v3824_v58  ;;  %v3825_v25 = vmul.f32 %v8731_v34, %v3794_v27  ;;  %v11525_v45 = vld [vmem:[#allocation12 + $0x4a0] sm:$0xff]   ;;  %v11526_v19 = vld [vmem:[#allocation12 + $0x4a8] sm:$0xff]   ;;  %v11527_v58 = vld [vmem:[#allocation12 + $0x4b0] sm:$0xff]  }
 0x593   : > { %v3875_v63 = vmin.f32 %v3867_v24, 3.0  ;;  %v3868_v47 = vmax.f32 %v11185_v26, 0.0  ;;  %v3847_v4 = vmax.f32 %v3839_v61, 0.0  ;;  %v3840_v22 = vadd.f32 %v8732_v8, %v3827_v2  ;;  %v11528_v23 = vld [vmem:[#allocation12 + $0x4b8] sm:$0xff]   ;;  %v11529_v24 = vld [vmem:[#allocation12 + $0x500] sm:$0xff]  }
 0x594   : > { %v3873_v48 = vmin.f32 %v3865_v11, 3.0  ;;  %v3866_v14 = vmax.f32 %v11183_v51, 0.0  ;;  %v3845_v36 = vmax.f32 %v3837_v29, 0.0  ;;  %v3838_v38 = vadd.f32 %v8732_v8, %v3825_v25  ;;  %v11530_v51 = vld [vmem:[#allocation12 + $0x508] sm:$0xff]   ;;  %v11531_v25 = vld [vmem:[#allocation12 + $0x510] sm:$0xff]  }
 0x595   : > { %v12713_v39 = vmul.f32 0.5, %v3875_v63  ;;  %v3876_v53 = vmin.f32 %v3868_v47, 3.0  ;;  %v3855_v43 = vmul.f32 2.0, %v3847_v4  ;;  %v3848_v44 = vmax.f32 %v3840_v22, 0.0  ;;  %v4181_v47 = vld [vmem:[#allocation2 + $0x2] sm:$0xff] }
 0x596   : > { %v12715_v46 = vmul.f32 0.5, %v3873_v48  ;;  %v3874_v5 = vmin.f32 %v3866_v14, 3.0  ;;  %v3853_v33 = vmul.f32 2.0, %v3845_v36  ;;  %v3846_v32 = vmax.f32 %v3838_v38, 0.0  ;;  %v11532_v14 = vld [vmem:[#allocation12 + $0x518] sm:$0xff]   ;;  %v11533_v38 = vld [vmem:[#allocation12 + $0x520] sm:$0xff]  }
 0x597   : > { %3891 = vst [vmem:[#allocation2 + $0x31] sm:$0xff] %v12713_v39  ;;  %v12718_v54 = vmul.f32 0.5, %v3876_v53  ;;  %v11188_v16 = vround.rtne.f32 %v3855_v43  ;;  %v3856_v56 = vmul.f32 2.0, %v3848_v44  ;;  %v11534_v53 = vld [vmem:[#allocation12 + $0x528] sm:$0xff]   ;;  %v11535_v43 = vld [vmem:[#allocation12 + $0x530] sm:$0xff]   ;;  %v11536_v44 = vld [vmem:[#allocation12 + $0x538] sm:$0xff]  }
 0x598   : > { %3889 = vst [vmem:[#allocation2 + $0x11] sm:$0xff] %v12715_v46  ;;  %v12721_v59 = vmul.f32 0.5, %v3874_v5  ;;  %v11186_v0 = vround.rtne.f32 %v3853_v33  ;;  %v3854_v52 = vmul.f32 2.0, %v3846_v32  ;;  %v3934_v41 = vpack.c.bf16 %v12715_v46, %v3926_v60  ;;  %v11537_v60 = vld [vmem:[#allocation12 + $0x540] sm:$0xff]  }
 0x599   : > { %3892 = vst [vmem:[#allocation2 + $0x41] sm:$0xff] %v12718_v54  ;;  %v3871_v34 = vmax.f32 %v11188_v16, 0.0  ;;  %v11189_v6 = vround.rtne.f32 %v3856_v56  ;;  %v4490_v8 = vpack.c.bf16 %v12718_v54, %v12713_v39 }
 0x59a   : > { %3890 = vst [vmem:[#allocation2 + $0x21] sm:$0xff] %v12721_v59  ;;  %v3869_v30 = vmax.f32 %v11186_v0, 0.0  ;;  %v11187_v12 = vround.rtne.f32 %v3854_v52  ;;  %10166 = vmatprep.mubr.bf16.mxu0 %v3934_v41  ;;  %v12730_v40 = vpack.c.bf16 %v12713_v39, %v12721_v59  ;;  %v4489_v55 = vpack.c.bf16 %v12721_v59, %v12715_v46  ;;  %v11538_v0 = vld [vmem:[#allocation12 + $0x548] sm:$0xff]   ;;  %v11539_v41 = vld [vmem:[#allocation12 + $0x550] sm:$0xff]   ;;  %v11556_v59 = vld [vmem:[#allocation12 + $0x5d8] sm:$0xff]  }
 0x59b   : > { %v3879_v20 = vmin.f32 %v3871_v34, 3.0  ;;  %v3872_v10 = vmax.f32 %v11189_v6, 0.0  ;;  %v11555_v46 = vld [vmem:[#allocation12 + $0x5d0] sm:$0xff]   ;;  %v11557_v39 = vld [vmem:[#allocation12 + $0x5e0] sm:$0xff]  }
 0x59c   : > { %v3877_v31 = vmin.f32 %v3869_v30, 3.0  ;;  %v3870_v42 = vmax.f32 %v11187_v12, 0.0  ;;  %10167 = vmatmul.mubr.bf16.vlgmr.msra.gmra.mrb[8].mxu0 %v12730_v40  ;;  %v11540_v12 = vld [vmem:[#allocation12 + $0x558] sm:$0xff]  }
 0x59d   : > { %v12735_v21 = vmul.f32 0.5, %v3879_v20  ;;  %v3880_v49 = vmin.f32 %v3872_v10, 3.0  ;;  %10175 = vmatpush3.bf16.msra.mxu0 %v12710_v50  ;;  %v11541_v20 = vld [vmem:[#allocation12 + $0x560] sm:$0xff]   ;;  %v11542_v10 = vld [vmem:[#allocation12 + $0x568] sm:$0xff]  }
 0x59e   : > { %v12738_v28 = vmul.f32 0.5, %v3877_v31  ;;  %v3878_v35 = vmin.f32 %v3870_v42, 3.0  ;;  %10176 = vmatprep.subr.bf16.mxu0 %v11522_v17  ;;  %v12770_v2 = vld [vmem:[#allocation2 + $0x30] sm:$0xff]  ;;  %v11544_v42 = vld [vmem:[#allocation12 + $0x578] sm:$0xff]  }
 0x59f   : > { %3895 = vst [vmem:[#allocation2 + $0x71] sm:$0xff] %v12735_v21  ;;  %v12741_v57 = vmul.f32 0.5, %v3880_v49  ;;  %v12750_v15 = vld [vmem:[#allocation2 + $0x10] sm:$0xff]  ;;  %v11545_v49 = vld [vmem:[#allocation12 + $0x580] sm:$0xff]  }
 0x5a0   : > { %3893 = vst [vmem:[#allocation2 + $0x51] sm:$0xff] %v12738_v28  ;;  %v12744_v62 = vmul.f32 0.5, %v3878_v35  ;;  %v12748_v37 = vpack.c.bf16 %v12738_v28, %v12718_v54  ;;  %v3905_v13 = vpack.c.bf16 %v12750_v15, %v12698_v1  ;;  %v12776_v11 = vld [vmem:[#allocation2 + $0x40] sm:$0xff]  ;;  %v12786_v4 = vld [vmem:[#allocation2 + $0x12] sm:$0xff]  ;;  %v11558_v54 = vld [vmem:[#allocation12 + $0x5e8] sm:$0xff]  }
 0x5a1   : > { %3896 = vst [vmem:[#allocation2 + $0x81] sm:$0xff] %v12741_v57  ;;  %10177 = vmatpush3.bf16.msra.mxu0 %v11522_v17  ;;  %v4492_v50 = vpack.c.bf16 %v12741_v57, %v12735_v21  ;;  %v12766_v26 = vld [vmem:[#allocation2 + $0x20] sm:$0xff]  ;;  %v4189_v36 = vpack.c.bf16 %v12786_v4, %v4181_v47  ;;  %v12800_v32 = vld [vmem:[#allocation2 + $0x32] sm:$0xff]  ;;  %v4340_v35 = vpack.c.bf16 %v12776_v11, %v12770_v2 }
 0x5a2   : > { %3894 = vst [vmem:[#allocation2 + $0x61] sm:$0xff] %v12744_v62  ;;  %10170 = vmatprep.mubr.bf16.mxu0 %v12748_v37  ;;  %10178 = vmatprep.subr.bf16.mxu0 %v11523_v7  ;;  %v12759_v9 = vpack.c.bf16 %v12735_v21, %v12744_v62  ;;  %v4491_v18 = vpack.c.bf16 %v12744_v62, %v12738_v28  ;;  %v12796_v5 = vld [vmem:[#allocation2 + $0x22] sm:$0xff]  ;;  %v11543_v31 = vld [vmem:[#allocation12 + $0x570] sm:$0xff]   ;;  %v11560_v28 = vld [vmem:[#allocation12 + $0x5f8] sm:$0xff]  }
 0x5a3   : > { %v12774_v27 = vpack.c.bf16 %v12770_v2, %v12766_v26  ;;  %v12804_v16 = vpack.c.bf16 %v12800_v32, %v12796_v5  ;;  %v12806_v56 = vld [vmem:[#allocation2 + $0x42] sm:$0xff]  ;;  %v4339_v17 = vpack.c.bf16 %v12766_v26, %v12750_v15  ;;  %v11552_v26 = vld [vmem:[#allocation12 + $0x5b8] sm:$0xff]  }
 0x5a4   : > { %10171 = vmatmul.mubr.bf16.gmra.mrb[12].mxu0 %v12759_v9  ;;  %v11554_v2 = vld [vmem:[#allocation12 + $0x5c8] sm:$0xff]   ;;  %v11561_v62 = vld [vmem:[#allocation12 + $0x600] sm:$0xff]   ;;  %v4640_v21 = vpack.c.bf16 %v12806_v56, %v12800_v32 }
 0x5a5   : > { %10179 = vmatpush3.bf16.msra.mxu0 %v11523_v7  ;;  %10190 = vmatprep.mubr.bf16.mxu0 %v3905_v13  ;;  %v11546_v7 = vld [vmem:[#allocation12 + $0x588] sm:$0xff]   ;;  %v11565_v47 = vld [vmem:[#allocation12 + $0x620] sm:$0xff]  }
 0x5a6   : > { %10180 = vmatprep.subr.bf16.mxu0 %v11524_v3  ;;  %v12788_v22 = vld [vmem:[#allocation2 + $0x70] sm:$0xff] }
 0x5a7   : > { %v12768_v61 = vld [vmem:[#allocation2 + $0x50] sm:$0xff] }
 0x5a8   : > { %v12780_v29 = vpack.c.bf16 %v12768_v61, %v12776_v11  ;;  %v12798_v33 = vld [vmem:[#allocation2 + $0x52] sm:$0xff]  ;;  %v12829_v13 = vld [vmem:[#allocation2 + $0x80] sm:$0xff] }
 0x5a9   : > { %10181 = vmatpush3.bf16.msra.mxu0 %v11524_v3  ;;  %v12784_v63 = vld [vmem:[#allocation2 + $0x60] sm:$0xff]  ;;  %v12810_v52 = vpack.c.bf16 %v12798_v33, %v12806_v56  ;;  %v12816_v6 = vld [vmem:[#allocation2 + $0x72] sm:$0xff] }
 0x5aa   : > { %10182 = vmatprep.subr.bf16.mxu0 %v11525_v45  ;;  %v12792_v48 = vpack.c.bf16 %v12788_v22, %v12784_v63  ;;  %v12814_v34 = vld [vmem:[#allocation2 + $0x62] sm:$0xff]  ;;  %v4341_v15 = vpack.c.bf16 %v12784_v63, %v12768_v61  ;;  %v11547_v3 = vld [vmem:[#allocation12 + $0x590] sm:$0xff]   ;;  %v11564_v63 = vld [vmem:[#allocation12 + $0x618] sm:$0xff]  }
 0x5ab   : > { %v12820_v30 = vpack.c.bf16 %v12816_v6, %v12814_v34  ;;  %v11553_v61 = vld [vmem:[#allocation12 + $0x5c0] sm:$0xff]   ;;  %v11563_v11 = vld [vmem:[#allocation12 + $0x610] sm:$0xff]   ;;  %v11580_v56 = vld [vmem:[#allocation12 + $0x698] sm:$0xff]  }
 0x5ad   : > { %10183 = vmatpush3.bf16.msra.mxu0 %v11525_v45  ;;  %v4342_v45 = vpack.c.bf16 %v12829_v13, %v12788_v22  ;;  %v11567_v22 = vld [vmem:[#allocation12 + $0x630] sm:$0xff]  }
 0x5ae   : > { %10184 = vmatprep.subr.bf16.mxu0 %v11526_v19 }
 0x5b1   : > { %10185 = vmatpush3.bf16.msra.mxu0 %v11526_v19  ;;  %v11548_v19 = vld [vmem:[#allocation12 + $0x598] sm:$0xff]  }
 0x5b2   : > { %10186 = vmatprep.subr.bf16.mxu0 %v11527_v58 }
 0x5b5   : > { %10187 = vmatpush3.bf16.msra.mxu0 %v11527_v58  ;;  %v11549_v58 = vld [vmem:[#allocation12 + $0x5a0] sm:$0xff]  }
 0x5b6   : > { %10188 = vmatprep.subr.bf16.mxu0 %v11528_v23 }
 0x5b9   : > { %10189 = vmatpush3.bf16.msra.mxu0 %v11528_v23  ;;  %v11550_v23 = vld [vmem:[#allocation12 + $0x5a8] sm:$0xff]  }
 0x5ba   : > { %10198 = vmatprep.subr.bf16.mxu0 %v11529_v24 }
 0x5bc   : > { %10191 = vmatmul.mubr.bf16.vlgmr.msra.gmra.mrb[8].mxu0 %v12774_v27 }
 0x5bd   : > { %10194 = vmatprep.mubr.bf16.mxu0 %v12780_v29  ;;  %10199 = vmatpush3.bf16.msra.mxu0 %v11529_v24  ;;  %v11551_v24 = vld [vmem:[#allocation12 + $0x5b0] sm:$0xff]  }
 0x5be   : > { %10200 = vmatprep.subr.bf16.mxu0 %v11530_v51 }
 0x5c1   : > { %10201 = vmatpush3.bf16.msra.mxu0 %v11530_v51  ;;  %v12851_v51 = vld [vmem:[#allocation2 + $0x82] sm:$0xff] }
 0x5c2   : > { %10202 = vmatprep.subr.bf16.mxu0 %v11531_v25 }
 0x5c4   : > { %10195 = vmatmul.mubr.bf16.gmra.mrb[12].mxu0 %v12792_v48 }
 0x5c5   : > { %10203 = vmatpush3.bf16.msra.mxu0 %v11531_v25  ;;  %10214 = vmatprep.mubr.bf16.mxu0 %v4189_v36  ;;  %v4642_v25 = vpack.c.bf16 %v12851_v51, %v12816_v6  ;;  %v11569_v36 = vld [vmem:[#allocation12 + $0x640] sm:$0xff]   ;;  %v11586_v6 = vld [vmem:[#allocation12 + $0x708] sm:$0xff]  }
 0x5c6   : > { %10204 = vmatprep.subr.bf16.mxu0 %v11532_v14 }
 0x5c9   : > { %10205 = vmatpush3.bf16.msra.mxu0 %v11532_v14  ;;  %v11568_v14 = vld [vmem:[#allocation12 + $0x638] sm:$0xff]  }
 0x5ca   : > { %10206 = vmatprep.subr.bf16.mxu0 %v11533_v38 }
 0x5cd   : > { %10207 = vmatpush3.bf16.msra.mxu0 %v11533_v38  ;;  %v11570_v38 = vld [vmem:[#allocation12 + $0x648] sm:$0xff]  }
 0x5ce   : > { %10208 = vmatprep.subr.bf16.mxu0 %v11534_v53 }
 0x5d1   : > { %10209 = vmatpush3.bf16.msra.mxu0 %v11534_v53  ;;  %v4792_v53 = vpack.c.bf16 %v12698_v1, %v12829_v13  ;;  %v11577_v1 = vld [vmem:[#allocation12 + $0x680] sm:$0xff]  }
 0x5d2   : > { %10210 = vmatprep.subr.bf16.mxu0 %v11535_v43 }
 0x5d5   : > { %10211 = vmatpush3.bf16.msra.mxu0 %v11535_v43  ;;  %v11572_v43 = vld [vmem:[#allocation12 + $0x658] sm:$0xff]  }
 0x5d6   : > { %10212 = vmatprep.subr.bf16.mxu0 %v11536_v44 }
 0x5d9   : > { %10213 = vmatpush3.bf16.msra.mxu0 %v11536_v44  ;;  %v11573_v44 = vld [vmem:[#allocation12 + $0x660] sm:$0xff]  }
 0x5da   : > { %10222 = vmatprep.subr.bf16.mxu0 %v11537_v60 }
 0x5dc   : > { %10215 = vmatmul.mubr.bf16.vlgmr.msra.gmra.mrb[8].mxu0 %v12804_v16 }
 0x5dd   : > { %10218 = vmatprep.mubr.bf16.mxu0 %v12810_v52  ;;  %10223 = vmatpush3.bf16.msra.mxu0 %v11537_v60  ;;  %v11576_v60 = vld [vmem:[#allocation12 + $0x678] sm:$0xff]  }
 0x5de   : > { %10224 = vmatprep.subr.bf16.mxu0 %v11538_v0 }
 0x5e1   : > { %10225 = vmatpush3.bf16.msra.mxu0 %v11538_v0  ;;  %v11581_v0 = vld [vmem:[#allocation12 + $0x6a0] sm:$0xff]  }
 0x5e2   : > { %10226 = vmatprep.subr.bf16.mxu0 %v11539_v41 }
 0x5e4   : > { %10219 = vmatmul.mubr.bf16.gmra.mrb[12].mxu0 %v12820_v30 }
 0x5e5   : > { %10227 = vmatpush3.bf16.msra.mxu0 %v11539_v41  ;;  %10238 = vmatprep.mubr.bf16.mxu0 %v4339_v17  ;;  %v11584_v41 = vld [vmem:[#allocation12 + $0x6b8] sm:$0xff]  }
 0x5e6   : > { %10228 = vmatprep.subr.bf16.mxu0 %v11540_v12  ;;  %v11588_v17 = vld [vmem:[#allocation12 + $0x718] sm:$0xff]  }
 0x5e9   : > { %10229 = vmatpush3.bf16.msra.mxu0 %v11540_v12  ;;  %v11587_v12 = vld [vmem:[#allocation12 + $0x710] sm:$0xff]  }
 0x5ea   : > { %10230 = vmatprep.subr.bf16.mxu0 %v11541_v20 }
 0x5ed   : > { %10231 = vmatpush3.bf16.msra.mxu0 %v11541_v20  ;;  %v11589_v20 = vld [vmem:[#allocation12 + $0x720] sm:$0xff]  }
 0x5ee   : > { %10232 = vmatprep.subr.bf16.mxu0 %v11542_v10 }
 0x5f1   : > { %10233 = vmatpush3.bf16.msra.mxu0 %v11542_v10  ;;  %v11592_v10 = vld [vmem:[#allocation12 + $0x738] sm:$0xff]  }
 0x5f2   : > { %10234 = vmatprep.subr.bf16.mxu0 %v11543_v31 }
 0x5f5   : > { %10235 = vmatpush3.bf16.msra.mxu0 %v11543_v31  ;;  %v12868_v31 = vld [vmem:[#allocation12 + $0x6c0] sm:$0xff]  }
 0x5f6   : > { %10236 = vmatprep.subr.bf16.mxu0 %v11544_v42 }
 0x5f9   : > { %10237 = vmatpush3.bf16.msra.mxu0 %v11544_v42  ;;  %v5300_v42 = vld [vmem:[#allocation3 + $0x31] sm:$0xff] }
 0x5fa   : > { %10246 = vmatprep.subr.bf16.mxu0 %v11545_v49 }
 0x5fc   : > { %10239 = vmatmul.mubr.bf16.vlgmr.msra.gmra.mrb[8].mxu0 %v4340_v35  ;;  %v5301_v35 = vld [vmem:[#allocation3 + $0x41] sm:$0xff] }
 0x5fd   : > { %10242 = vmatprep.mubr.bf16.mxu0 %v4341_v15  ;;  %10247 = vmatpush3.bf16.msra.mxu0 %v11545_v49  ;;  %v5298_v49 = vld [vmem:[#allocation3 + $0x11] sm:$0xff]  ;;  %v5299_v15 = vld [vmem:[#allocation3 + $0x21] sm:$0xff] }
 0x5fe   : > { %10248 = vmatprep.subr.bf16.mxu0 %v11546_v7  ;;  %v5306_v13 = vmul.f32 12.7, %v5298_v49 }
 0x601   : > { %10249 = vmatpush3.bf16.msra.mxu0 %v11546_v7  ;;  %v5308_v7 = vmul.f32 12.7, %v5300_v42 }
 0x602   : > { %10250 = vmatprep.subr.bf16.mxu0 %v11547_v3 }
 0x604   : > { %10243 = vmatmul.mubr.bf16.gmra.mrb[12].mxu0 %v4342_v45  ;;  %v5302_v45 = vld [vmem:[#allocation3 + $0x51] sm:$0xff] }
 0x605   : > { %10251 = vmatpush3.bf16.msra.mxu0 %v11547_v3  ;;  %10262 = vmatprep.mubr.bf16.mxu0 %v4489_v55  ;;  %v4639_v55 = vpack.c.bf16 %v12796_v5, %v12786_v4  ;;  %v11566_v4 = vld [vmem:[#allocation12 + $0x628] sm:$0xff]   ;;  %v5304_v3 = vld [vmem:[#allocation3 + $0x71] sm:$0xff] }
 0x606   : > { %10252 = vmatprep.subr.bf16.mxu0 %v11548_v19  ;;  %v11578_v5 = vld [vmem:[#allocation12 + $0x688] sm:$0xff]  }
 0x609   : > { %10253 = vmatpush3.bf16.msra.mxu0 %v11548_v19  ;;  %v5309_v19 = vmul.f32 12.7, %v5301_v35 }
 0x60a   : > { %10254 = vmatprep.subr.bf16.mxu0 %v11549_v58 }
 0x60d   : > { %10255 = vmatpush3.bf16.msra.mxu0 %v11549_v58  ;;  %v5305_v58 = vld [vmem:[#allocation3 + $0x81] sm:$0xff] }
 0x60e   : > { %10256 = vmatprep.subr.bf16.mxu0 %v11550_v23 }
 0x611   : > { %10257 = vmatpush3.bf16.msra.mxu0 %v11550_v23  ;;  %v5307_v23 = vmul.f32 12.7, %v5299_v15 }
 0x612   : > { %10258 = vmatprep.subr.bf16.mxu0 %v11551_v24 }
 0x615   : > { %10259 = vmatpush3.bf16.msra.mxu0 %v11551_v24  ;;  %v5312_v24 = vmul.f32 12.7, %v5304_v3 }
 0x616   : > { %10260 = vmatprep.subr.bf16.mxu0 %v11552_v26 }
 0x619   : > { %10261 = vmatpush3.bf16.msra.mxu0 %v11552_v26  ;;  %v5303_v26 = vld [vmem:[#allocation3 + $0x61] sm:$0xff] }
 0x61a   : > { %10270 = vmatprep.subr.bf16.mxu0 %v11553_v61 }
 0x61c   : > { %10263 = vmatmul.mubr.bf16.vlgmr.msra.gmra.mrb[8].mxu0 %v4490_v8  ;;  %v11559_v8 = vld [vmem:[#allocation12 + $0x5f0] sm:$0xff]  }
 0x61d   : > { %10266 = vmatprep.mubr.bf16.mxu0 %v4491_v18  ;;  %10271 = vmatpush3.bf16.msra.mxu0 %v11553_v61  ;;  %v4641_v18 = vpack.c.bf16 %v12814_v34, %v12798_v33  ;;  %v4938_v33 = vld [vmem:[#allocation2 + $0x91] sm:$0xff]  ;;  %v11585_v34 = vld [vmem:[#allocation12 + $0x700] sm:$0xff]   ;;  %v11200_v61 = vround.rtne.f32 %v5308_v7 }
 0x61e   : > { %10272 = vmatprep.subr.bf16.mxu0 %v11554_v2  ;;  %v4942_v32 = vpack.c.bf16 %v4938_v33, %v12741_v57  ;;  %v5088_v57 = vld [vmem:[#allocation2 + $0x92] sm:$0xff]  ;;  %10366 = vmatprep.subr.bf16.mxu1 %v11585_v34 }
 0x61f   : > { %10367 = vmatpush3.bf16.msra.mxu1 %v11585_v34 }
 0x620   : > { %10368 = vmatprep.subr.bf16.mxu1 %v11586_v6 }
 0x621   : > { %10273 = vmatpush3.bf16.msra.mxu0 %v11554_v2  ;;  %v5310_v2 = vmul.f32 12.7, %v5302_v45 }
 0x622   : > { %10274 = vmatprep.subr.bf16.mxu0 %v11555_v46 }
 0x623   : > { %10369 = vmatpush3.bf16.msra.mxu1 %v11586_v6 }
 0x624   : > { %10267 = vmatmul.mubr.bf16.gmra.mrb[12].mxu0 %v4492_v50  ;;  %v11562_v50 = vld [vmem:[#allocation12 + $0x608] sm:$0xff]   ;;  %10370 = vmatprep.subr.bf16.mxu1 %v11587_v12 }
 0x625   : > { %10275 = vmatpush3.bf16.msra.mxu0 %v11555_v46  ;;  %10286 = vmatprep.mubr.bf16.mxu0 %v4639_v55  ;;  %v11198_v46 = vround.rtne.f32 %v5306_v13  ;;  %v8805_v55 = vld [vmem:[#allocation13 + $0x6] ss:$0 sm:$0xff] }
 0x626   : > { %10276 = vmatprep.subr.bf16.mxu0 %v11556_v59 }
 0x627   : > { %10371 = vmatpush3.bf16.msra.mxu1 %v11587_v12 }
 0x628   : > { %10372 = vmatprep.subr.bf16.mxu1 %v11588_v17 }
 0x629   : > { %10277 = vmatpush3.bf16.msra.mxu0 %v11556_v59  ;;  %v5313_v59 = vmul.f32 12.7, %v5305_v58 }
 0x62a   : > { %10278 = vmatprep.subr.bf16.mxu0 %v11557_v39 }
 0x62b   : > { %10373 = vmatpush3.bf16.msra.mxu1 %v11588_v17 }
 0x62c   : > { %10374 = vmatprep.subr.bf16.mxu1 %v11589_v20 }
 0x62d   : > { %10279 = vmatpush3.bf16.msra.mxu0 %v11557_v39  ;;  %v11201_v39 = vround.rtne.f32 %v5309_v19 }
 0x62e   : > { %10280 = vmatprep.subr.bf16.mxu0 %v11558_v54 }
 0x62f   : > { %10375 = vmatpush3.bf16.msra.mxu1 %v11589_v20 }
 0x631   : > { %10281 = vmatpush3.bf16.msra.mxu0 %v11558_v54  ;;  %v5311_v54 = vmul.f32 12.7, %v5303_v26 }
 0x632   : > { %10282 = vmatprep.subr.bf16.mxu0 %v11559_v8 }
 0x635   : > { %10283 = vmatpush3.bf16.msra.mxu0 %v11559_v8  ;;  %v11199_v8 = vround.rtne.f32 %v5307_v23 }
 0x636   : > { %10284 = vmatprep.subr.bf16.mxu0 %v11560_v28 }
 0x639   : > { %10285 = vmatpush3.bf16.msra.mxu0 %v11560_v28  ;;  %v11204_v28 = vround.rtne.f32 %v5312_v24 }
 0x63a   : > { %10294 = vmatprep.subr.bf16.mxu0 %v11561_v62 }
 0x63c   : > { %10287 = vmatmul.mubr.bf16.vlgmr.msra.gmra.mrb[8].mxu0 %v4640_v21  ;;  %v8806_v21 = vld [vmem:[#allocation13 + $0x7] ss:$0 sm:$0xff] }
 0x63d   : > { %10290 = vmatprep.mubr.bf16.mxu0 %v4641_v18  ;;  %10295 = vmatpush3.bf16.msra.mxu0 %v11561_v62  ;;  %v11202_v18 = vround.rtne.f32 %v5310_v2 }
 0x63e   : > { %10296 = vmatprep.subr.bf16.mxu0 %v11562_v50 }
 0x641   : > { %10297 = vmatpush3.bf16.msra.mxu0 %v11562_v50  ;;  %v8817_v50 = vclamps-f32 %v11200_v61, 127.0 }
 0x642   : > { %10298 = vmatprep.subr.bf16.mxu0 %v11563_v11 }
 0x644   : > { %10291 = vmatmul.mubr.bf16.gmra.mrb[12].mxu0 %v4642_v25  ;;  %v8815_v25 = vclamps-f32 %v11198_v46, 127.0 }
 0x645   : > { %10299 = vmatpush3.bf16.msra.mxu0 %v11563_v11  ;;  %10310 = vmatprep.mubr.bf16.mxu0 %v12774_v27  ;;  %v11571_v27 = vld [vmem:[#allocation12 + $0x650] sm:$0xff]  }
 0x646   : > { %10300 = vmatprep.subr.bf16.mxu0 %v11564_v63 }
 0x649   : > { %10301 = vmatpush3.bf16.msra.mxu0 %v11564_v63  ;;  %v11205_v63 = vround.rtne.f32 %v5313_v59 }
 0x64a   : > { %10302 = vmatprep.subr.bf16.mxu0 %v11565_v47 }
 0x64b   : > { %v8822_v33 = vclamps-f32 %v11205_v63, 127.0 }
 0x64d   : > { %10303 = vmatpush3.bf16.msra.mxu0 %v11565_v47  ;;  %v5345_v42 = vmul.f32 0.07874016, %v8822_v33 }
 0x64e   : > { %10304 = vmatprep.subr.bf16.mxu0 %v11566_v4 }
 0x651   : > { %10305 = vmatpush3.bf16.msra.mxu0 %v11566_v4 }
 0x652   : > { %10306 = vmatprep.subr.bf16.mxu0 %v11567_v22 }
 0x655   : > { %10307 = vmatpush3.bf16.msra.mxu0 %v11567_v22  ;;  %v8818_v22 = vclamps-f32 %v11201_v39, 127.0 }
 0x656   : > { %10308 = vmatprep.subr.bf16.mxu0 %v11568_v14 }
 0x659   : > { %10309 = vmatpush3.bf16.msra.mxu0 %v11568_v14  ;;  %v11203_v14 = vround.rtne.f32 %v5311_v54 }
 0x65a   : > { %10318 = vmatprep.subr.bf16.mxu0 %v11569_v36 }
 0x65c   : > { %10311 = vmatmul.mubr.bf16.vlgmr.msra.gmra.mrb[8].mxu0 %v12780_v29  ;;  %v11574_v29 = vld [vmem:[#allocation12 + $0x668] sm:$0xff]  }
 0x65d   : > { %10314 = vmatprep.mubr.bf16.mxu0 %v12792_v48  ;;  %10319 = vmatpush3.bf16.msra.mxu0 %v11569_v36  ;;  %v11575_v48 = vld [vmem:[#allocation12 + $0x670] sm:$0xff]  }
 0x65e   : > { %10320 = vmatprep.subr.bf16.mxu0 %v11570_v38 }
 0x661   : > { %10321 = vmatpush3.bf16.msra.mxu0 %v11570_v38 }
 0x662   : > { %10322 = vmatprep.subr.bf16.mxu0 %v11571_v27 }
 0x664   : > { %10315 = vmatmul.mubr.bf16.gmra.mrb[12].mxu0 %v4792_v53  ;;  %v8816_v53 = vclamps-f32 %v11199_v8, 127.0 }
 0x665   : > { %10323 = vmatpush3.bf16.msra.mxu0 %v11571_v27  ;;  %10334 = vmatprep.mubr.bf16.mxu0 %v12730_v40  ;;  %v11579_v40 = vld [vmem:[#allocation12 + $0x690] sm:$0xff]  }
 0x666   : > { %10324 = vmatprep.subr.bf16.mxu0 %v11572_v43 }
 0x669   : > { %10325 = vmatpush3.bf16.msra.mxu0 %v11572_v43  ;;  %v8821_v43 = vclamps-f32 %v11204_v28, 127.0 }
 0x66a   : > { %10326 = vmatprep.subr.bf16.mxu0 %v11573_v44 }
 0x66d   : > { %10327 = vmatpush3.bf16.msra.mxu0 %v11573_v44  ;;  %v5340_v44 = vmul.f32 0.07874016, %v8817_v50 }
 0x66e   : > { %10328 = vmatprep.subr.bf16.mxu0 %v11574_v29 }
 0x671   : > { %10329 = vmatpush3.bf16.msra.mxu0 %v11574_v29 }
 0x672   : > { %10330 = vmatprep.subr.bf16.mxu0 %v11575_v48 }
 0x675   : > { %10331 = vmatpush3.bf16.msra.mxu0 %v11575_v48 }
 0x676   : > { %10332 = vmatprep.subr.bf16.mxu0 %v11576_v60 }
 0x679   : > { %10333 = vmatpush3.bf16.msra.mxu0 %v11576_v60  ;;  %v8819_v60 = vclamps-f32 %v11202_v18, 127.0 }
 0x67a   : > { %10342 = vmatprep.subr.bf16.mxu0 %v11577_v1 }
 0x67b   : > { %v5342_v17 = vmul.f32 0.07874016, %v8819_v60 }
 0x67c   : > { %10335 = vmatmul.mubr.bf16.vlgmr.msra.gmra.mrb[8].mxu0 %v12748_v37  ;;  %v11582_v37 = vld [vmem:[#allocation12 + $0x6a8] sm:$0xff]  }
 0x67d   : > { %10338 = vmatprep.mubr.bf16.mxu0 %v12759_v9  ;;  %10343 = vmatpush3.bf16.msra.mxu0 %v11577_v1  ;;  %v11583_v9 = vld [vmem:[#allocation12 + $0x6b0] sm:$0xff]  }
 0x67e   : > { %10344 = vmatprep.subr.bf16.mxu0 %v11578_v5 }
 0x681   : > { %10345 = vmatpush3.bf16.msra.mxu0 %v11578_v5  ;;  %v5338_v5 = vmul.f32 0.07874016, %v8815_v25 }
 0x682   : > { %10346 = vmatprep.subr.bf16.mxu0 %v11579_v40 }
 0x684   : > { %10339 = vmatmul.mubr.bf16.gmra.mrb[12].mxu0 %v4942_v32 }
 0x685   : > { %10347 = vmatpush3.bf16.msra.mxu0 %v11579_v40  ;;  %10358 = vmatprep.mubr.bf16.mxu0 %v12804_v16  ;;  %v5092_v16 = vpack.c.bf16 %v5088_v57, %v12851_v51  ;;  %v5339_v57 = vmul.f32 0.07874016, %v8816_v53 }
 0x686   : > { %10348 = vmatprep.subr.bf16.mxu0 %v11580_v56 }
 0x689   : > { %10349 = vmatpush3.bf16.msra.mxu0 %v11580_v56  ;;  %v5341_v56 = vmul.f32 0.07874016, %v8818_v22 }
 0x68a   : > { %10350 = vmatprep.subr.bf16.mxu0 %v11581_v0 }
 0x68d   : > { %10351 = vmatpush3.bf16.msra.mxu0 %v11581_v0 }
 0x68e   : > { %10352 = vmatprep.subr.bf16.mxu0 %v11582_v37 }
 0x691   : > { %10353 = vmatpush3.bf16.msra.mxu0 %v11582_v37  ;;  %v8820_v37 = vclamps-f32 %v11203_v14, 127.0 }
 0x692   : > { %10354 = vmatprep.subr.bf16.mxu0 %v11583_v9 }
 0x693   : > { %v5343_v3 = vmul.f32 0.07874016, %v8820_v37 }
 0x695   : > { %10355 = vmatpush3.bf16.msra.mxu0 %v11583_v9 }
 0x696   : > { %10356 = vmatprep.subr.bf16.mxu0 %v11584_v41 }
 0x699   : > { %10357 = vmatpush3.bf16.msra.mxu0 %v11584_v41 }
 0x69c   : > { %10359 = vmatmul.mubr.bf16.vlgmr.msra.gmra.mrb[8].mxu0 %v12810_v52  ;;  %v11590_v52 = vld [vmem:[#allocation12 + $0x728] sm:$0xff]  }
 0x69d   : > { %10362 = vmatprep.mubr.bf16.mxu0 %v12820_v30  ;;  %10376 = vmatprep.subr.bf16.mxu1 %v11590_v52  ;;  %v11591_v30 = vld [vmem:[#allocation12 + $0x730] sm:$0xff]  }
 0x69e   : > { %10377 = vmatpush3.bf16.msra.mxu1 %v11590_v52 }
 0x69f   : > { %10378 = vmatprep.subr.bf16.mxu1 %v11591_v30 }
 0x6a2   : > { %10379 = vmatpush3.bf16.msra.mxu1 %v11591_v30 }
 0x6a3   : > { %10380 = vmatprep.subr.bf16.mxu1 %v11592_v10 }
 0x6a4   : > { %10363 = vmatmul.mubr.bf16.gmra.mrb[12].mxu0 %v5092_v16  ;;  %v5344_v16 = vmul.f32 0.07874016, %v8821_v43 }
 0x6a6   : > { %10381 = vmatpush3.bf16.msra.mxu1 %v11592_v10 }
 0x6a7   : > { %10390 = vmatprep.subr.bf16.mxu1 %v12868_v31 }
 0x76f   : > { %v10360_v62 = vpop.f32.mrb[8].mxu0 }
 0x770   : > { %v5239_v11 = vmul.f32 %v10360_v62, %v8805_v55  ;;  %v5192_v51 = vpop.f32.mrb[9].mxu0 }
 0x771   : > { %v5237_v47 = vmul.f32 %v8805_v55, %v5192_v51  ;;  %v10361_v4 = vpop.f32.mrb[10].mxu0 }
 0x772   : > { %v5252_v36 = vadd.f32 %v8806_v21, %v5239_v11  ;;  %v5240_v38 = vmul.f32 %v10361_v4, %v8805_v55  ;;  %v5195_v27 = vpop.f32.mrb[11].mxu0 }
 0x773   : > { %v5250_v29 = vadd.f32 %v8806_v21, %v5237_v47  ;;  %v5238_v48 = vmul.f32 %v8805_v55, %v5195_v27 }
 0x774   : > { %v5260_v1 = vmul.f32 12.7, %v5252_v36  ;;  %v5253_v40 = vadd.f32 %v8806_v21, %v5240_v38 }
 0x775   : > { %v5258_v32 = vmul.f32 12.7, %v5250_v29  ;;  %v5251_v0 = vadd.f32 %v8806_v21, %v5238_v48 }
 0x776   : > { %v11192_v9 = vround.rtne.f32 %v5260_v1  ;;  %v5261_v41 = vmul.f32 12.7, %v5253_v40 }
 0x777   : > { %v11190_v34 = vround.rtne.f32 %v5258_v32  ;;  %v5259_v6 = vmul.f32 12.7, %v5251_v0  ;;  %v10364_v12 = vpop.f32.mrb[12].mxu0 }
 0x778   : > { %v8809_v20 = vclamps-f32 %v11192_v9, 127.0  ;;  %v11193_v52 = vround.rtne.f32 %v5261_v41  ;;  %v5243_v30 = vmul.f32 %v10364_v12, %v8805_v55  ;;  %v5208_v10 = vpop.f32.mrb[13].mxu0 }
 0x779   : > { %v8807_v49 = vclamps-f32 %v11190_v34, 127.0  ;;  %v11191_v35 = vround.rtne.f32 %v5259_v6  ;;  %v5241_v7 = vmul.f32 %v8805_v55, %v5208_v10  ;;  %v10365_v15 = vpop.f32.mrb[14].mxu0 }
 0x77a   : > { %v5292_v13 = vmul.f32 0.07874016, %v8809_v20  ;;  %v8810_v45 = vclamps-f32 %v11193_v52, 127.0  ;;  %v5256_v19 = vadd.f32 %v8806_v21, %v5243_v30  ;;  %v5244_v58 = vmul.f32 %v10365_v15, %v8805_v55  ;;  %v5211_v23 = vpop.f32.mrb[15].mxu0 }
 0x77b   : > { %v5290_v24 = vmul.f32 0.07874016, %v8807_v49  ;;  %v8808_v26 = vclamps-f32 %v11191_v35, 127.0  ;;  %v5254_v61 = vadd.f32 %v8806_v21, %v5241_v7  ;;  %v5242_v2 = vmul.f32 %v8805_v55, %v5211_v23 }
 0x77c   : > { %v5348_v46 = vadd.f32 %v5340_v44, %v5292_v13  ;;  %v5293_v59 = vmul.f32 0.07874016, %v8810_v45  ;;  %v5264_v39 = vmul.f32 12.7, %v5256_v19  ;;  %v5257_v54 = vadd.f32 %v8806_v21, %v5244_v58  ;;  %v5439_v19 = vld [vmem:[#allocation3 + $0x1] sm:$0xff] }
 0x77d   : > { %v5346_v8 = vadd.f32 %v5338_v5, %v5290_v24  ;;  %v5291_v28 = vmul.f32 0.07874016, %v8808_v26  ;;  %v5262_v62 = vmul.f32 12.7, %v5254_v61  ;;  %v5255_v50 = vadd.f32 %v8806_v21, %v5242_v2 }
 0x77e   : > { %v5356_v18 = vmax.f32 %v5348_v46, 0.0  ;;  %v5349_v11 = vadd.f32 %v5341_v56, %v5293_v59  ;;  %v11196_v51 = vround.rtne.f32 %v5264_v39  ;;  %v5265_v25 = vmul.f32 12.7, %v5257_v54 }
 0x77f   : > { %v5354_v63 = vmax.f32 %v5346_v8, 0.0  ;;  %v5347_v47 = vadd.f32 %v5339_v57, %v5291_v28  ;;  %v11194_v4 = vround.rtne.f32 %v5262_v62  ;;  %v5263_v22 = vmul.f32 12.7, %v5255_v50  ;;  %v11594_v50 = vld [vmem:[#allocation12 + $0x6c8] sm:$0xff]  }
 0x780   : > { %v5364_v14 = vmul.f32 2.0, %v5356_v18  ;;  %v5357_v36 = vmax.f32 %v5349_v11, 0.0  ;;  %v8813_v38 = vclamps-f32 %v11196_v51, 127.0  ;;  %v11197_v55 = vround.rtne.f32 %v5265_v25 }
 0x781   : > { %v5362_v27 = vmul.f32 2.0, %v5354_v63  ;;  %v5355_v53 = vmax.f32 %v5347_v47, 0.0  ;;  %v8811_v43 = vclamps-f32 %v11194_v4, 127.0  ;;  %v11195_v44 = vround.rtne.f32 %v5263_v22 }
 0x782   : > { %v11208_v29 = vround.rtne.f32 %v5364_v14  ;;  %v5365_v48 = vmul.f32 2.0, %v5357_v36  ;;  %v5296_v60 = vmul.f32 0.07874016, %v8813_v38  ;;  %v8814_v21 = vclamps-f32 %v11197_v55, 127.0  ;;  %v11595_v36 = vld [vmem:[#allocation12 + $0x6d0] sm:$0xff]  }
 0x783   : > { %v11206_v1 = vround.rtne.f32 %v5362_v27  ;;  %v5363_v5 = vmul.f32 2.0, %v5355_v53  ;;  %v5294_v40 = vmul.f32 0.07874016, %v8811_v43  ;;  %v8812_v33 = vclamps-f32 %v11195_v44, 127.0 }
 0x784   : > { %v5380_v32 = vmax.f32 %v11208_v29, 0.0  ;;  %v11209_v56 = vround.rtne.f32 %v5365_v48  ;;  %v5352_v0 = vadd.f32 %v5344_v16, %v5296_v60  ;;  %v5297_v37 = vmul.f32 0.07874016, %v8814_v21  ;;  %v11596_v21 = vld [vmem:[#allocation12 + $0x6d8] sm:$0xff]  }
 0x785   : > { %v5378_v9 = vmax.f32 %v11206_v1, 0.0  ;;  %v11207_v41 = vround.rtne.f32 %v5363_v5  ;;  %v5350_v57 = vadd.f32 %v5342_v17, %v5294_v40  ;;  %v5295_v34 = vmul.f32 0.07874016, %v8812_v33  ;;  %v12923_v5 = vld [vmem:[#allocation2] sm:$0xff] }
 0x786   : > { %v5388_v6 = vmin.f32 %v5380_v32, 3.0  ;;  %v5381_v12 = vmax.f32 %v11209_v56, 0.0  ;;  %v5360_v20 = vmax.f32 %v5352_v0, 0.0  ;;  %v5353_v52 = vadd.f32 %v5345_v42, %v5297_v37  ;;  %v11597_v56 = vld [vmem:[#allocation12 + $0x6e0] sm:$0xff]  }
 0x787   : > { %v5386_v30 = vmin.f32 %v5378_v9, 3.0  ;;  %v5379_v10 = vmax.f32 %v11207_v41, 0.0  ;;  %v5358_v49 = vmax.f32 %v5350_v57, 0.0  ;;  %v5351_v35 = vadd.f32 %v5343_v3, %v5295_v34  ;;  %v11598_v9 = vld [vmem:[#allocation12 + $0x6e8] sm:$0xff]   ;;  %v11599_v57 = vld [vmem:[#allocation12 + $0x6f0] sm:$0xff]   ;;  %v11600_v34 = vld [vmem:[#allocation12 + $0x6f8] sm:$0xff]  }
 0x788   : > { %v12871_v7 = vmul.f32 0.5, %v5388_v6  ;;  %v5389_v15 = vmin.f32 %v5381_v12, 3.0  ;;  %v5368_v13 = vmul.f32 2.0, %v5360_v20  ;;  %v5361_v45 = vmax.f32 %v5353_v52, 0.0  ;;  %v11601_v6 = vld [vmem:[#allocation12 + $0x740] sm:$0xff]  }
 0x789   : > { %v12873_v16 = vmul.f32 0.5, %v5386_v30  ;;  %v5387_v58 = vmin.f32 %v5379_v10, 3.0  ;;  %v5366_v23 = vmul.f32 2.0, %v5358_v49  ;;  %v5359_v17 = vmax.f32 %v5351_v35, 0.0  ;;  %v11602_v49 = vld [vmem:[#allocation12 + $0x748] sm:$0xff]  }
 0x78a   : > { %5404 = vst [vmem:[#allocation3 + $0x31] sm:$0xff] %v12871_v7  ;;  %v12876_v24 = vmul.f32 0.5, %v5389_v15  ;;  %v11212_v42 = vround.rtne.f32 %v5368_v13  ;;  %v5369_v26 = vmul.f32 2.0, %v5361_v45  ;;  %v11603_v15 = vld [vmem:[#allocation12 + $0x750] sm:$0xff]   ;;  %v5694_v45 = vld [vmem:[#allocation3 + $0x2] sm:$0xff] }
 0x78b   : > { %5402 = vst [vmem:[#allocation3 + $0x11] sm:$0xff] %v12873_v16  ;;  %v12879_v3 = vmul.f32 0.5, %v5387_v58  ;;  %v11210_v61 = vround.rtne.f32 %v5366_v23  ;;  %v5367_v2 = vmul.f32 2.0, %v5359_v17  ;;  %v5447_v46 = vpack.c.bf16 %v12873_v16, %v5439_v19  ;;  %v11604_v23 = vld [vmem:[#allocation12 + $0x758] sm:$0xff]  }
 0x78c   : > { %5405 = vst [vmem:[#allocation3 + $0x41] sm:$0xff] %v12876_v24  ;;  %v5384_v59 = vmax.f32 %v11212_v42, 0.0  ;;  %v11213_v39 = vround.rtne.f32 %v5369_v26  ;;  %v6003_v54 = vpack.c.bf16 %v12876_v24, %v12871_v7  ;;  %v11605_v42 = vld [vmem:[#allocation12 + $0x760] sm:$0xff]   ;;  %v11606_v26 = vld [vmem:[#allocation12 + $0x768] sm:$0xff]  }
 0x78d   : > { %5403 = vst [vmem:[#allocation3 + $0x21] sm:$0xff] %v12879_v3  ;;  %v5382_v8 = vmax.f32 %v11210_v61, 0.0  ;;  %v11211_v28 = vround.rtne.f32 %v5367_v2  ;;  %10382 = vmatprep.mubr.bf16.mxu1 %v5447_v46  ;;  %v5448_v62 = vpack.c.bf16 %v12871_v7, %v12879_v3  ;;  %v6002_v18 = vpack.c.bf16 %v12879_v3, %v12873_v16  ;;  %v11607_v61 = vld [vmem:[#allocation12 + $0x770] sm:$0xff]   ;;  %v11608_v2 = vld [vmem:[#allocation12 + $0x778] sm:$0xff]   ;;  %v11609_v46 = vld [vmem:[#allocation12 + $0x780] sm:$0xff]  }
 0x78e   : > { %v5392_v11 = vmin.f32 %v5384_v59, 3.0  ;;  %v5385_v51 = vmax.f32 %v11213_v39, 0.0  ;;  %v11610_v39 = vld [vmem:[#allocation12 + $0x788] sm:$0xff]   ;;  %v11627_v16 = vld [vmem:[#allocation12 + $0x810] sm:$0xff]   ;;  %v11629_v7 = vld [vmem:[#allocation12 + $0x820] sm:$0xff]  }
 0x78f   : > { %v5390_v25 = vmin.f32 %v5382_v8, 3.0  ;;  %v5383_v63 = vmax.f32 %v11211_v28, 0.0  ;;  %10383 = vmatmul.mubr.bf16.vlgmr.msra.gmra.mrb[32].mxu1 %v5448_v62  ;;  %v11611_v28 = vld [vmem:[#allocation12 + $0x790] sm:$0xff]  }
 0x790   : > { %v12890_v47 = vmul.f32 0.5, %v5392_v11  ;;  %v5393_v4 = vmin.f32 %v5385_v51, 3.0  ;;  %10391 = vmatpush3.bf16.msra.mxu1 %v12868_v31  ;;  %v11612_v11 = vld [vmem:[#allocation12 + $0x798] sm:$0xff]  }
 0x791   : > { %v12893_v22 = vmul.f32 0.5, %v5390_v25  ;;  %v5391_v14 = vmin.f32 %v5383_v63, 3.0  ;;  %10392 = vmatprep.subr.bf16.mxu1 %v11594_v50  ;;  %v12905_v43 = vld [vmem:[#allocation3 + $0x32] sm:$0xff]  ;;  %v11613_v25 = vld [vmem:[#allocation12 + $0x7a0] sm:$0xff]   ;;  %v11614_v63 = vld [vmem:[#allocation12 + $0x7a8] sm:$0xff]  }
 0x792   : > { %5408 = vst [vmem:[#allocation3 + $0x71] sm:$0xff] %v12890_v47  ;;  %v12896_v38 = vmul.f32 0.5, %v5393_v4  ;;  %v12903_v53 = vld [vmem:[#allocation3 + $0x10] sm:$0xff] }
 0x793   : > { %5406 = vst [vmem:[#allocation3 + $0x51] sm:$0xff] %v12893_v22  ;;  %v12899_v55 = vmul.f32 0.5, %v5391_v14  ;;  %v5449_v27 = vpack.c.bf16 %v12893_v22, %v12876_v24  ;;  %v12907_v31 = vld [vmem:[#allocation3 + $0x42] sm:$0xff]  ;;  %v12921_v1 = vld [vmem:[#allocation3 + $0x12] sm:$0xff]  ;;  %v5418_v40 = vpack.c.bf16 %v12903_v53, %v12923_v5 }
 0x794   : > { %5409 = vst [vmem:[#allocation3 + $0x81] sm:$0xff] %v12896_v38  ;;  %10393 = vmatpush3.bf16.msra.mxu1 %v11594_v50  ;;  %v12910_v44 = vld [vmem:[#allocation3 + $0x22] sm:$0xff]  ;;  %v6005_v29 = vpack.c.bf16 %v12896_v38, %v12890_v47  ;;  %v6153_v48 = vpack.c.bf16 %v12907_v31, %v12905_v43  ;;  %v12940_v52 = vld [vmem:[#allocation3 + $0x30] sm:$0xff]  ;;  %v5702_v17 = vpack.c.bf16 %v12921_v1, %v5694_v45  ;;  %v11616_v14 = vld [vmem:[#allocation12 + $0x7b8] sm:$0xff]  }
 0x795   : > { %5407 = vst [vmem:[#allocation3 + $0x61] sm:$0xff] %v12899_v55  ;;  %10386 = vmatprep.mubr.bf16.mxu1 %v5449_v27  ;;  %10394 = vmatprep.subr.bf16.mxu1 %v11595_v36  ;;  %v12919_v60 = vpack.c.bf16 %v12890_v47, %v12899_v55  ;;  %v6004_v33 = vpack.c.bf16 %v12899_v55, %v12893_v22  ;;  %v5412_v12 = vld [vmem:[#allocation3 + $0x20] sm:$0xff]  ;;  %v11615_v4 = vld [vmem:[#allocation12 + $0x7b0] sm:$0xff]   ;;  %v11630_v24 = vld [vmem:[#allocation12 + $0x828] sm:$0xff]  }
 0x796   : > { %v6152_v32 = vpack.c.bf16 %v12910_v44, %v12921_v1  ;;  %v12943_v30 = vpack.c.bf16 %v12940_v52, %v5412_v12  ;;  %v12945_v10 = vld [vmem:[#allocation3 + $0x40] sm:$0xff]  ;;  %v12965_v59 = vpack.c.bf16 %v12905_v43, %v12910_v44  ;;  %v5852_v51 = vpack.c.bf16 %v5412_v12, %v12903_v53  ;;  %v11618_v53 = vld [vmem:[#allocation12 + $0x7c8] sm:$0xff]   ;;  %v11623_v12 = vld [vmem:[#allocation12 + $0x7f0] sm:$0xff]  }
 0x797   : > { %10387 = vmatmul.mubr.bf16.gmra.mrb[36].mxu1 %v12919_v60  ;;  %v5853_v27 = vpack.c.bf16 %v12945_v10, %v12940_v52  ;;  %v11625_v52 = vld [vmem:[#allocation12 + $0x800] sm:$0xff]   ;;  %v11632_v47 = vld [vmem:[#allocation12 + $0x838] sm:$0xff]   ;;  %v11634_v44 = vld [vmem:[#allocation12 + $0x848] sm:$0xff]  }
 0x798   : > { %10395 = vmatpush3.bf16.msra.mxu1 %v11595_v36  ;;  %10406 = vmatprep.mubr.bf16.mxu1 %v5418_v40  ;;  %v11617_v36 = vld [vmem:[#allocation12 + $0x7c0] sm:$0xff]   ;;  %v11619_v40 = vld [vmem:[#allocation12 + $0x7d0] sm:$0xff]   ;;  %v11644_v45 = vld [vmem:[#allocation12 + $0x898] sm:$0xff]  }
 0x799   : > { %10396 = vmatprep.subr.bf16.mxu1 %v11596_v21  ;;  %v12955_v19 = vld [vmem:[#allocation3 + $0x70] sm:$0xff]  ;;  %v11633_v55 = vld [vmem:[#allocation12 + $0x840] sm:$0xff]  }
 0x79a   : > { %v12932_v0 = vld [vmem:[#allocation3 + $0x52] sm:$0xff]  ;;  %v11637_v43 = vld [vmem:[#allocation12 + $0x860] sm:$0xff]  }
 0x79b   : > { %v12938_v20 = vld [vmem:[#allocation3 + $0x50] sm:$0xff]  ;;  %v12969_v8 = vpack.c.bf16 %v12932_v0, %v12907_v31  ;;  %v13010_v1 = vld [vmem:[#allocation3 + $0x82] sm:$0xff] }
 0x79c   : > { %10397 = vmatpush3.bf16.msra.mxu1 %v11596_v21  ;;  %v12934_v37 = vld [vmem:[#allocation3 + $0x62] sm:$0xff]  ;;  %v12949_v35 = vpack.c.bf16 %v12938_v20, %v12945_v10  ;;  %v12973_v62 = vld [vmem:[#allocation3 + $0x72] sm:$0xff] }
 0x79d   : > { %10398 = vmatprep.subr.bf16.mxu1 %v11597_v56  ;;  %v6154_v41 = vpack.c.bf16 %v12934_v37, %v12932_v0  ;;  %v12953_v13 = vld [vmem:[#allocation3 + $0x60] sm:$0xff]  ;;  %v12977_v50 = vpack.c.bf16 %v12973_v62, %v12934_v37  ;;  %v11626_v10 = vld [vmem:[#allocation12 + $0x808] sm:$0xff]   ;;  %v11640_v0 = vld [vmem:[#allocation12 + $0x878] sm:$0xff]  }
 0x79e   : > { %v12959_v58 = vpack.c.bf16 %v12955_v19, %v12953_v13  ;;  %v5854_v21 = vpack.c.bf16 %v12953_v13, %v12938_v20  ;;  %v11624_v20 = vld [vmem:[#allocation12 + $0x7f8] sm:$0xff]   ;;  %v11638_v31 = vld [vmem:[#allocation12 + $0x868] sm:$0xff]   ;;  %v11641_v37 = vld [vmem:[#allocation12 + $0x880] sm:$0xff]  }
 0x7a0   : > { %10399 = vmatpush3.bf16.msra.mxu1 %v11597_v56  ;;  %v12985_v56 = vld [vmem:[#allocation3 + $0x80] sm:$0xff] }
 0x7a1   : > { %10400 = vmatprep.subr.bf16.mxu1 %v11598_v9  ;;  %v6305_v13 = vpack.c.bf16 %v12923_v5, %v12985_v56 }
 0x7a4   : > { %10401 = vmatpush3.bf16.msra.mxu1 %v11598_v9  ;;  %v5855_v9 = vpack.c.bf16 %v12985_v56, %v12955_v19  ;;  %v13045_v56 = vld [vmem:[#allocation12 + $0xb20] sm:$0xff]  }
 0x7a5   : > { %10402 = vmatprep.subr.bf16.mxu1 %v11599_v57 }
 0x7a8   : > { %10403 = vmatpush3.bf16.msra.mxu1 %v11599_v57  ;;  %v11620_v57 = vld [vmem:[#allocation12 + $0x7d8] sm:$0xff]  }
 0x7a9   : > { %10404 = vmatprep.subr.bf16.mxu1 %v11600_v34 }
 0x7ac   : > { %10405 = vmatpush3.bf16.msra.mxu1 %v11600_v34  ;;  %v11621_v34 = vld [vmem:[#allocation12 + $0x7e0] sm:$0xff]  }
 0x7ad   : > { %10414 = vmatprep.subr.bf16.mxu1 %v11601_v6 }
 0x7af   : > { %10407 = vmatmul.mubr.bf16.vlgmr.msra.gmra.mrb[32].mxu1 %v12943_v30 }
 0x7b0   : > { %10410 = vmatprep.mubr.bf16.mxu1 %v12949_v35  ;;  %10415 = vmatpush3.bf16.msra.mxu1 %v11601_v6  ;;  %v11622_v6 = vld [vmem:[#allocation12 + $0x7e8] sm:$0xff]  }
 0x7b1   : > { %10416 = vmatprep.subr.bf16.mxu1 %v11602_v49 }
 0x7b4   : > { %10417 = vmatpush3.bf16.msra.mxu1 %v11602_v49  ;;  %v11657_v49 = vld [vmem:[#allocation12 + $0x940] sm:$0xff]  }
 0x7b5   : > { %10418 = vmatprep.subr.bf16.mxu1 %v11603_v15  ;;  %10582 = vmatprep.subr.bf16.mxu0 %v11657_v49 }
 0x7b6   : > { %10583 = vmatpush3.bf16.msra.mxu0 %v11657_v49 }
 0x7b7   : > { %10411 = vmatmul.mubr.bf16.gmra.mrb[36].mxu1 %v12959_v58 }
 0x7b8   : > { %10419 = vmatpush3.bf16.msra.mxu1 %v11603_v15  ;;  %10430 = vmatprep.mubr.bf16.mxu1 %v5702_v17  ;;  %v6445_v15 = vld [vmem:[#allocation3 + $0x31] sm:$0xff] }
 0x7b9   : > { %10420 = vmatprep.subr.bf16.mxu1 %v11604_v23  ;;  %v6452_v19 = vpack.c.bf16 %v6445_v15, %v12879_v3  ;;  %v11648_v17 = vld [vmem:[#allocation12 + $0x8b8] sm:$0xff]  }
 0x7bc   : > { %10421 = vmatpush3.bf16.msra.mxu1 %v11604_v23  ;;  %v11645_v23 = vld [vmem:[#allocation12 + $0x8a0] sm:$0xff]  }
 0x7bd   : > { %10422 = vmatprep.subr.bf16.mxu1 %v11605_v42 }
 0x7c0   : > { %10423 = vmatpush3.bf16.msra.mxu1 %v11605_v42  ;;  %v11649_v42 = vld [vmem:[#allocation12 + $0x8c0] sm:$0xff]  }
 0x7c1   : > { %10424 = vmatprep.subr.bf16.mxu1 %v11606_v26 }
 0x7c4   : > { %10425 = vmatpush3.bf16.msra.mxu1 %v11606_v26  ;;  %v6446_v26 = vld [vmem:[#allocation3 + $0x41] sm:$0xff] }
 0x7c5   : > { %10426 = vmatprep.subr.bf16.mxu1 %v11607_v61  ;;  %v6453_v3 = vpack.c.bf16 %v12893_v22, %v6446_v26  ;;  %v11653_v22 = vld [vmem:[#allocation12 + $0x8e0] sm:$0xff]  }
 0x7c8   : > { %10427 = vmatpush3.bf16.msra.mxu1 %v11607_v61  ;;  %v11650_v61 = vld [vmem:[#allocation12 + $0x8c8] sm:$0xff]  }
 0x7c9   : > { %10428 = vmatprep.subr.bf16.mxu1 %v11608_v2 }
 0x7cc   : > { %10429 = vmatpush3.bf16.msra.mxu1 %v11608_v2  ;;  %v11651_v2 = vld [vmem:[#allocation12 + $0x8d0] sm:$0xff]  }
 0x7cd   : > { %10438 = vmatprep.subr.bf16.mxu1 %v11609_v46 }
 0x7cf   : > { %10431 = vmatmul.mubr.bf16.vlgmr.msra.gmra.mrb[32].mxu1 %v12965_v59 }
 0x7d0   : > { %10434 = vmatprep.mubr.bf16.mxu1 %v12969_v8  ;;  %10439 = vmatpush3.bf16.msra.mxu1 %v11609_v46  ;;  %v6451_v46 = vld [vmem:[#allocation3 + $0x91] sm:$0xff] }
 0x7d1   : > { %10440 = vmatprep.subr.bf16.mxu1 %v11610_v39 }
 0x7d4   : > { %10441 = vmatpush3.bf16.msra.mxu1 %v11610_v39  ;;  %v6455_v39 = vpack.c.bf16 %v6451_v46, %v12896_v38  ;;  %v6601_v38 = vld [vmem:[#allocation3 + $0x92] sm:$0xff] }
 0x7d5   : > { %10442 = vmatprep.subr.bf16.mxu1 %v11611_v28 }
 0x7d7   : > { %10435 = vmatmul.mubr.bf16.gmra.mrb[36].mxu1 %v12977_v50 }
 0x7d8   : > { %10443 = vmatpush3.bf16.msra.mxu1 %v11611_v28  ;;  %10454 = vmatprep.mubr.bf16.mxu1 %v5852_v51  ;;  %v11652_v28 = vld [vmem:[#allocation12 + $0x8d8] sm:$0xff]   ;;  %v11658_v51 = vld [vmem:[#allocation12 + $0x948] sm:$0xff]  }
 0x7d9   : > { %10444 = vmatprep.subr.bf16.mxu1 %v11612_v11  ;;  %10584 = vmatprep.subr.bf16.mxu0 %v11658_v51 }
 0x7da   : > { %10585 = vmatpush3.bf16.msra.mxu0 %v11658_v51 }
 0x7dc   : > { %10445 = vmatpush3.bf16.msra.mxu1 %v11612_v11  ;;  %v11656_v11 = vld [vmem:[#allocation12 + $0x8f8] sm:$0xff]  }
 0x7dd   : > { %10446 = vmatprep.subr.bf16.mxu1 %v11613_v25 }
 0x7e0   : > { %10447 = vmatpush3.bf16.msra.mxu1 %v11613_v25  ;;  %v11659_v25 = vld [vmem:[#allocation12 + $0x950] sm:$0xff]  }
 0x7e1   : > { %10448 = vmatprep.subr.bf16.mxu1 %v11614_v63  ;;  %10586 = vmatprep.subr.bf16.mxu0 %v11659_v25 }
 0x7e2   : > { %10587 = vmatpush3.bf16.msra.mxu0 %v11659_v25 }
 0x7e4   : > { %10449 = vmatpush3.bf16.msra.mxu1 %v11614_v63  ;;  %v11661_v63 = vld [vmem:[#allocation12 + $0x958] sm:$0xff]  }
 0x7e5   : > { %10450 = vmatprep.subr.bf16.mxu1 %v11615_v4  ;;  %10588 = vmatprep.subr.bf16.mxu0 %v11661_v63 }
 0x7e6   : > { %10589 = vmatpush3.bf16.msra.mxu0 %v11661_v63 }
 0x7e8   : > { %10451 = vmatpush3.bf16.msra.mxu1 %v11615_v4  ;;  %v11663_v4 = vld [vmem:[#allocation12 + $0x960] sm:$0xff]  }
 0x7e9   : > { %10452 = vmatprep.subr.bf16.mxu1 %v11616_v14  ;;  %10590 = vmatprep.subr.bf16.mxu0 %v11663_v4 }
 0x7ea   : > { %10591 = vmatpush3.bf16.msra.mxu0 %v11663_v4  ;;  %v6856_v4 = vld [vmem:[#allocation2 + $0x1] sm:$0xff] }
 0x7ec   : > { %10453 = vmatpush3.bf16.msra.mxu1 %v11616_v14  ;;  %v13027_v14 = vld [vmem:[#allocation12 + $0xb00] sm:$0xff]  }
 0x7ed   : > { %10462 = vmatprep.subr.bf16.mxu1 %v11617_v36 }
 0x7ef   : > { %10455 = vmatmul.mubr.bf16.vlgmr.msra.gmra.mrb[32].mxu1 %v5853_v27  ;;  %v13035_v27 = vld [vmem:[#allocation12 + $0xb10] sm:$0xff]  }
 0x7f0   : > { %10458 = vmatprep.mubr.bf16.mxu1 %v5854_v21  ;;  %10463 = vmatpush3.bf16.msra.mxu1 %v11617_v36  ;;  %v11667_v36 = vld [vmem:[#allocation12 + $0x970] sm:$0xff]   ;;  %v13039_v21 = vld [vmem:[#allocation12 + $0xb18] sm:$0xff]  }
 0x7f1   : > { %10464 = vmatprep.subr.bf16.mxu1 %v11618_v53 }
 0x7f4   : > { %10465 = vmatpush3.bf16.msra.mxu1 %v11618_v53  ;;  %v11669_v53 = vld [vmem:[#allocation12 + $0x978] sm:$0xff]  }
 0x7f5   : > { %10466 = vmatprep.subr.bf16.mxu1 %v11619_v40 }
 0x7f7   : > { %10459 = vmatmul.mubr.bf16.gmra.mrb[36].mxu1 %v5855_v9  ;;  %v13050_v9 = vld [vmem:[#allocation12 + $0xb28] sm:$0xff]  }
 0x7f8   : > { %10467 = vmatpush3.bf16.msra.mxu1 %v11619_v40  ;;  %10478 = vmatprep.mubr.bf16.mxu1 %v6002_v18  ;;  %v11628_v18 = vld [vmem:[#allocation12 + $0x818] sm:$0xff]   ;;  %v13042_v40 = vld [vmem:[#allocation12 + $0x900] sm:$0xff]  }
 0x7f9   : > { %10468 = vmatprep.subr.bf16.mxu1 %v11620_v57 }
 0x7fc   : > { %10469 = vmatpush3.bf16.msra.mxu1 %v11620_v57  ;;  %v13052_v57 = vld [vmem:[#allocation12 + $0xb30] sm:$0xff]  }
 0x7fd   : > { %10470 = vmatprep.subr.bf16.mxu1 %v11621_v34 }
 0x800   : > { %10471 = vmatpush3.bf16.msra.mxu1 %v11621_v34  ;;  %v13057_v34 = vld [vmem:[#allocation12 + $0xb38] sm:$0xff]  }
 0x801   : > { %10472 = vmatprep.subr.bf16.mxu1 %v11622_v6 }
 0x804   : > { %10473 = vmatpush3.bf16.msra.mxu1 %v11622_v6  ;;  %v8895_v6 = vld [vmem:[#allocation13 + $0x8] ss:$0 sm:$0xff] }
 0x805   : > { %10474 = vmatprep.subr.bf16.mxu1 %v11623_v12 }
 0x808   : > { %10475 = vmatpush3.bf16.msra.mxu1 %v11623_v12 }
 0x809   : > { %10476 = vmatprep.subr.bf16.mxu1 %v11624_v20 }
 0x80c   : > { %10477 = vmatpush3.bf16.msra.mxu1 %v11624_v20  ;;  %v8896_v20 = vld [vmem:[#allocation13 + $0x9] ss:$0 sm:$0xff] }
 0x80d   : > { %10486 = vmatprep.subr.bf16.mxu1 %v11625_v52 }
 0x80f   : > { %10479 = vmatmul.mubr.bf16.vlgmr.msra.gmra.mrb[32].mxu1 %v6003_v54  ;;  %v11631_v54 = vld [vmem:[#allocation12 + $0x830] sm:$0xff]  }
 0x810   : > { %10482 = vmatprep.mubr.bf16.mxu1 %v6004_v33  ;;  %10487 = vmatpush3.bf16.msra.mxu1 %v11625_v52  ;;  %v6155_v33 = vpack.c.bf16 %v13010_v1, %v12973_v62  ;;  %v11654_v62 = vld [vmem:[#allocation12 + $0x8e8] sm:$0xff]  }
 0x811   : > { %10488 = vmatprep.subr.bf16.mxu1 %v11626_v10 }
 0x814   : > { %10489 = vmatpush3.bf16.msra.mxu1 %v11626_v10 }
 0x815   : > { %10490 = vmatprep.subr.bf16.mxu1 %v11627_v16 }
 0x817   : > { %10483 = vmatmul.mubr.bf16.gmra.mrb[36].mxu1 %v6005_v29  ;;  %v11635_v29 = vld [vmem:[#allocation12 + $0x850] sm:$0xff]  }
 0x818   : > { %10491 = vmatpush3.bf16.msra.mxu1 %v11627_v16  ;;  %10502 = vmatprep.mubr.bf16.mxu1 %v6152_v32  ;;  %v11636_v32 = vld [vmem:[#allocation12 + $0x858] sm:$0xff]  }
 0x819   : > { %10492 = vmatprep.subr.bf16.mxu1 %v11628_v18 }
 0x81c   : > { %10493 = vmatpush3.bf16.msra.mxu1 %v11628_v18 }
 0x81d   : > { %10494 = vmatprep.subr.bf16.mxu1 %v11629_v7 }
 0x820   : > { %10495 = vmatpush3.bf16.msra.mxu1 %v11629_v7 }
 0x821   : > { %10496 = vmatprep.subr.bf16.mxu1 %v11630_v24 }
 0x824   : > { %10497 = vmatpush3.bf16.msra.mxu1 %v11630_v24 }
 0x825   : > { %10498 = vmatprep.subr.bf16.mxu1 %v11631_v54 }
 0x828   : > { %10499 = vmatpush3.bf16.msra.mxu1 %v11631_v54 }
 0x829   : > { %10500 = vmatprep.subr.bf16.mxu1 %v11632_v47 }
 0x82c   : > { %10501 = vmatpush3.bf16.msra.mxu1 %v11632_v47 }
 0x82d   : > { %10510 = vmatprep.subr.bf16.mxu1 %v11633_v55 }
 0x82f   : > { %10503 = vmatmul.mubr.bf16.vlgmr.msra.gmra.mrb[32].mxu1 %v6153_v48  ;;  %v11639_v48 = vld [vmem:[#allocation12 + $0x870] sm:$0xff]  }
 0x830   : > { %10506 = vmatprep.mubr.bf16.mxu1 %v6154_v41  ;;  %10511 = vmatpush3.bf16.msra.mxu1 %v11633_v55  ;;  %v11642_v41 = vld [vmem:[#allocation12 + $0x888] sm:$0xff]  }
 0x831   : > { %10512 = vmatprep.subr.bf16.mxu1 %v11634_v44 }
 0x834   : > { %10513 = vmatpush3.bf16.msra.mxu1 %v11634_v44 }
 0x835   : > { %10514 = vmatprep.subr.bf16.mxu1 %v11635_v29 }
 0x837   : > { %10507 = vmatmul.mubr.bf16.gmra.mrb[36].mxu1 %v6155_v33 }
 0x838   : > { %10515 = vmatpush3.bf16.msra.mxu1 %v11635_v29  ;;  %10526 = vmatprep.mubr.bf16.mxu1 %v12943_v30  ;;  %v11643_v30 = vld [vmem:[#allocation12 + $0x890] sm:$0xff]  }
 0x839   : > { %10516 = vmatprep.subr.bf16.mxu1 %v11636_v32 }
 0x83c   : > { %10517 = vmatpush3.bf16.msra.mxu1 %v11636_v32 }
 0x83d   : > { %10518 = vmatprep.subr.bf16.mxu1 %v11637_v43 }
 0x840   : > { %10519 = vmatpush3.bf16.msra.mxu1 %v11637_v43 }
 0x841   : > { %10520 = vmatprep.subr.bf16.mxu1 %v11638_v31 }
 0x844   : > { %10521 = vmatpush3.bf16.msra.mxu1 %v11638_v31 }
 0x845   : > { %10522 = vmatprep.subr.bf16.mxu1 %v11639_v48 }
 0x848   : > { %10523 = vmatpush3.bf16.msra.mxu1 %v11639_v48 }
 0x849   : > { %10524 = vmatprep.subr.bf16.mxu1 %v11640_v0 }
 0x84c   : > { %10525 = vmatpush3.bf16.msra.mxu1 %v11640_v0 }
 0x84d   : > { %10534 = vmatprep.subr.bf16.mxu1 %v11641_v37 }
 0x84f   : > { %10527 = vmatmul.mubr.bf16.vlgmr.msra.gmra.mrb[32].mxu1 %v12949_v35  ;;  %v11646_v35 = vld [vmem:[#allocation12 + $0x8a8] sm:$0xff]  }
 0x850   : > { %10530 = vmatprep.mubr.bf16.mxu1 %v12959_v58  ;;  %10535 = vmatpush3.bf16.msra.mxu1 %v11641_v37  ;;  %v11647_v58 = vld [vmem:[#allocation12 + $0x8b0] sm:$0xff]  }
 0x851   : > { %10536 = vmatprep.subr.bf16.mxu1 %v11642_v41 }
 0x854   : > { %10537 = vmatpush3.bf16.msra.mxu1 %v11642_v41 }
 0x855   : > { %10538 = vmatprep.subr.bf16.mxu1 %v11643_v30 }
 0x857   : > { %10531 = vmatmul.mubr.bf16.gmra.mrb[36].mxu1 %v6305_v13 }
 0x858   : > { %10539 = vmatpush3.bf16.msra.mxu1 %v11643_v30  ;;  %10550 = vmatprep.mubr.bf16.mxu1 %v6452_v19 }
 0x859   : > { %10540 = vmatprep.subr.bf16.mxu1 %v11644_v45 }
 0x85c   : > { %10541 = vmatpush3.bf16.msra.mxu1 %v11644_v45 }
 0x85d   : > { %10542 = vmatprep.subr.bf16.mxu1 %v11645_v23 }
 0x860   : > { %10543 = vmatpush3.bf16.msra.mxu1 %v11645_v23 }
 0x861   : > { %10544 = vmatprep.subr.bf16.mxu1 %v11646_v35 }
 0x864   : > { %10545 = vmatpush3.bf16.msra.mxu1 %v11646_v35 }
 0x865   : > { %10546 = vmatprep.subr.bf16.mxu1 %v11647_v58 }
 0x868   : > { %10547 = vmatpush3.bf16.msra.mxu1 %v11647_v58 }
 0x869   : > { %10548 = vmatprep.subr.bf16.mxu1 %v11648_v17 }
 0x86c   : > { %10549 = vmatpush3.bf16.msra.mxu1 %v11648_v17 }
 0x86d   : > { %10558 = vmatprep.subr.bf16.mxu1 %v11649_v42 }
 0x86f   : > { %10551 = vmatmul.mubr.bf16.vlgmr.msra.gmra.mrb[32].mxu1 %v6453_v3 }
 0x870   : > { %10554 = vmatprep.mubr.bf16.mxu1 %v12919_v60  ;;  %10559 = vmatpush3.bf16.msra.mxu1 %v11649_v42  ;;  %v11655_v60 = vld [vmem:[#allocation12 + $0x8f0] sm:$0xff]  }
 0x871   : > { %10560 = vmatprep.subr.bf16.mxu1 %v11650_v61 }
 0x874   : > { %10561 = vmatpush3.bf16.msra.mxu1 %v11650_v61 }
 0x875   : > { %10562 = vmatprep.subr.bf16.mxu1 %v11651_v2 }
 0x877   : > { %10555 = vmatmul.mubr.bf16.gmra.mrb[36].mxu1 %v6455_v39 }
 0x878   : > { %10563 = vmatpush3.bf16.msra.mxu1 %v11651_v2  ;;  %10574 = vmatprep.mubr.bf16.mxu1 %v12965_v59  ;;  %v6605_v59 = vpack.c.bf16 %v6601_v38, %v13010_v1 }
 0x879   : > { %10564 = vmatprep.subr.bf16.mxu1 %v11652_v28 }
 0x87c   : > { %10565 = vmatpush3.bf16.msra.mxu1 %v11652_v28 }
 0x87d   : > { %10566 = vmatprep.subr.bf16.mxu1 %v11653_v22 }
 0x880   : > { %10567 = vmatpush3.bf16.msra.mxu1 %v11653_v22 }
 0x881   : > { %10568 = vmatprep.subr.bf16.mxu1 %v11654_v62 }
 0x884   : > { %10569 = vmatpush3.bf16.msra.mxu1 %v11654_v62 }
 0x885   : > { %10570 = vmatprep.subr.bf16.mxu1 %v11655_v60 }
 0x888   : > { %10571 = vmatpush3.bf16.msra.mxu1 %v11655_v60 }
 0x889   : > { %10572 = vmatprep.subr.bf16.mxu1 %v11656_v11 }
 0x88c   : > { %10573 = vmatpush3.bf16.msra.mxu1 %v11656_v11 }
 0x88d   : > { %10798 = vmatprep.subr.bf16.mxu1 %v13027_v14 }
 0x88f   : > { %10575 = vmatmul.mubr.bf16.vlgmr.msra.gmra.mrb[32].mxu1 %v12969_v8  ;;  %v11665_v8 = vld [vmem:[#allocation12 + $0x968] sm:$0xff]  }
 0x890   : > { %10578 = vmatprep.mubr.bf16.mxu1 %v12977_v50  ;;  %10806 = vmatpush3.bf16.msra.mxu1 %v13027_v14  ;;  %v13031_v50 = vld [vmem:[#allocation12 + $0xb08] sm:$0xff]  }
 0x891   : > { %10592 = vmatprep.subr.bf16.mxu0 %v11665_v8  ;;  %10799 = vmatprep.subr.bf16.mxu1 %v13031_v50 }
 0x892   : > { %10593 = vmatpush3.bf16.msra.mxu0 %v11665_v8 }
 0x893   : > { %10594 = vmatprep.subr.bf16.mxu0 %v11667_v36 }
 0x894   : > { %10807 = vmatpush3.bf16.msra.mxu1 %v13031_v50 }
 0x895   : > { %10800 = vmatprep.subr.bf16.mxu1 %v13035_v27 }
 0x896   : > { %10595 = vmatpush3.bf16.msra.mxu0 %v11667_v36 }
 0x897   : > { %10579 = vmatmul.mubr.bf16.gmra.mrb[36].mxu1 %v6605_v59  ;;  %10596 = vmatprep.subr.bf16.mxu0 %v11669_v53 }
 0x898   : > { %10808 = vmatpush3.bf16.msra.mxu1 %v13035_v27 }
 0x899   : > { %10801 = vmatprep.subr.bf16.mxu1 %v13039_v21 }
 0x89a   : > { %10597 = vmatpush3.bf16.msra.mxu0 %v11669_v53 }
 0x89b   : > { %10606 = vmatprep.subr.bf16.mxu0 %v13042_v40 }
 0x89c   : > { %10809 = vmatpush3.bf16.msra.mxu1 %v13039_v21 }
 0x89d   : > { %10802 = vmatprep.subr.bf16.mxu1 %v13045_v56 }
 0x8a0   : > { %10810 = vmatpush3.bf16.msra.mxu1 %v13045_v56 }
 0x8a1   : > { %10803 = vmatprep.subr.bf16.mxu1 %v13050_v9 }
 0x8a4   : > { %10811 = vmatpush3.bf16.msra.mxu1 %v13050_v9 }
 0x8a5   : > { %10804 = vmatprep.subr.bf16.mxu1 %v13052_v57 }
 0x8a8   : > { %10812 = vmatpush3.bf16.msra.mxu1 %v13052_v57 }
 0x8a9   : > { %10805 = vmatprep.subr.bf16.mxu1 %v13057_v34 }
 0x8ac   : > { %10813 = vmatpush3.bf16.msra.mxu1 %v13057_v34 }
 0x962   : > { %v10576_v12 = vpop.f32.mrb[32].mxu1 }
 0x963   : > { %v6752_v52 = vmul.f32 %v10576_v12, %v8895_v6  ;;  %v6705_v10 = vpop.f32.mrb[33].mxu1 }
 0x964   : > { %v6750_v16 = vmul.f32 %v8895_v6, %v6705_v10  ;;  %v10577_v18 = vpop.f32.mrb[34].mxu1 }
 0x965   : > { %v6765_v49 = vadd.f32 %v8896_v20, %v6752_v52  ;;  %v6753_v7 = vmul.f32 %v10577_v18, %v8895_v6  ;;  %v6708_v24 = vpop.f32.mrb[35].mxu1 }
 0x966   : > { %v6763_v54 = vadd.f32 %v8896_v20, %v6750_v16  ;;  %v6751_v47 = vmul.f32 %v8895_v6, %v6708_v24 }
 0x967   : > { %v6773_v55 = vmax.f32 %v6765_v49, 0.0  ;;  %v6766_v44 = vadd.f32 %v8896_v20, %v6753_v7 }
 0x968   : > { %v6771_v29 = vmax.f32 %v6763_v54, 0.0  ;;  %v6764_v1 = vadd.f32 %v8896_v20, %v6751_v47 }
 0x969   : > { %v6781_v33 = vmul.f32 2.0, %v6773_v55  ;;  %v6774_v32 = vmax.f32 %v6766_v44, 0.0 }
 0x96a   : > { %v6779_v43 = vmul.f32 2.0, %v6771_v29  ;;  %v6772_v31 = vmax.f32 %v6764_v1, 0.0  ;;  %v10580_v48 = vpop.f32.mrb[36].mxu1  ;;  %v11673_v29 = vld [vmem:[#allocation12 + $0x908] sm:$0xff]  }
 0x96b   : > { %v11216_v0 = vround.rtne.f32 %v6781_v33  ;;  %v6782_v37 = vmul.f32 2.0, %v6774_v32  ;;  %v6756_v41 = vmul.f32 %v10580_v48, %v8895_v6  ;;  %v6721_v30 = vpop.f32.mrb[37].mxu1 }
 0x96c   : > { %v11214_v15 = vround.rtne.f32 %v6779_v43  ;;  %v6780_v13 = vmul.f32 2.0, %v6772_v31  ;;  %v6754_v45 = vmul.f32 %v8895_v6, %v6721_v30  ;;  %v10581_v19 = vpop.f32.mrb[38].mxu1  ;;  %v11675_v30 = vld [vmem:[#allocation12 + $0x910] sm:$0xff]  }
 0x96d   : > { %v6797_v23 = vmax.f32 %v11216_v0, 0.0  ;;  %v11217_v35 = vround.rtne.f32 %v6782_v37  ;;  %v6769_v58 = vadd.f32 %v8896_v20, %v6756_v41  ;;  %v6757_v17 = vmul.f32 %v10581_v19, %v8895_v6  ;;  %v6724_v42 = vpop.f32.mrb[39].mxu1 }
 0x96e   : > { %v6795_v26 = vmax.f32 %v11214_v15, 0.0  ;;  %v11215_v3 = vround.rtne.f32 %v6780_v13  ;;  %v6767_v61 = vadd.f32 %v8896_v20, %v6754_v45  ;;  %v6755_v2 = vmul.f32 %v8895_v6, %v6724_v42 }
 0x96f   : > { %v6805_v46 = vmin.f32 %v6797_v23, 3.0  ;;  %v6798_v39 = vmax.f32 %v11217_v35, 0.0  ;;  %v6777_v28 = vmax.f32 %v6769_v58, 0.0  ;;  %v6770_v22 = vadd.f32 %v8896_v20, %v6757_v17 }
 0x970   : > { %v6803_v62 = vmin.f32 %v6795_v26, 3.0  ;;  %v6796_v60 = vmax.f32 %v11215_v3, 0.0  ;;  %v6775_v11 = vmax.f32 %v6767_v61, 0.0  ;;  %v6768_v38 = vadd.f32 %v8896_v20, %v6755_v2  ;;  %v11676_v26 = vld [vmem:[#allocation12 + $0x918] sm:$0xff]  }
 0x971   : > { %v13062_v59 = vmul.f32 0.5, %v6805_v46  ;;  %v6806_v51 = vmin.f32 %v6798_v39, 3.0  ;;  %v6785_v25 = vmul.f32 2.0, %v6777_v28  ;;  %v6778_v63 = vmax.f32 %v6770_v22, 0.0  ;;  %v11677_v39 = vld [vmem:[#allocation12 + $0x920] sm:$0xff]  }
 0x972   : > { %v13064_v8 = vmul.f32 0.5, %v6803_v62  ;;  %v6804_v36 = vmin.f32 %v6796_v60, 3.0  ;;  %v6783_v53 = vmul.f32 2.0, %v6775_v11  ;;  %v6776_v12 = vmax.f32 %v6768_v38, 0.0  ;;  %v8018_v62 = vld [vmem:[#allocation2 + $0x92] sm:$0xff] }
 0x973   : > { %6821 = vst [vmem:[#allocation2 + $0x31] sm:$0xff] %v13062_v59  ;;  %v13067_v6 = vmul.f32 0.5, %v6806_v51  ;;  %v11220_v52 = vround.rtne.f32 %v6785_v25  ;;  %v6786_v10 = vmul.f32 2.0, %v6778_v63  ;;  %v11678_v51 = vld [vmem:[#allocation12 + $0x928] sm:$0xff]  }
 0x974   : > { %6819 = vst [vmem:[#allocation2 + $0x11] sm:$0xff] %v13064_v8  ;;  %v13070_v20 = vmul.f32 0.5, %v6804_v36  ;;  %v11218_v16 = vround.rtne.f32 %v6783_v53  ;;  %v6784_v18 = vmul.f32 2.0, %v6776_v12  ;;  %v6864_v49 = vpack.c.bf16 %v13064_v8, %v6856_v4  ;;  %v11679_v4 = vld [vmem:[#allocation12 + $0x930] sm:$0xff]   ;;  %v11680_v36 = vld [vmem:[#allocation12 + $0x938] sm:$0xff]   ;;  %v11681_v53 = vld [vmem:[#allocation12 + $0x980] sm:$0xff]  }
 0x975   : > { %6822 = vst [vmem:[#allocation2 + $0x41] sm:$0xff] %v13067_v6  ;;  %v6801_v7 = vmax.f32 %v11220_v52, 0.0  ;;  %v11221_v24 = vround.rtne.f32 %v6786_v10  ;;  %v7420_v54 = vpack.c.bf16 %v13067_v6, %v13062_v59 }
 0x976   : > { %6820 = vst [vmem:[#allocation2 + $0x21] sm:$0xff] %v13070_v20  ;;  %v6799_v47 = vmax.f32 %v11218_v16, 0.0  ;;  %v11219_v55 = vround.rtne.f32 %v6784_v18  ;;  %10598 = vmatprep.mubr.bf16.mxu0 %v6864_v49  ;;  %v6865_v44 = vpack.c.bf16 %v13062_v59, %v13070_v20  ;;  %v7419_v1 = vpack.c.bf16 %v13070_v20, %v13064_v8  ;;  %v11682_v49 = vld [vmem:[#allocation12 + $0x988] sm:$0xff]   ;;  %v11707_v8 = vld [vmem:[#allocation12 + $0xa50] sm:$0xff]   ;;  %v11709_v59 = vld [vmem:[#allocation12 + $0xa60] sm:$0xff]  }
 0x977   : > { %v6809_v33 = vmin.f32 %v6801_v7, 3.0  ;;  %v6802_v32 = vmax.f32 %v11221_v24, 0.0  ;;  %v11683_v24 = vld [vmem:[#allocation12 + $0x990] sm:$0xff]  }
 0x978   : > { %v6807_v43 = vmin.f32 %v6799_v47, 3.0  ;;  %v6800_v31 = vmax.f32 %v11219_v55, 0.0  ;;  %10599 = vmatmul.mubr.bf16.vlgmr.msra.gmra.mrb[16].mxu0 %v6865_v44  ;;  %v7111_v55 = vld [vmem:[#allocation2 + $0x2] sm:$0xff] }
 0x979   : > { %v13081_v48 = vmul.f32 0.5, %v6809_v33  ;;  %v6810_v0 = vmin.f32 %v6802_v32, 3.0  ;;  %10607 = vmatpush3.bf16.msra.mxu0 %v13042_v40  ;;  %v11684_v33 = vld [vmem:[#allocation12 + $0x998] sm:$0xff]  }
 0x97a   : > { %v13084_v37 = vmul.f32 0.5, %v6807_v43  ;;  %v6808_v41 = vmin.f32 %v6800_v31, 3.0  ;;  %10608 = vmatprep.subr.bf16.mxu0 %v11673_v29  ;;  %v13096_v23 = vld [vmem:[#allocation2 + $0x32] sm:$0xff]  ;;  %v11685_v43 = vld [vmem:[#allocation12 + $0x9a0] sm:$0xff]   ;;  %v11686_v31 = vld [vmem:[#allocation12 + $0x9a8] sm:$0xff]  }
 0x97b   : > { %6825 = vst [vmem:[#allocation2 + $0x71] sm:$0xff] %v13081_v48  ;;  %v13087_v15 = vmul.f32 0.5, %v6810_v0  ;;  %v13094_v19 = vld [vmem:[#allocation2 + $0x10] sm:$0xff] }
 0x97c   : > { %6823 = vst [vmem:[#allocation2 + $0x51] sm:$0xff] %v13084_v37  ;;  %v13090_v13 = vmul.f32 0.5, %v6808_v41  ;;  %v6866_v45 = vpack.c.bf16 %v13084_v37, %v13067_v6  ;;  %v13098_v40 = vld [vmem:[#allocation2 + $0x42] sm:$0xff]  ;;  %v13112_v3 = vld [vmem:[#allocation2 + $0x12] sm:$0xff]  ;;  %v6835_v61 = vpack.c.bf16 %v13094_v19, %v12923_v5 }
 0x97d   : > { %6826 = vst [vmem:[#allocation2 + $0x81] sm:$0xff] %v13087_v15  ;;  %10609 = vmatpush3.bf16.msra.mxu0 %v11673_v29  ;;  %v13101_v35 = vld [vmem:[#allocation2 + $0x22] sm:$0xff]  ;;  %v7422_v58 = vpack.c.bf16 %v13087_v15, %v13081_v48  ;;  %v7570_v17 = vpack.c.bf16 %v13098_v40, %v13096_v23  ;;  %v13141_v10 = vld [vmem:[#allocation2 + $0x30] sm:$0xff]  ;;  %v7119_v32 = vpack.c.bf16 %v13112_v3, %v7111_v55  ;;  %v11688_v41 = vld [vmem:[#allocation12 + $0x9b8] sm:$0xff]  }
 0x97e   : > { %6824 = vst [vmem:[#allocation2 + $0x61] sm:$0xff] %v13090_v13  ;;  %10602 = vmatprep.mubr.bf16.mxu0 %v6866_v45  ;;  %10610 = vmatprep.subr.bf16.mxu0 %v11675_v30  ;;  %v13110_v42 = vpack.c.bf16 %v13081_v48, %v13090_v13  ;;  %v7421_v2 = vpack.c.bf16 %v13090_v13, %v13084_v37  ;;  %v6829_v12 = vld [vmem:[#allocation2 + $0x20] sm:$0xff]  ;;  %v11687_v0 = vld [vmem:[#allocation12 + $0x9b0] sm:$0xff]   ;;  %v11710_v6 = vld [vmem:[#allocation12 + $0xa68] sm:$0xff]  }
 0x97f   : > { %v7569_v46 = vpack.c.bf16 %v13101_v35, %v13112_v3  ;;  %v13144_v16 = vpack.c.bf16 %v13141_v10, %v6829_v12  ;;  %v13146_v18 = vld [vmem:[#allocation2 + $0x40] sm:$0xff]  ;;  %v13163_v45 = vpack.c.bf16 %v13096_v23, %v13101_v35  ;;  %v11712_v13 = vld [vmem:[#allocation12 + $0xa78] sm:$0xff]   ;;  %v11715_v35 = vld [vmem:[#allocation12 + $0xa90] sm:$0xff]  }
 0x980   : > { %10603 = vmatmul.mubr.bf16.gmra.mrb[20].mxu0 %v13110_v42  ;;  %v11713_v48 = vld [vmem:[#allocation12 + $0xa80] sm:$0xff]   ;;  %v11716_v3 = vld [vmem:[#allocation12 + $0xa98] sm:$0xff]  }
 0x981   : > { %10611 = vmatpush3.bf16.msra.mxu0 %v11675_v30  ;;  %10622 = vmatprep.mubr.bf16.mxu0 %v6835_v61  ;;  %v11689_v30 = vld [vmem:[#allocation12 + $0x9c0] sm:$0xff]  }
 0x982   : > { %10612 = vmatprep.subr.bf16.mxu0 %v11676_v26  ;;  %v13121_v28 = vld [vmem:[#allocation2 + $0x72] sm:$0xff]  ;;  %v11717_v23 = vld [vmem:[#allocation12 + $0xaa0] sm:$0xff]  }
 0x983   : > { %v13127_v5 = vld [vmem:[#allocation2 + $0x52] sm:$0xff] }
 0x984   : > { %v13123_v22 = vld [vmem:[#allocation2 + $0x82] sm:$0xff]  ;;  %v13139_v52 = vld [vmem:[#allocation2 + $0x50] sm:$0xff]  ;;  %v13167_v61 = vpack.c.bf16 %v13127_v5, %v13098_v40 }
 0x985   : > { %v13125_v60 = vld [vmem:[#allocation2 + $0x62] sm:$0xff]  ;;  %10613 = vmatpush3.bf16.msra.mxu0 %v11676_v26  ;;  %v7572_v11 = vpack.c.bf16 %v13123_v22, %v13121_v28  ;;  %v8022_v63 = vpack.c.bf16 %v8018_v62, %v13123_v22  ;;  %v13150_v7 = vpack.c.bf16 %v13139_v52, %v13146_v18  ;;  %v13154_v44 = vld [vmem:[#allocation2 + $0x70] sm:$0xff]  ;;  %v11692_v62 = vld [vmem:[#allocation12 + $0x9d8] sm:$0xff]  }
 0x986   : > { %v13133_v38 = vpack.c.bf16 %v13121_v28, %v13125_v60  ;;  %10614 = vmatprep.subr.bf16.mxu0 %v11677_v39  ;;  %v7571_v25 = vpack.c.bf16 %v13125_v60, %v13127_v5  ;;  %v6833_v47 = vld [vmem:[#allocation2 + $0x60] sm:$0xff]  ;;  %v11690_v26 = vld [vmem:[#allocation12 + $0x9c8] sm:$0xff]   ;;  %v11723_v22 = vld [vmem:[#allocation12 + $0xad0] sm:$0xff]  }
 0x987   : > { %v13157_v29 = vpack.c.bf16 %v13154_v44, %v6833_v47  ;;  %v13176_v55 = vld [vmem:[#allocation2 + $0x80] sm:$0xff]  ;;  %v11718_v40 = vld [vmem:[#allocation12 + $0xaa8] sm:$0xff]   ;;  %v7862_v60 = vld [vmem:[#allocation2 + $0x31] sm:$0xff] }
 0x988   : > { %10794 = vmatprep.mubr.bf16.mxu1 %v13133_v38  ;;  %v11722_v28 = vld [vmem:[#allocation12 + $0xac8] sm:$0xff]   ;;  %v11732_v5 = vld [vmem:[#allocation2] sm:$0xff] }
 0x989   : > { %10795 = vmatmul.mubr.bf16.vlgmr.msra.gmra.mrb[40].mxu1 %v8022_v63  ;;  %10615 = vmatpush3.bf16.msra.mxu0 %v11677_v39  ;;  %v11691_v39 = vld [vmem:[#allocation12 + $0x9d0] sm:$0xff]   ;;  %v11693_v63 = vld [vmem:[#allocation12 + $0x9e0] sm:$0xff]  }
 0x98a   : > { %10616 = vmatprep.subr.bf16.mxu0 %v11678_v51 }
 0x98d   : > { %10617 = vmatpush3.bf16.msra.mxu0 %v11678_v51  ;;  %v7269_v51 = vpack.c.bf16 %v6829_v12, %v13094_v19  ;;  %v7270_v19 = vpack.c.bf16 %v13146_v18, %v13141_v10  ;;  %v7271_v12 = vpack.c.bf16 %v6833_v47, %v13139_v52  ;;  %v11701_v52 = vld [vmem:[#allocation12 + $0xa20] sm:$0xff]   ;;  %v11702_v10 = vld [vmem:[#allocation12 + $0xa28] sm:$0xff]   ;;  %v11703_v18 = vld [vmem:[#allocation12 + $0xa30] sm:$0xff]  }
 0x98e   : > { %10618 = vmatprep.subr.bf16.mxu0 %v11679_v4  ;;  %v11704_v47 = vld [vmem:[#allocation12 + $0xa38] sm:$0xff]  }
 0x991   : > { %10619 = vmatpush3.bf16.msra.mxu0 %v11679_v4  ;;  %v11694_v4 = vld [vmem:[#allocation12 + $0x9e8] sm:$0xff]  }
 0x992   : > { %10620 = vmatprep.subr.bf16.mxu0 %v11680_v36 }
 0x995   : > { %10621 = vmatpush3.bf16.msra.mxu0 %v11680_v36  ;;  %v11695_v36 = vld [vmem:[#allocation12 + $0x9f0] sm:$0xff]  }
 0x996   : > { %10630 = vmatprep.subr.bf16.mxu0 %v11681_v53 }
 0x998   : > { %10623 = vmatmul.mubr.bf16.vlgmr.msra.gmra.mrb[16].mxu0 %v13144_v16 }
 0x999   : > { %10626 = vmatprep.mubr.bf16.mxu0 %v13150_v7  ;;  %10631 = vmatpush3.bf16.msra.mxu0 %v11681_v53  ;;  %v11696_v53 = vld [vmem:[#allocation12 + $0x9f8] sm:$0xff]  }
 0x99a   : > { %10632 = vmatprep.subr.bf16.mxu0 %v11682_v49 }
 0x99d   : > { %10633 = vmatpush3.bf16.msra.mxu0 %v11682_v49  ;;  %v11697_v49 = vld [vmem:[#allocation12 + $0xa00] sm:$0xff]  }
 0x99e   : > { %10634 = vmatprep.subr.bf16.mxu0 %v11683_v24 }
 0x9a0   : > { %10627 = vmatmul.mubr.bf16.gmra.mrb[20].mxu0 %v13157_v29 }
 0x9a1   : > { %10635 = vmatpush3.bf16.msra.mxu0 %v11683_v24  ;;  %10646 = vmatprep.mubr.bf16.mxu0 %v7119_v32  ;;  %v11699_v24 = vld [vmem:[#allocation12 + $0xa10] sm:$0xff]   ;;  %v11700_v32 = vld [vmem:[#allocation12 + $0xa18] sm:$0xff]  }
 0x9a2   : > { %10636 = vmatprep.subr.bf16.mxu0 %v11684_v33 }
 0x9a5   : > { %10637 = vmatpush3.bf16.msra.mxu0 %v11684_v33  ;;  %v7272_v33 = vpack.c.bf16 %v13176_v55, %v13154_v44  ;;  %v11705_v44 = vld [vmem:[#allocation12 + $0xa40] sm:$0xff]  }
 0x9a6   : > { %10638 = vmatprep.subr.bf16.mxu0 %v11685_v43 }
 0x9a9   : > { %10639 = vmatpush3.bf16.msra.mxu0 %v11685_v43  ;;  %v11706_v43 = vld [vmem:[#allocation12 + $0xa48] sm:$0xff]  }
 0x9aa   : > { %10640 = vmatprep.subr.bf16.mxu0 %v11686_v31 }
 0x9ad   : > { %10641 = vmatpush3.bf16.msra.mxu0 %v11686_v31  ;;  %v11725_v31 = vld [vmem:[#allocation12 + $0xae0] sm:$0xff]  }
 0x9ae   : > { %10642 = vmatprep.subr.bf16.mxu0 %v11687_v0 }
 0x9b1   : > { %10643 = vmatpush3.bf16.msra.mxu0 %v11687_v0  ;;  %v11728_v0 = vld [vmem:[#allocation12 + $0xaf8] sm:$0xff]  }
 0x9b2   : > { %10644 = vmatprep.subr.bf16.mxu0 %v11688_v41 }
 0x9b5   : > { %10645 = vmatpush3.bf16.msra.mxu0 %v11688_v41  ;;  %v7863_v41 = vld [vmem:[#allocation2 + $0x41] sm:$0xff] }
 0x9b6   : > { %10654 = vmatprep.subr.bf16.mxu0 %v11689_v30 }
 0x9b8   : > { %10647 = vmatmul.mubr.bf16.vlgmr.msra.gmra.mrb[16].mxu0 %v13163_v45 }
 0x9b9   : > { %10650 = vmatprep.mubr.bf16.mxu0 %v13167_v61  ;;  %10655 = vmatpush3.bf16.msra.mxu0 %v11689_v30  ;;  %v7868_v30 = vld [vmem:[#allocation2 + $0x91] sm:$0xff] }
 0x9ba   : > { %10656 = vmatprep.subr.bf16.mxu0 %v11690_v26 }
 0x9bd   : > { %10657 = vmatpush3.bf16.msra.mxu0 %v11690_v26 }
 0x9be   : > { %10658 = vmatprep.subr.bf16.mxu0 %v11691_v39 }
 0x9c0   : > { %10651 = vmatmul.mubr.bf16.gmra.mrb[20].mxu0 %v13133_v38  ;;  %v11698_v38 = vld [vmem:[#allocation12 + $0xa08] sm:$0xff]  }
 0x9c1   : > { %10659 = vmatpush3.bf16.msra.mxu0 %v11691_v39  ;;  %10670 = vmatprep.mubr.bf16.mxu0 %v7269_v51  ;;  %v7872_v51 = vpack.c.bf16 %v7868_v30, %v13087_v15 }
 0x9c2   : > { %10660 = vmatprep.subr.bf16.mxu0 %v11692_v62 }
 0x9c5   : > { %10661 = vmatpush3.bf16.msra.mxu0 %v11692_v62 }
 0x9c6   : > { %10662 = vmatprep.subr.bf16.mxu0 %v11693_v63 }
 0x9c9   : > { %10663 = vmatpush3.bf16.msra.mxu0 %v11693_v63  ;;  %v13232_v63 = vld [vmem:[#allocation13 + $0xb] ss:$0 sm:$0xff] }
 0x9ca   : > { %10664 = vmatprep.subr.bf16.mxu0 %v11694_v4 }
 0x9cd   : > { %10665 = vmatpush3.bf16.msra.mxu0 %v11694_v4 }
 0x9ce   : > { %10666 = vmatprep.subr.bf16.mxu0 %v11695_v36 }
 0x9d1   : > { %10667 = vmatpush3.bf16.msra.mxu0 %v11695_v36 }
 0x9d2   : > { %10668 = vmatprep.subr.bf16.mxu0 %v11696_v53 }
 0x9d5   : > { %10669 = vmatpush3.bf16.msra.mxu0 %v11696_v53 }
 0x9d6   : > { %10678 = vmatprep.subr.bf16.mxu0 %v11697_v49 }
 0x9d8   : > { %10671 = vmatmul.mubr.bf16.vlgmr.msra.gmra.mrb[16].mxu0 %v7270_v19 }
 0x9d9   : > { %10674 = vmatprep.mubr.bf16.mxu0 %v7271_v12  ;;  %10679 = vmatpush3.bf16.msra.mxu0 %v11697_v49 }
 0x9da   : > { %10680 = vmatprep.subr.bf16.mxu0 %v11698_v38 }
 0x9dd   : > { %10681 = vmatpush3.bf16.msra.mxu0 %v11698_v38 }
 0x9de   : > { %10682 = vmatprep.subr.bf16.mxu0 %v11699_v24 }
 0x9e0   : > { %10675 = vmatmul.mubr.bf16.gmra.mrb[20].mxu0 %v7272_v33 }
 0x9e1   : > { %10683 = vmatpush3.bf16.msra.mxu0 %v11699_v24  ;;  %10694 = vmatprep.mubr.bf16.mxu0 %v7419_v1  ;;  %v11708_v1 = vld [vmem:[#allocation12 + $0xa58] sm:$0xff]  }
 0x9e2   : > { %10684 = vmatprep.subr.bf16.mxu0 %v11700_v32 }
 0x9e5   : > { %10685 = vmatpush3.bf16.msra.mxu0 %v11700_v32 }
 0x9e6   : > { %10686 = vmatprep.subr.bf16.mxu0 %v11701_v52 }
 0x9e9   : > { %10687 = vmatpush3.bf16.msra.mxu0 %v11701_v52 }
 0x9ea   : > { %10688 = vmatprep.subr.bf16.mxu0 %v11702_v10 }
 0x9ed   : > { %10689 = vmatpush3.bf16.msra.mxu0 %v11702_v10 }
 0x9ee   : > { %10690 = vmatprep.subr.bf16.mxu0 %v11703_v18 }
 0x9f1   : > { %10691 = vmatpush3.bf16.msra.mxu0 %v11703_v18 }
 0x9f2   : > { %10692 = vmatprep.subr.bf16.mxu0 %v11704_v47 }
 0x9f5   : > { %10693 = vmatpush3.bf16.msra.mxu0 %v11704_v47 }
 0x9f6   : > { %10702 = vmatprep.subr.bf16.mxu0 %v11705_v44 }
 0x9f8   : > { %10695 = vmatmul.mubr.bf16.vlgmr.msra.gmra.mrb[16].mxu0 %v7420_v54  ;;  %v11711_v54 = vld [vmem:[#allocation12 + $0xa70] sm:$0xff]  }
 0x9f9   : > { %10698 = vmatprep.mubr.bf16.mxu0 %v7421_v2  ;;  %10703 = vmatpush3.bf16.msra.mxu0 %v11705_v44  ;;  %v11720_v2 = vld [vmem:[#allocation12 + $0xab8] sm:$0xff]  }
 0x9fa   : > { %10704 = vmatprep.subr.bf16.mxu0 %v11706_v43 }
 0x9fd   : > { %10705 = vmatpush3.bf16.msra.mxu0 %v11706_v43 }
 0x9fe   : > { %10706 = vmatprep.subr.bf16.mxu0 %v11707_v8 }
 0xa00   : > { %10699 = vmatmul.mubr.bf16.gmra.mrb[20].mxu0 %v7422_v58  ;;  %v11714_v58 = vld [vmem:[#allocation12 + $0xa88] sm:$0xff]  }
 0xa01   : > { %10707 = vmatpush3.bf16.msra.mxu0 %v11707_v8  ;;  %10718 = vmatprep.mubr.bf16.mxu0 %v7569_v46  ;;  %v11721_v46 = vld [vmem:[#allocation12 + $0xac0] sm:$0xff]  }
 0xa02   : > { %10708 = vmatprep.subr.bf16.mxu0 %v11708_v1 }
 0xa05   : > { %10709 = vmatpush3.bf16.msra.mxu0 %v11708_v1 }
 0xa06   : > { %10710 = vmatprep.subr.bf16.mxu0 %v11709_v59 }
 0xa09   : > { %10711 = vmatpush3.bf16.msra.mxu0 %v11709_v59 }
 0xa0a   : > { %10712 = vmatprep.subr.bf16.mxu0 %v11710_v6 }
 0xa0d   : > { %10713 = vmatpush3.bf16.msra.mxu0 %v11710_v6 }
 0xa0e   : > { %10714 = vmatprep.subr.bf16.mxu0 %v11711_v54 }
 0xa11   : > { %10715 = vmatpush3.bf16.msra.mxu0 %v11711_v54 }
 0xa12   : > { %10716 = vmatprep.subr.bf16.mxu0 %v11712_v13 }
 0xa15   : > { %10717 = vmatpush3.bf16.msra.mxu0 %v11712_v13 }
 0xa16   : > { %10726 = vmatprep.subr.bf16.mxu0 %v11713_v48 }
 0xa18   : > { %10719 = vmatmul.mubr.bf16.vlgmr.msra.gmra.mrb[16].mxu0 %v7570_v17  ;;  %v11719_v17 = vld [vmem:[#allocation12 + $0xab0] sm:$0xff]  }
 0xa19   : > { %10722 = vmatprep.mubr.bf16.mxu0 %v7571_v25  ;;  %10727 = vmatpush3.bf16.msra.mxu0 %v11713_v48  ;;  %v11724_v25 = vld [vmem:[#allocation12 + $0xad8] sm:$0xff]  }
 0xa1a   : > { %10728 = vmatprep.subr.bf16.mxu0 %v11714_v58 }
 0xa1d   : > { %10729 = vmatpush3.bf16.msra.mxu0 %v11714_v58 }
 0xa1e   : > { %10730 = vmatprep.subr.bf16.mxu0 %v11715_v35 }
 0xa20   : > { %10723 = vmatmul.mubr.bf16.gmra.mrb[20].mxu0 %v7572_v11  ;;  %v7722_v11 = vpack.c.bf16 %v11732_v5, %v13176_v55 }
 0xa21   : > { %10731 = vmatpush3.bf16.msra.mxu0 %v11715_v35  ;;  %10742 = vmatprep.mubr.bf16.mxu0 %v13144_v16  ;;  %v7869_v16 = vpack.c.bf16 %v7862_v60, %v13070_v20  ;;  %v7870_v20 = vpack.c.bf16 %v13084_v37, %v7863_v41 }
 0xa22   : > { %10732 = vmatprep.subr.bf16.mxu0 %v11716_v3 }
 0xa25   : > { %10733 = vmatpush3.bf16.msra.mxu0 %v11716_v3 }
 0xa26   : > { %10734 = vmatprep.subr.bf16.mxu0 %v11717_v23 }
 0xa29   : > { %10735 = vmatpush3.bf16.msra.mxu0 %v11717_v23 }
 0xa2a   : > { %10736 = vmatprep.subr.bf16.mxu0 %v11718_v40 }
 0xa2d   : > { %10737 = vmatpush3.bf16.msra.mxu0 %v11718_v40 }
 0xa2e   : > { %10738 = vmatprep.subr.bf16.mxu0 %v11719_v17 }
 0xa31   : > { %10739 = vmatpush3.bf16.msra.mxu0 %v11719_v17 }
 0xa32   : > { %10740 = vmatprep.subr.bf16.mxu0 %v11720_v2 }
 0xa35   : > { %10741 = vmatpush3.bf16.msra.mxu0 %v11720_v2 }
 0xa36   : > { %10750 = vmatprep.subr.bf16.mxu0 %v11721_v46 }
 0xa38   : > { %10743 = vmatmul.mubr.bf16.vlgmr.msra.gmra.mrb[16].mxu0 %v13150_v7  ;;  %v11726_v7 = vld [vmem:[#allocation12 + $0xae8] sm:$0xff]  }
 0xa39   : > { %10746 = vmatprep.mubr.bf16.mxu0 %v13157_v29  ;;  %10751 = vmatpush3.bf16.msra.mxu0 %v11721_v46  ;;  %v11727_v29 = vld [vmem:[#allocation12 + $0xaf0] sm:$0xff]  }
 0xa3a   : > { %10752 = vmatprep.subr.bf16.mxu0 %v11722_v28 }
 0xa3d   : > { %10753 = vmatpush3.bf16.msra.mxu0 %v11722_v28 }
 0xa3e   : > { %10754 = vmatprep.subr.bf16.mxu0 %v11723_v22 }
 0xa40   : > { %10747 = vmatmul.mubr.bf16.gmra.mrb[20].mxu0 %v7722_v11 }
 0xa41   : > { %10755 = vmatpush3.bf16.msra.mxu0 %v11723_v22  ;;  %10766 = vmatprep.mubr.bf16.mxu0 %v7869_v16 }
 0xa42   : > { %10756 = vmatprep.subr.bf16.mxu0 %v11724_v25 }
 0xa45   : > { %10757 = vmatpush3.bf16.msra.mxu0 %v11724_v25 }
 0xa46   : > { %10758 = vmatprep.subr.bf16.mxu0 %v11725_v31 }
 0xa49   : > { %10759 = vmatpush3.bf16.msra.mxu0 %v11725_v31 }
 0xa4a   : > { %10760 = vmatprep.subr.bf16.mxu0 %v11726_v7 }
 0xa4d   : > { %10761 = vmatpush3.bf16.msra.mxu0 %v11726_v7 }
 0xa4e   : > { %10762 = vmatprep.subr.bf16.mxu0 %v11727_v29 }
 0xa51   : > { %10763 = vmatpush3.bf16.msra.mxu0 %v11727_v29 }
 0xa52   : > { %10764 = vmatprep.subr.bf16.mxu0 %v11728_v0 }
 0xa55   : > { %10765 = vmatpush3.bf16.msra.mxu0 %v11728_v0 }
 0xa56   : > { %10774 = vmatprep.subr.bf16.mxu0 %v13027_v14 }
 0xa58   : > { %10767 = vmatmul.mubr.bf16.vlgmr.msra.gmra.mrb[16].mxu0 %v7870_v20 }
 0xa59   : > { %10770 = vmatprep.mubr.bf16.mxu0 %v13110_v42  ;;  %10775 = vmatpush3.bf16.msra.mxu0 %v13027_v14  ;;  %v8194_v14 = vld [vmem:[#allocation3 + $0x71] sm:$0xff] }
 0xa5a   : > { %10776 = vmatprep.subr.bf16.mxu0 %v13031_v50  ;;  %v8202_v42 = vmul.f32 12.7, %v8194_v14 }
 0xa5c   : > { %v10796_v26 = vpop.f32.mrb[40].mxu1  ;;  %v11228_v55 = vround.rtne.f32 %v8202_v42 }
 0xa5d   : > { %v8138_v39 = vpop.f32.mrb[41].mxu1  ;;  %10777 = vmatpush3.bf16.msra.mxu0 %v13031_v50  ;;  %v8192_v50 = vld [vmem:[#allocation3 + $0x51] sm:$0xff] }
 0xa5e   : > { %v10797_v62 = vpop.f32.mrb[42].mxu1  ;;  %10778 = vmatprep.subr.bf16.mxu0 %v13035_v27  ;;  %v8977_v59 = vclamps-f32 %v11228_v55, 127.0 }
 0xa5f   : > { %v8141_v37 = vpop.f32.mrb[43].mxu1 }
 0xa60   : > { %10771 = vmatmul.mubr.bf16.gmra.mrb[20].mxu0 %v7872_v51  ;;  %v8234_v46 = vmul.f32 0.07874016, %v8977_v59 }
 0xa61   : > { %10779 = vmatpush3.bf16.msra.mxu0 %v13035_v27  ;;  %10790 = vmatprep.mubr.bf16.mxu0 %v13163_v45 }
 0xa62   : > { %10780 = vmatprep.subr.bf16.mxu0 %v13039_v21 }
 0xa65   : > { %10781 = vmatpush3.bf16.msra.mxu0 %v13039_v21  ;;  %v13230_v21 = vld [vmem:[#allocation13 + $0xa] ss:$0 sm:$0xff] }
 0xa66   : > { %10782 = vmatprep.subr.bf16.mxu0 %v13045_v56 }
 0xa69   : > { %10783 = vmatpush3.bf16.msra.mxu0 %v13045_v56  ;;  %v8195_v56 = vld [vmem:[#allocation3 + $0x81] sm:$0xff] }
 0xa6a   : > { %10784 = vmatprep.subr.bf16.mxu0 %v13050_v9  ;;  %v8203_v49 = vmul.f32 12.7, %v8195_v56 }
 0xa6c   : > { %v11229_v44 = vround.rtne.f32 %v8203_v49 }
 0xa6d   : > { %10785 = vmatpush3.bf16.msra.mxu0 %v13050_v9  ;;  %v8193_v9 = vld [vmem:[#allocation3 + $0x61] sm:$0xff] }
 0xa6e   : > { %10786 = vmatprep.subr.bf16.mxu0 %v13052_v57  ;;  %v8201_v12 = vmul.f32 12.7, %v8193_v9  ;;  %v8978_v3 = vclamps-f32 %v11229_v44, 127.0 }
 0xa70   : > { %v11227_v1 = vround.rtne.f32 %v8201_v12  ;;  %v8235_v16 = vmul.f32 0.07874016, %v8978_v3 }
 0xa71   : > { %10787 = vmatpush3.bf16.msra.mxu0 %v13052_v57  ;;  %v8200_v57 = vmul.f32 12.7, %v8192_v50 }
 0xa72   : > { %10788 = vmatprep.subr.bf16.mxu0 %v13057_v34  ;;  %v8976_v17 = vclamps-f32 %v11227_v1, 127.0 }
 0xa73   : > { %v11226_v52 = vround.rtne.f32 %v8200_v57 }
 0xa74   : > { %v8233_v29 = vmul.f32 0.07874016, %v8976_v17 }
 0xa75   : > { %10789 = vmatpush3.bf16.msra.mxu0 %v13057_v34  ;;  %v8975_v13 = vclamps-f32 %v11226_v52, 127.0 }
 0xa77   : > { %v8232_v60 = vmul.f32 0.07874016, %v8975_v13 }
 0xa78   : > { %10791 = vmatmul.mubr.bf16.vlgmr.msra.gmra.mrb[16].mxu0 %v13167_v61 }
 0xb33   : > { %v10772_v27 = vpop.f32.mrb[20].mxu0 }
 0xb34   : > { %v10822_v15 = vadd.f32 %v10796_v26, %v10772_v27  ;;  %v7988_v45 = vpop.f32.mrb[21].mxu0  ;;  %v8191_v27 = vld [vmem:[#allocation3 + $0x41] sm:$0xff] }
 0xb35   : > { %v10823_v4 = vadd.f32 %v8138_v39, %v7988_v45  ;;  %v10773_v36 = vpop.f32.mrb[22].mxu0  ;;  %v8190_v39 = vld [vmem:[#allocation3 + $0x31] sm:$0xff]  ;;  %v8189_v45 = vld [vmem:[#allocation3 + $0x21] sm:$0xff] }
 0xb36   : > { %v8173_v53 = vmul.f32 %v10822_v15, %v13230_v21  ;;  %v10824_v34 = vadd.f32 %v10797_v62, %v10773_v36  ;;  %v7991_v61 = vpop.f32.mrb[23].mxu0  ;;  %v8198_v42 = vmul.f32 12.7, %v8190_v39 }
 0xb37   : > { %v8171_v19 = vmul.f32 %v10823_v4, %v13230_v21  ;;  %v10825_v38 = vadd.f32 %v8141_v37, %v7991_v61  ;;  %v8188_v37 = vld [vmem:[#allocation3 + $0x11] sm:$0xff] }
 0xb38   : > { %v8186_v24 = vadd.f32 %v13232_v63, %v8173_v53  ;;  %v8174_v33 = vmul.f32 %v10824_v34, %v13230_v21  ;;  %v8196_v57 = vmul.f32 12.7, %v8188_v37  ;;  %v8199_v34 = vmul.f32 12.7, %v8191_v27 }
 0xb39   : > { %v8184_v32 = vadd.f32 %v13232_v63, %v8171_v19  ;;  %v8172_v10 = vmul.f32 %v10825_v38, %v13230_v21  ;;  %v8197_v38 = vmul.f32 12.7, %v8189_v45 }
 0xb3a   : > { %v8242_v18 = vmul.f32 12.7, %v8186_v24  ;;  %v8187_v47 = vadd.f32 %v13232_v63, %v8174_v33  ;;  %v11224_v33 = vround.rtne.f32 %v8198_v42  ;;  %v11225_v59 = vround.rtne.f32 %v8199_v34 }
 0xb3b   : > { %v8240_v43 = vmul.f32 12.7, %v8184_v32  ;;  %v8185_v8 = vadd.f32 %v13232_v63, %v8172_v10 }
 0xb3c   : > { %v11236_v6 = vround.rtne.f32 %v8242_v18  ;;  %v8243_v54 = vmul.f32 12.7, %v8187_v47  ;;  %v11222_v47 = vround.rtne.f32 %v8196_v57 }
 0xb3d   : > { %v11234_v48 = vround.rtne.f32 %v8240_v43  ;;  %v8241_v58 = vmul.f32 12.7, %v8185_v8 }
 0xb3e   : > { %v8985_v35 = vclamps-f32 %v11236_v6, 127.0  ;;  %v11237_v23 = vround.rtne.f32 %v8243_v54 }
 0xb3f   : > { %v8983_v40 = vclamps-f32 %v11234_v48, 127.0  ;;  %v11235_v2 = vround.rtne.f32 %v8241_v58  ;;  %v11223_v58 = vround.rtne.f32 %v8197_v38 }
 0xb40   : > { %v8274_v28 = vmul.f32 0.07874016, %v8985_v35  ;;  %v8986_v22 = vclamps-f32 %v11237_v23, 127.0 }
 0xb41   : > { %v8272_v5 = vmul.f32 0.07874016, %v8983_v40  ;;  %v8984_v11 = vclamps-f32 %v11235_v2, 127.0 }
 0xb42   : > { %v8282_v25 = vadd.f32 %v8274_v28, %v8234_v46  ;;  %v8275_v31 = vmul.f32 0.07874016, %v8986_v22 }
 0xb43   : > { %v8280_v7 = vadd.f32 %v8272_v5, %v8232_v60  ;;  %v8273_v0 = vmul.f32 0.07874016, %v8984_v11  ;;  %v8973_v60 = vclamps-f32 %v11224_v33, 127.0 }
 0xb44   : > { %v8290_v41 = vmax.f32 %v8282_v25, 0.0  ;;  %v8283_v20 = vadd.f32 %v8275_v31, %v8235_v16  ;;  %v8971_v16 = vclamps-f32 %v11222_v47, 127.0 }
 0xb45   : > { %v8288_v30 = vmax.f32 %v8280_v7, 0.0  ;;  %v8281_v26 = vadd.f32 %v8273_v0, %v8233_v29  ;;  %v8974_v29 = vclamps-f32 %v11225_v59, 127.0 }
 0xb46   : > { %v8298_v62 = vmul.f32 2.0, %v8290_v41  ;;  %v8291_v51 = vmax.f32 %v8283_v20, 0.0  ;;  %v8972_v20 = vclamps-f32 %v11223_v58, 127.0 }
 0xb47   : > { %v8296_v14 = vmul.f32 2.0, %v8288_v30  ;;  %v8289_v50 = vmax.f32 %v8281_v26, 0.0  ;;  %v8230_v30 = vmul.f32 0.07874016, %v8973_v60 }
 0xb48   : > { %v11244_v56 = vround.rtne.f32 %v8298_v62  ;;  %v8299_v15 = vmul.f32 2.0, %v8291_v51  ;;  %v8228_v62 = vmul.f32 0.07874016, %v8971_v16 }
 0xb49   : > { %v11242_v9 = vround.rtne.f32 %v8296_v14  ;;  %v8297_v4 = vmul.f32 2.0, %v8289_v50  ;;  %v8231_v50 = vmul.f32 0.07874016, %v8974_v29 }
 0xb4a   : > { %v8314_v36 = vmax.f32 %v11244_v56, 0.0  ;;  %v11245_v53 = vround.rtne.f32 %v8299_v15  ;;  %v8229_v15 = vmul.f32 0.07874016, %v8972_v20 }
 0xb4b   : > { %v8312_v49 = vmax.f32 %v11242_v9, 0.0  ;;  %v11243_v61 = vround.rtne.f32 %v8297_v4  ;;  %v10792_v19 = vpop.f32.mrb[16].mxu0 }
 0xb4c   : > { %v8322_v12 = vmin.f32 %v8314_v36, 3.0  ;;  %v8315_v24 = vmax.f32 %v11245_v53, 0.0  ;;  %v8169_v55 = vmul.f32 %v10792_v19, %v13230_v21  ;;  %v8122_v32 = vpop.f32.mrb[17].mxu0 }
 0xb4d   : > { %v8320_v52 = vmin.f32 %v8312_v49, 3.0  ;;  %v8313_v10 = vmax.f32 %v11243_v61, 0.0  ;;  %v8167_v18 = vmul.f32 %v13230_v21, %v8122_v32  ;;  %v10793_v44 = vpop.f32.mrb[18].mxu0 }
 0xb4e   : > { %v8323_v43 = vmin.f32 %v8315_v24, 3.0  ;;  %v8182_v8 = vadd.f32 %v13232_v63, %v8169_v55  ;;  %v8170_v1 = vmul.f32 %v10793_v44, %v13230_v21  ;;  %v8125_v6 = vpop.f32.mrb[19].mxu0  ;;  %v8330_v35 = vmul.f32 0.5, %v8322_v12 }
 0xb4f   : > { %v8321_v54 = vmin.f32 %v8313_v10, 3.0  ;;  %v8180_v13 = vadd.f32 %v13232_v63, %v8167_v18  ;;  %v8168_v48 = vmul.f32 %v13230_v21, %v8125_v6  ;;  %v8328_v17 = vmul.f32 0.5, %v8320_v52 }
 0xb50   : > { %v8331_v3 = vmul.f32 0.5, %v8323_v43  ;;  %v8238_v23 = vmul.f32 12.7, %v8182_v8  ;;  %v8183_v40 = vadd.f32 %v13232_v63, %v8170_v1 }
 0xb51   : > { %v8329_v2 = vmul.f32 0.5, %v8321_v54  ;;  %v8236_v46 = vmul.f32 12.7, %v8180_v13  ;;  %v8181_v28 = vadd.f32 %v13232_v63, %v8168_v48 }
 0xb52   : > { %v9029_v22 = vpack.c.bf16 %v8331_v3, %v8330_v35  ;;  %v11232_v5 = vround.rtne.f32 %v8238_v23  ;;  %v8239_v11 = vmul.f32 12.7, %v8183_v40 }
 0xb53   : > { %v9024_v25 = vpack.c.bf16 %v8329_v2, %v8328_v17  ;;  %v11230_v31 = vround.rtne.f32 %v8236_v46  ;;  %v8237_v21 = vmul.f32 12.7, %v8181_v28 }
 0xb54   : > { %9033 = vst [vmem:[%s13251_s27 + $0x18] sm:$0xff] %v9029_v22   ;;  %v8981_v7 = vclamps-f32 %v11232_v5, 127.0  ;;  %v11233_v0 = vround.rtne.f32 %v8239_v11 }
 0xb55   : > { %9032 = vst [vmem:[%s13251_s27 + $0x10] sm:$0xff] %v9024_v25   ;;  %v8979_v41 = vclamps-f32 %v11230_v31, 127.0  ;;  %v11231_v63 = vround.rtne.f32 %v8237_v21 }
 0xb56   : > { %v8270_v26 = vmul.f32 0.07874016, %v8981_v7  ;;  %v8982_v39 = vclamps-f32 %v11233_v0, 127.0 }
 0xb57   : > { %v8268_v51 = vmul.f32 0.07874016, %v8979_v41  ;;  %v8980_v37 = vclamps-f32 %v11231_v63, 127.0 }
 0xb58   : > { %v8278_v14 = vadd.f32 %v8270_v26, %v8230_v30  ;;  %v8271_v27 = vmul.f32 0.07874016, %v8982_v39 }
 0xb59   : > { %v8276_v56 = vadd.f32 %v8268_v51, %v8228_v62  ;;  %v8269_v42 = vmul.f32 0.07874016, %v8980_v37 }
 0xb5a   : > { %v8286_v45 = vmax.f32 %v8278_v14, 0.0  ;;  %v8279_v9 = vadd.f32 %v8271_v27, %v8231_v50 }
 0xb5b   : > { %v8284_v4 = vmax.f32 %v8276_v56, 0.0  ;;  %v8277_v57 = vadd.f32 %v8269_v42, %v8229_v15 }
 0xb5c   : > { %v8294_v36 = vmul.f32 2.0, %v8286_v45  ;;  %v8287_v53 = vmax.f32 %v8279_v9, 0.0 }
 0xb5d   : > { %v8292_v34 = vmul.f32 2.0, %v8284_v4  ;;  %v8285_v49 = vmax.f32 %v8277_v57, 0.0 }
 0xb5e   : > { %v11240_v61 = vround.rtne.f32 %v8294_v36  ;;  %v8295_v19 = vmul.f32 2.0, %v8287_v53 }
 0xb5f   : > { %v11238_v38 = vround.rtne.f32 %v8292_v34  ;;  %v8293_v12 = vmul.f32 2.0, %v8285_v49 }
 0xb60   : > { %v8310_v24 = vmax.f32 %v11240_v61, 0.0  ;;  %v11241_v55 = vround.rtne.f32 %v8295_v19 }
 0xb61   : > { %v8308_v33 = vmax.f32 %v11238_v38, 0.0  ;;  %v11239_v32 = vround.rtne.f32 %v8293_v12 }
 0xb62   : > { %v8318_v52 = vmin.f32 %v8310_v24, 3.0  ;;  %v8311_v10 = vmax.f32 %v11241_v55, 0.0 }
 0xb63   : > { %v8316_v18 = vmin.f32 %v8308_v33, 3.0  ;;  %v8309_v47 = vmax.f32 %v11239_v32, 0.0 }
 0xb64   : > { %v8319_v44 = vmin.f32 %v8311_v10, 3.0  ;;  %v8326_v8 = vmul.f32 0.5, %v8318_v52 }
 0xb65   : > { %v8317_v43 = vmin.f32 %v8309_v47, 3.0  ;;  %v8324_v59 = vmul.f32 0.5, %v8316_v18 }
 0xb66   : > { %v8327_v1 = vmul.f32 0.5, %v8319_v44 }
 0xb67   : > { %v8325_v6 = vmul.f32 0.5, %v8317_v43 }
 0xb68   : > { %v9019_v54 = vpack.c.bf16 %v8327_v1, %v8326_v8 }
 0xb69   : > { %v9014_v13 = vpack.c.bf16 %v8325_v6, %v8324_v59 }
 0xb6a   : > { %9031 = vst [vmem:[%s13251_s27 + $0x8] sm:$0xff] %v9019_v54  }
 0xb6b   : > { %9015 = vst [vmem:[%s13251_s27] sm:$0xff] %v9014_v13  }
 0xb6c   : > { %11918 = shalt.err (!%p11915_p8)
}
 0xb6d   : > { %s11919_s0 = scalar_lea.hbm %s13260_s3, 512  ;;  %s11923_s8 = scalar_lea.hbm %s13314_s6, 1024 }
 0xb6e   : > { %p11920_p11 = scmp.ne.s32.totalorder %s13260_s3, %s11919_s0  ;;  %p11924_p1 = scmp.lt.u32.totalorder %s13260_s3, %s13314_s6 }
 0xb6f   : > { %p11925_p2 = scmp.lt.u32.totalorder %s11923_s8, %s11919_s0  ;;  %p11927_p0 = scmp.lt.u32.totalorder %s11919_s0, %s13260_s3 }
 0xb70   : > { %p11921_p7 = pnand %p11920_p11, %p12209_p3 }
 0xb71   : > { %p11926_p13 = por %p11925_p2, %p11924_p1 }
 0xb72   : > { %p11922_p12 = pneg %p11921_p7 }
 0xb73   : > { %p11928_p4 = por %p11927_p0, %p11926_p13 }
 0xb75   : > { %p11929_p6 = pnand %p11928_p4, %p11922_p12 }
 0xb77   : > { %11932 = shalt.err (!%p11929_p6)
}
 0xb78   : > { %s12001_s7 = smov 64   ;;  %s12002_s27 = smov 4  }
 0xb79   : > { %11266 = dma.vmem_to_hbm [thread:$0]  (%p12209_p3), %s13262_s18, 512, %s13260_s3, %s8373_s25, %s12001_s7, %s12001_s7, %s12002_s27  }
 0xb7a PF: > { %s8401_s12 = sand.u32 1, %s11975_s21   ;;  %p13346_p10 = scmp.ne.s32.totalorder %s13326_s28, 0 }
 0xb7b   : > { %p13347_p5 = scmp.ge.s32.totalorder %s11987_s24, 2  ;;  %s8402_s17 = scalar_lea.sflag [#allocation6], %s8401_s12 }
 0xb7d   : > { %p11289_p9 = pnand %p13347_p5, %p13346_p10 }
 0xb7f   : > { %11970 = dma.done.wait (!%p11289_p9), %s8402_s17, 512  }
 0xb80   : > { %11972 = vsyncadd (!%p11289_p9), %s8402_s17, 4294966784  ;;  %p24_p8 = scmp.ge.s32.totalorder %s12196_s15, 4   ;;  %s13348_s21 = smov %s11979_s22 }
 0xb81   : > { %s13349_s22 = smov %s11983_s23  ;;  %s13350_s23 = smov %s12205_s19 }
 0xb82   : > { %s13351_s24 = smov %s12196_s15  ;;  %26 = sbr.rel (!%p24_p8) target bundleno = 13 (0xd), region = 172 }
 0xb89   :  { %8407 = vsyncpa [#allocation5], 1 }
 0xb8a   :  { %8409 = vsyncpa [#allocation5 + $0x1], 1 }
 0xb8b   :  { %8410 = vsyncpa [#allocation8], 1 }
 0xb8c   :  { %8412 = vsyncpa [#allocation8 + $0x1], 1 }
 0xb8d   :  { %8413 = vsyncpa [#allocation11], 1 }
 0xb8e   :  { %8414 = vsyncpa [#allocation14], 1 }
 0xb8f   :  { %8415 = vsyncpa [#allocation6], 1 }
 0xb90   :  { %8417 = vsyncpa [#allocation6 + $0x1], 1 }

</bundles_post_ra>
